<compile_context>
chip_gen: v5e
topology: v5e:2x2
jax: 0.10.0
libtpu: 0.0.40
codegen_flags: <defaults>
</compile_context>

<pallas_src>
import functools

import numpy as np
import jax
import jax.numpy as jnp
from jax import lax
from jax.experimental import pallas as pl
from jax.experimental.pallas import tpu as pltpu

F32 = jnp.float32
BF16 = jnp.bfloat16

# Order of the structural-constant inputs (must match kernel signature).
_CONST_ORDER = ("attr_coarse", "R0", "G00", "G01", "G01p", "S00", "S01",
                "G10", "S11", "Gf", "Gfp", "Gc", "SfT", "ScT")


def _mm(a, b):
    """MXU matmul: bf16 operands, f32 accumulation (astype is a no-op if already bf16)."""
    return jnp.dot(a.astype(BF16), b.astype(BF16), preferred_element_type=F32)


def _relu(x):
    return jnp.maximum(x, 0.0)


# --------------------------- fused forward kernel ---------------------------

def _fused_forward_kernel(treedef,
                          x0f_ref, eattr0_ref, attrc_ref,
                          r0_ref, g00_ref, g01_ref, g01p_ref, s00_ref, s01_ref,
                          g10_ref, s11_ref, gf_ref, gfp_ref, gc_ref, sft_ref, sct_ref,
                          *rest):
    *param_refs, out_ref, out_r_ref = rest
    prm = jax.tree_util.tree_unflatten(treedef, list(param_refs))
    prm = jax.tree_util.tree_map(lambda r: r[...], prm)   # load all params (tiny)

    x0f = x0f_ref[...]              # [n0, 1]  fine node features (f32)
    eraw = eattr0_ref[...]          # [E0, 2]  fine edge attributes (f32)
    attrc = attrc_ref[...]          # [E1, 1]  coarse edge attributes (f32)
    # Structural 0/1 matrices arrive as bf16 (lossless) -> no per-use casts.
    R0 = r0_ref[...]                # [n1, n0] restriction
    G00, G01 = g00_ref[...], g01_ref[...]   # [E0, n0] gather by ei0[0] / ei0[1]
    G01p = g01p_ref[...]            # [E0, n0_pad] ei0[1] one-hot, lane-padded to 128
    S00, S01 = s00_ref[...], s01_ref[...]   # [n0, E0] scatter to ei0[0] / ei0[1]
    G10, S11 = g10_ref[...], s11_ref[...]   # [E1, n1], [n1, E1]
    Gf, Gc = gf_ref[...], gc_ref[...]       # [Ef2c, n0], [Ef2c, n1]
    Gfp = gfp_ref[...]              # [Ef2c, n0_pad]
    SfT, ScT = sft_ref[...], sct_ref[...]   # [n0, Ef2c], [n1, Ef2c]

    # ---- building blocks (everything stays resident in vregs/VMEM) ----
    def lin(x, wb, relu=False):
        w, b = wb
        y = _mm(x, w) + b
        return _relu(y) if relu else y

    def lift(x1, wb, relu=True):
        # Linear(1, d): K == 1 -> VPU broadcast instead of a degenerate matmul.
        w, b = wb
        y = x1 * w + b
        return _relu(y) if relu else y

    def lin2_vpu(x2, wb, relu=True):
        # Linear(2, d): K == 2 -> two VPU broadcasts (no degenerate MXU push).
        w, b = wb
        y = x2[:, 0:1] * w[0:1, :] + x2[:, 1:2] * w[1:2, :] + b
        return _relu(y) if relu else y

    def mlp3_scalar_in(x1, layers):     # Linear(1,d) ReLU Linear(d,d) ReLU Linear(d,·)
        l1, l2, l3 = layers
        h = lift(x1, l1, relu=True)
        h = lin(h, l2, relu=True)
        return lin(h, l3)

    def tagconv(Aw_b, x, p):
        # TAGConv(K=2, normalize=False): x W0 + (A x) W1 + (A^2 x) W2 + b
        # Kept as accumulated matmuls (see K-merge note in the header); each
        # operand is cast to bf16 exactly once.
        w0, w1, w2, b = p
        x_b = x.astype(BF16)
        xa_b = _mm(Aw_b, x_b).astype(BF16)
        xaa_b = _mm(Aw_b, xa_b).astype(BF16)
        return _mm(x_b, w0) + _mm(xa_b, w1) + _mm(xaa_b, w2) + b

    def plainmp(xi_g, xj_g, S, p):
        # msg = Lin2(ReLU(Lin1(cat(x_i, x_j)))); aggr='add' over target nodes.
        # cat(x_i,x_j) @ W1 computed as x_i @ W1[:d] + x_j @ W1[d:] (identical).
        w1i, w1j, b1, w2, b2 = p
        h = _relu(_mm(xi_g, w1i) + _mm(xj_g, w1j) + b1)
        msg = _mm(h, w2) + b2
        return _mm(S, msg)

    def inorm(x, eps=1e-5):
        # torch_geometric InstanceNorm (affine=False): per-channel over nodes.
        mean = jnp.mean(x, axis=0, keepdims=True)
        var = jnp.mean(jnp.square(x - mean), axis=0, keepdims=True)
        return (x - mean) * lax.rsqrt(var + eps)

    def edge_model(xs_g, xt_g, p):
        # TODO(synk): EdgeModel class not provided; assumed MLP(cat(src, dst))
        # with hidden dims [d, d//2, d//4], ReLU activations, scalar output.
        (w1s, w1t, b1), l2, l3, l4 = p
        h = _relu(_mm(xs_g, w1s) + _mm(xt_g, w1t) + b1)
        h = lin(h, l2, relu=True)
        h = lin(h, l3, relu=True)
        return lin(h, l4)                                   # [E, 1] (kernel-internal)

    # ---- forward ----
    # pre_edge_main on fine edge attributes  [E0,2] -> [E0,1]  (first layer on VPU)
    m1, m2, m3 = prm["pre_edge_main"]
    h = lin2_vpu(eraw, m1, relu=True)
    h = lin(h, m2, relu=True)
    attr0 = lin(h, m3)

    # make_graph (K_means_agg_torch): coarse node features = R0 @ X (unnormalized).
    # Exact f32 dot (tiny shapes) instead of a degenerate bf16 N=1 MXU pass.
    x1f = jnp.dot(R0.astype(F32), x0f, preferred_element_type=F32)   # [n1, 1]

    # pre_node / pre_edge on both levels
    x0 = mlp3_scalar_in(x0f, prm["pre_node"])                    # [n0, d]
    x1 = mlp3_scalar_in(x1f, prm["pre_node"])                    # [n1, d]
    ea0 = mlp3_scalar_in(attr0, prm["pre_edge"]).astype(BF16)    # [E0, 1]
    ea1 = mlp3_scalar_in(attrc, prm["pre_edge"]).astype(BF16)    # [E1, 1]

    # dense weighted adjacencies A[dst, src] = w_e (scatter-add as one-hot matmul)
    A0w_b = _mm(S01, ea0 * G00).astype(BF16)     # [n0, n0]; cast once, reused 4x
    A1w_b = _mm(S11, ea1 * G10).astype(BF16)     # [n1, n1]; cast once, reused 2x

    # single U-cycle: num_layers=1, lvl=2
    x_ff0 = tagconv(A0w_b, x0, prm["conv_down"])                               # convs_down L0
    x_ff1 = plainmp(_mm(Gc, x1), _mm(Gf, x_ff0.astype(BF16)), ScT, prm["f2c"]) # f2c L0->L1
    x_ff1 = tagconv(A1w_b, x_ff1, prm["coarsest"])                             # coarsest  L1
    x_ff0n_b = inorm(x_ff0).astype(BF16)
    x_ff1_b = inorm(x_ff1).astype(BF16)          # reused: c2f gather + coarse head
    x_ff0 = plainmp(_mm(Gf, x_ff0n_b), _mm(Gc, x_ff1_b), SfT, prm["c2f"])      # c2f L1->L0
    x_ff0 = tagconv(A0w_b, x_ff0, prm["conv_up"])                              # convs_up  L0

    # output heads
    x_coarse = lin(x_ff1_b, prm["linear_out_coarse"])
    x_fine_b = lin(x_ff0, prm["linear_out"]).astype(BF16)    # cast once, 3 gather reuses

    # restriction-operator edges ('L1' -> 'L0'): (coarse, fine) pairs
    attr_r = edge_model(_mm(Gc, x_coarse), _mm(Gf, x_fine_b), prm["edge_model_R"])
    out_r = _mm(ScT, attr_r.astype(BF16) * Gfp)              # [n1, n0_pad] lane-dense
    # Both train and eval branches of the reference divide columns by their sum.
    # TODO(synk): no zero-sum guard in the PyTorch code either; padded (all-zero)
    # lanes become NaN here and are sliced off in the wrapper.
    out_r = out_r / jnp.sum(out_r, axis=0, keepdims=True)

    # prolongation-mask edges among fine nodes (mask_edges == nonzero(A))
    attr_p = edge_model(_mm(G00, x_fine_b), _mm(G01, x_fine_b), prm["edge_model"])
    out = _mm(S00, attr_p.astype(BF16) * G01p)               # [n0, n0_pad] lane-dense

    out_ref[...] = out
    out_r_ref[...] = out_r


# --------------------------- wrapper -----------------------------------------

def _flops_estimate(n0, n1, n0p, e0, e1, ef2c, d):
    mm = lambda m, k, n: 2 * m * k * n
    fl = 0
    # pre-MLPs (edges + nodes, both levels)
    fl += mm(e0, 2, d) + mm(e0, d, d) + mm(e0, d, 1)
    fl += mm(e0, 1, d) + mm(e0, d, d) + mm(e0, d, 1)
    fl += mm(e1, 1, d) + mm(e1, d, d) + mm(e1, d, 1)
    fl += mm(n0, 1, d) + mm(n0, d, d) + mm(n0, d, d)
    fl += mm(n1, 1, d) + mm(n1, d, d) + mm(n1, d, d)
    # dense adjacency scatters
    fl += mm(n0, e0, n0) + mm(n1, e1, n1)
    # TAGConvs (2 fine + 1 coarse): 2 A-matmuls + 3 weight matmuls each
    fl += 2 * (2 * mm(n0, n0, d) + 3 * mm(n0, d, d))
    fl += 2 * mm(n1, n1, d) + 3 * mm(n1, d, d)
    # PlainMP f2c + c2f: 2 gathers + 2 MLP matmuls + 1 scatter each
    fl += 2 * (mm(ef2c, n0, d) + mm(ef2c, n1, d) + 2 * mm(ef2c, d, d)
               + mm(max(n0, n1), ef2c, d))
    # output heads
    fl += mm(n0, d, d) + mm(n1, d, d)
    # edge models (2 gathers + 4 MLP layers each) + lane-dense output scatters
    for e in (e0, ef2c):
        fl += (2 * mm(e, n0, d) + 2 * mm(e, d, d) + mm(e, d, d // 2)
               + mm(e, d // 2, d // 4) + mm(e, d // 4, 1))
    fl += mm(n0, e0, n0p) + mm(n1, ef2c, n0p)
    return int(fl)


def make_forward(graph, train=True):
    del train  # train/eval both column-normalize out_R; same math is applied.
    # Structural 0/1 matrices are exact in bf16 -> store them as bf16 (halves
    # DMA/VMEM bytes and removes per-use casts); attr_coarse stays f32 (data).
    consts = {k: jnp.asarray(graph["consts"][k],
                             F32 if k == "attr_coarse" else BF16)
              for k in _CONST_ORDER}
    n0, n1, n0p = graph["n_fine"], graph["n_coarse"], graph["n_fine_pad"]
    e0, e1, ef2c = graph["n_edges0"], graph["n_edges1"], graph["n_f2c"]
    vmem_spec = pl.BlockSpec(memory_space=pltpu.MemorySpace.VMEM)

    const_args = [consts[k] for k in _CONST_ORDER]
    const_bytes = sum(int(c.size) * c.dtype.itemsize for c in const_args)
    out_bytes = (n0 * n0p + n1 * n0p) * 4

    @jax.jit
    def forward(params, x0_feat, edge_attr0_raw):
        flat_params, treedef = jax.tree_util.tree_flatten(params)
        d = params["pre_node"][1][0].shape[0]
        param_bytes = sum(int(np.prod(p.shape)) * p.dtype.itemsize
                          for p in flat_params)
        in_bytes = (int(x0_feat.size) * x0_feat.dtype.itemsize
                    + int(edge_attr0_raw.size) * edge_attr0_raw.dtype.itemsize)
        footprint = int(const_bytes + out_bytes + param_bytes + in_bytes)
        # Explicit scoped-VMEM ceiling: above v5e/v6e defaults (16/32 MiB),
        # below v7x's 64 MiB physical.
        vmem_limit = int(min(max(4 * footprint, 32 * 2**20), 48 * 2**20))
        cost = pl.CostEstimate(
            flops=_flops_estimate(n0, n1, n0p, e0, e1, ef2c, d),
            transcendentals=2 * d,        # rsqrt in the two instance norms
            bytes_accessed=footprint)

        n_inputs = 2 + len(const_args) + len(flat_params)
        kernel = functools.partial(_fused_forward_kernel, treedef)
        out_pad, out_r_pad = pl.pallas_call(
            kernel,
            out_shape=(jax.ShapeDtypeStruct((n0, n0p), F32),
                       jax.ShapeDtypeStruct((n1, n0p), F32)),
            in_specs=[vmem_spec] * n_inputs,
            out_specs=(vmem_spec, vmem_spec),
            compiler_params=pltpu.CompilerParams(vmem_limit_bytes=vmem_limit),
            cost_estimate=cost,
        )(x0_feat, edge_attr0_raw, *const_args, *flat_params)
        # Padded lanes (columns >= n0) only existed for full-width stores.
        return out_pad[:, :n0], out_r_pad[:, :n0]

    return forward


# --------------------------- parameters --------------------------------------

def init_params(key, d):
    keys = iter(jax.random.split(key, 64))

    def lin(fi, fo):
        k1, k2 = jax.random.split(next(keys))
        bound = 1.0 / np.sqrt(fi)
        w = jax.random.uniform(k1, (fi, fo), F32, -bound, bound)
        b = jax.random.uniform(k2, (1, fo), F32, -bound, bound)
        return (w, b)

    def tag(din, dout):                      # TAGConv K=2: 3 weights + 1 bias
        bound = 1.0 / np.sqrt(din)
        ws = tuple(jax.random.uniform(next(keys), (din, dout), F32, -bound, bound)
                   for _ in range(3))
        b = jax.random.uniform(next(keys), (1, dout), F32, -bound, bound)
        return (*ws, b)

    def mp(dim):                             # PlainMP: Lin(2d,d) ReLU Lin(d,d)
        w1, b1 = lin(2 * dim, dim)
        w2, b2 = lin(dim, dim)
        return (w1[:dim], w1[dim:], b1, w2, b2)   # Lin1 pre-split for cat(x_i, x_j)

    def em(dim):                             # assumed EdgeModel MLP
        w1, b1 = lin(2 * dim, dim)
        return ((w1[:dim], w1[dim:], b1), lin(dim, dim // 2),
                lin(dim // 2, dim // 4), lin(dim // 4, 1))

    return {
        "pre_edge_main": (lin(2, d), lin(d, d), lin(d, 1)),
        "pre_edge": (lin(1, d), lin(d, d), lin(d, 1)),
        "pre_node": (lin(1, d), lin(d, d), lin(d, d)),
        "conv_down": tag(d, d),
        "conv_up": tag(d, d),
        "coarsest": tag(d, d),
        "f2c": mp(d),
        "c2f": mp(d),
        "linear_out": lin(d, d),
        "linear_out_coarse": lin(d, d),
        "edge_model": em(d),
        "edge_model_R": em(d),
    }


# --------------------------- synthetic graph (make_graph) --------------------

def build_graph(n_fine=16, agg=2, lane_pad=128):
    # 1D periodic Laplacian as grid.A
    A = np.zeros((n_fine, n_fine), np.float64)
    for i in range(n_fine):
        A[i, i] = 2.0
        A[i, (i + 1) % n_fine] = -1.0
        A[i, (i - 1) % n_fine] = -1.0
    n_coarse = n_fine // agg
    R0 = np.zeros((n_coarse, n_fine), np.float64)            # [n_coarse, n_fine]
    for f in range(n_fine):
        R0[f // agg, f] = 1.0
    # TODO(synk): Lloyd aggregation (pyamg) replaced with deterministic blocks.
    ei0 = np.stack(np.nonzero(A)).astype(np.int64)            # [2, E0] fine-fine
    A_coarse = R0 @ A @ R0.T
    ei1 = np.stack(np.nonzero(A_coarse)).astype(np.int64)     # [2, E1] coarse-coarse
    attr_coarse = A_coarse[A_coarse != 0.0].reshape(-1, 1).astype(np.float32)
    f2c = np.stack(np.nonzero(R0.T)).astype(np.int64)         # [2, Ef2c] (fine, coarse)
    n_fine_pad = ((n_fine + lane_pad - 1) // lane_pad) * lane_pad

    def onehot(idx, n):
        m = np.zeros((idx.shape[0], n), np.float32)
        m[np.arange(idx.shape[0]), idx] = 1.0
        return m

    G00 = onehot(ei0[0], n_fine)       # gather rows of mask_edges / edge sources
    G01 = onehot(ei0[1], n_fine)       # gather cols of mask_edges / edge targets
    G01p = onehot(ei0[1], n_fine_pad)  # lane-padded (128) variant for the out scatter
    G10 = onehot(ei1[0], n_coarse)
    G11 = onehot(ei1[1], n_coarse)
    Gf = onehot(f2c[0], n_fine)        # fine endpoint of each f2c edge
    Gfp = onehot(f2c[0], n_fine_pad)   # lane-padded variant for the out_R scatter
    Gc = onehot(f2c[1], n_coarse)      # coarse endpoint of each f2c edge

    consts = dict(
        attr_coarse=attr_coarse,
        R0=R0.astype(np.float32),
        G00=G00, G01=G01, G01p=G01p,
        S00=np.ascontiguousarray(G00.T), S01=np.ascontiguousarray(G01.T),
        G10=G10, S11=np.ascontiguousarray(G11.T),
        Gf=Gf, Gfp=Gfp, Gc=Gc,
        SfT=np.ascontiguousarray(Gf.T), ScT=np.ascontiguousarray(Gc.T),
    )
    return dict(consts=consts, n_fine=n_fine, n_coarse=n_coarse,
                n_fine_pad=n_fine_pad, n_edges0=ei0.shape[1],
                n_edges1=ei1.shape[1], n_f2c=f2c.shape[1])


# --------------------------- driver -------------------------------------------

if __name__ == "__main__":
    dim_embed = 32
    graph = build_graph(n_fine=16, agg=2)

    key = jax.random.PRNGKey(0)
    k_par, k_x, k_e = jax.random.split(key, 3)
    params = init_params(k_par, dim_embed)

    x = jax.random.normal(k_x, (graph["n_fine"], 1), F32)            # data.x
    edge_attr = jax.random.normal(k_e, (graph["n_edges0"], 2), F32)  # data.edge_attr

    forward = make_forward(graph, train=True)
    out, out_R = forward(params, x, edge_attr)
    jax.block_until_ready((out, out_R))

    assert out.shape == (graph["n_fine"], graph["n_fine"])
    assert out_R.shape == (graph["n_coarse"], graph["n_fine"])
    print("KERNEL_OK")
</pallas_src>

<mosaic_0001>
module attributes {stable_mosaic.version = 11 : i64} {
  func.func @_fused_forward_kernel(%arg0: memref<16x1xf32, #tpu.memory_space<vmem>>, %arg1: memref<48x2xf32, #tpu.memory_space<vmem>>, %arg2: memref<24x1xf32, #tpu.memory_space<vmem>>, %arg3: memref<8x16xbf16, #tpu.memory_space<vmem>>, %arg4: memref<48x16xbf16, #tpu.memory_space<vmem>>, %arg5: memref<48x16xbf16, #tpu.memory_space<vmem>>, %arg6: memref<48x128xbf16, #tpu.memory_space<vmem>>, %arg7: memref<16x48xbf16, #tpu.memory_space<vmem>>, %arg8: memref<16x48xbf16, #tpu.memory_space<vmem>>, %arg9: memref<24x8xbf16, #tpu.memory_space<vmem>>, %arg10: memref<8x24xbf16, #tpu.memory_space<vmem>>, %arg11: memref<16x16xbf16, #tpu.memory_space<vmem>>, %arg12: memref<16x128xbf16, #tpu.memory_space<vmem>>, %arg13: memref<16x8xbf16, #tpu.memory_space<vmem>>, %arg14: memref<16x16xbf16, #tpu.memory_space<vmem>>, %arg15: memref<8x16xbf16, #tpu.memory_space<vmem>>, %arg16: memref<32x32xf32, #tpu.memory_space<vmem>>, %arg17: memref<32x32xf32, #tpu.memory_space<vmem>>, %arg18: memref<1x32xf32, #tpu.memory_space<vmem>>, %arg19: memref<32x32xf32, #tpu.memory_space<vmem>>, %arg20: memref<1x32xf32, #tpu.memory_space<vmem>>, %arg21: memref<32x32xf32, #tpu.memory_space<vmem>>, %arg22: memref<32x32xf32, #tpu.memory_space<vmem>>, %arg23: memref<32x32xf32, #tpu.memory_space<vmem>>, %arg24: memref<1x32xf32, #tpu.memory_space<vmem>>, %arg25: memref<32x32xf32, #tpu.memory_space<vmem>>, %arg26: memref<32x32xf32, #tpu.memory_space<vmem>>, %arg27: memref<32x32xf32, #tpu.memory_space<vmem>>, %arg28: memref<1x32xf32, #tpu.memory_space<vmem>>, %arg29: memref<32x32xf32, #tpu.memory_space<vmem>>, %arg30: memref<32x32xf32, #tpu.memory_space<vmem>>, %arg31: memref<32x32xf32, #tpu.memory_space<vmem>>, %arg32: memref<1x32xf32, #tpu.memory_space<vmem>>, %arg33: memref<32x32xf32, #tpu.memory_space<vmem>>, %arg34: memref<32x32xf32, #tpu.memory_space<vmem>>, %arg35: memref<1x32xf32, #tpu.memory_space<vmem>>, %arg36: memref<32x16xf32, #tpu.memory_space<vmem>>, %arg37: memref<1x16xf32, #tpu.memory_space<vmem>>, %arg38: memref<16x8xf32, #tpu.memory_space<vmem>>, %arg39: memref<1x8xf32, #tpu.memory_space<vmem>>, %arg40: memref<8x1xf32, #tpu.memory_space<vmem>>, %arg41: memref<1x1xf32, #tpu.memory_space<vmem>>, %arg42: memref<32x32xf32, #tpu.memory_space<vmem>>, %arg43: memref<32x32xf32, #tpu.memory_space<vmem>>, %arg44: memref<1x32xf32, #tpu.memory_space<vmem>>, %arg45: memref<32x16xf32, #tpu.memory_space<vmem>>, %arg46: memref<1x16xf32, #tpu.memory_space<vmem>>, %arg47: memref<16x8xf32, #tpu.memory_space<vmem>>, %arg48: memref<1x8xf32, #tpu.memory_space<vmem>>, %arg49: memref<8x1xf32, #tpu.memory_space<vmem>>, %arg50: memref<1x1xf32, #tpu.memory_space<vmem>>, %arg51: memref<32x32xf32, #tpu.memory_space<vmem>>, %arg52: memref<32x32xf32, #tpu.memory_space<vmem>>, %arg53: memref<1x32xf32, #tpu.memory_space<vmem>>, %arg54: memref<32x32xf32, #tpu.memory_space<vmem>>, %arg55: memref<1x32xf32, #tpu.memory_space<vmem>>, %arg56: memref<32x32xf32, #tpu.memory_space<vmem>>, %arg57: memref<1x32xf32, #tpu.memory_space<vmem>>, %arg58: memref<32x32xf32, #tpu.memory_space<vmem>>, %arg59: memref<1x32xf32, #tpu.memory_space<vmem>>, %arg60: memref<1x32xf32, #tpu.memory_space<vmem>>, %arg61: memref<1x32xf32, #tpu.memory_space<vmem>>, %arg62: memref<32x32xf32, #tpu.memory_space<vmem>>, %arg63: memref<1x32xf32, #tpu.memory_space<vmem>>, %arg64: memref<32x1xf32, #tpu.memory_space<vmem>>, %arg65: memref<1x1xf32, #tpu.memory_space<vmem>>, %arg66: memref<2x32xf32, #tpu.memory_space<vmem>>, %arg67: memref<1x32xf32, #tpu.memory_space<vmem>>, %arg68: memref<32x32xf32, #tpu.memory_space<vmem>>, %arg69: memref<1x32xf32, #tpu.memory_space<vmem>>, %arg70: memref<32x1xf32, #tpu.memory_space<vmem>>, %arg71: memref<1x1xf32, #tpu.memory_space<vmem>>, %arg72: memref<1x32xf32, #tpu.memory_space<vmem>>, %arg73: memref<1x32xf32, #tpu.memory_space<vmem>>, %arg74: memref<32x32xf32, #tpu.memory_space<vmem>>, %arg75: memref<1x32xf32, #tpu.memory_space<vmem>>, %arg76: memref<32x32xf32, #tpu.memory_space<vmem>>, %arg77: memref<1x32xf32, #tpu.memory_space<vmem>>, %arg78: memref<16x128xf32, #tpu.memory_space<vmem>>, %arg79: memref<8x128xf32, #tpu.memory_space<vmem>>) attributes {dimension_semantics = [], scalar_prefetch = 0 : i64, scratch_operands = 0 : i64, tpu.core_type = #tpu.core_type<tc>} {
    %c0 = arith.constant 0 : index
    %c0_0 = arith.constant 0 : index
    %0 = vector.load %arg16[%c0, %c0_0] : memref<32x32xf32, #tpu.memory_space<vmem>>, vector<32x32xf32>
    %c0_1 = arith.constant 0 : index
    %c0_2 = arith.constant 0 : index
    %1 = vector.load %arg17[%c0_1, %c0_2] : memref<32x32xf32, #tpu.memory_space<vmem>>, vector<32x32xf32>
    %c0_3 = arith.constant 0 : index
    %c0_4 = arith.constant 0 : index
    %2 = vector.load %arg18[%c0_3, %c0_4] : memref<1x32xf32, #tpu.memory_space<vmem>>, vector<1x32xf32>
    %c0_5 = arith.constant 0 : index
    %c0_6 = arith.constant 0 : index
    %3 = vector.load %arg19[%c0_5, %c0_6] : memref<32x32xf32, #tpu.memory_space<vmem>>, vector<32x32xf32>
    %c0_7 = arith.constant 0 : index
    %c0_8 = arith.constant 0 : index
    %4 = vector.load %arg20[%c0_7, %c0_8] : memref<1x32xf32, #tpu.memory_space<vmem>>, vector<1x32xf32>
    %c0_9 = arith.constant 0 : index
    %c0_10 = arith.constant 0 : index
    %5 = vector.load %arg21[%c0_9, %c0_10] : memref<32x32xf32, #tpu.memory_space<vmem>>, vector<32x32xf32>
    %c0_11 = arith.constant 0 : index
    %c0_12 = arith.constant 0 : index
    %6 = vector.load %arg22[%c0_11, %c0_12] : memref<32x32xf32, #tpu.memory_space<vmem>>, vector<32x32xf32>
    %c0_13 = arith.constant 0 : index
    %c0_14 = arith.constant 0 : index
    %7 = vector.load %arg23[%c0_13, %c0_14] : memref<32x32xf32, #tpu.memory_space<vmem>>, vector<32x32xf32>
    %c0_15 = arith.constant 0 : index
    %c0_16 = arith.constant 0 : index
    %8 = vector.load %arg24[%c0_15, %c0_16] : memref<1x32xf32, #tpu.memory_space<vmem>>, vector<1x32xf32>
    %c0_17 = arith.constant 0 : index
    %c0_18 = arith.constant 0 : index
    %9 = vector.load %arg25[%c0_17, %c0_18] : memref<32x32xf32, #tpu.memory_space<vmem>>, vector<32x32xf32>
    %c0_19 = arith.constant 0 : index
    %c0_20 = arith.constant 0 : index
    %10 = vector.load %arg26[%c0_19, %c0_20] : memref<32x32xf32, #tpu.memory_space<vmem>>, vector<32x32xf32>
    %c0_21 = arith.constant 0 : index
    %c0_22 = arith.constant 0 : index
    %11 = vector.load %arg27[%c0_21, %c0_22] : memref<32x32xf32, #tpu.memory_space<vmem>>, vector<32x32xf32>
    %c0_23 = arith.constant 0 : index
    %c0_24 = arith.constant 0 : index
    %12 = vector.load %arg28[%c0_23, %c0_24] : memref<1x32xf32, #tpu.memory_space<vmem>>, vector<1x32xf32>
    %c0_25 = arith.constant 0 : index
    %c0_26 = arith.constant 0 : index
    %13 = vector.load %arg29[%c0_25, %c0_26] : memref<32x32xf32, #tpu.memory_space<vmem>>, vector<32x32xf32>
    %c0_27 = arith.constant 0 : index
    %c0_28 = arith.constant 0 : index
    %14 = vector.load %arg30[%c0_27, %c0_28] : memref<32x32xf32, #tpu.memory_space<vmem>>, vector<32x32xf32>
    %c0_29 = arith.constant 0 : index
    %c0_30 = arith.constant 0 : index
    %15 = vector.load %arg31[%c0_29, %c0_30] : memref<32x32xf32, #tpu.memory_space<vmem>>, vector<32x32xf32>
    %c0_31 = arith.constant 0 : index
    %c0_32 = arith.constant 0 : index
    %16 = vector.load %arg32[%c0_31, %c0_32] : memref<1x32xf32, #tpu.memory_space<vmem>>, vector<1x32xf32>
    %c0_33 = arith.constant 0 : index
    %c0_34 = arith.constant 0 : index
    %17 = vector.load %arg33[%c0_33, %c0_34] : memref<32x32xf32, #tpu.memory_space<vmem>>, vector<32x32xf32>
    %c0_35 = arith.constant 0 : index
    %c0_36 = arith.constant 0 : index
    %18 = vector.load %arg34[%c0_35, %c0_36] : memref<32x32xf32, #tpu.memory_space<vmem>>, vector<32x32xf32>
    %c0_37 = arith.constant 0 : index
    %c0_38 = arith.constant 0 : index
    %19 = vector.load %arg35[%c0_37, %c0_38] : memref<1x32xf32, #tpu.memory_space<vmem>>, vector<1x32xf32>
    %c0_39 = arith.constant 0 : index
    %c0_40 = arith.constant 0 : index
    %20 = vector.load %arg36[%c0_39, %c0_40] : memref<32x16xf32, #tpu.memory_space<vmem>>, vector<32x16xf32>
    %c0_41 = arith.constant 0 : index
    %c0_42 = arith.constant 0 : index
    %21 = vector.load %arg37[%c0_41, %c0_42] : memref<1x16xf32, #tpu.memory_space<vmem>>, vector<1x16xf32>
    %c0_43 = arith.constant 0 : index
    %c0_44 = arith.constant 0 : index
    %22 = vector.load %arg38[%c0_43, %c0_44] : memref<16x8xf32, #tpu.memory_space<vmem>>, vector<16x8xf32>
    %c0_45 = arith.constant 0 : index
    %c0_46 = arith.constant 0 : index
    %23 = vector.load %arg39[%c0_45, %c0_46] : memref<1x8xf32, #tpu.memory_space<vmem>>, vector<1x8xf32>
    %c0_47 = arith.constant 0 : index
    %c0_48 = arith.constant 0 : index
    %24 = vector.load %arg40[%c0_47, %c0_48] : memref<8x1xf32, #tpu.memory_space<vmem>>, vector<8x1xf32>
    %c0_49 = arith.constant 0 : index
    %c0_50 = arith.constant 0 : index
    %25 = vector.load %arg41[%c0_49, %c0_50] : memref<1x1xf32, #tpu.memory_space<vmem>>, vector<1x1xf32>
    %c0_51 = arith.constant 0 : index
    %c0_52 = arith.constant 0 : index
    %26 = vector.load %arg42[%c0_51, %c0_52] : memref<32x32xf32, #tpu.memory_space<vmem>>, vector<32x32xf32>
    %c0_53 = arith.constant 0 : index
    %c0_54 = arith.constant 0 : index
    %27 = vector.load %arg43[%c0_53, %c0_54] : memref<32x32xf32, #tpu.memory_space<vmem>>, vector<32x32xf32>
    %c0_55 = arith.constant 0 : index
    %c0_56 = arith.constant 0 : index
    %28 = vector.load %arg44[%c0_55, %c0_56] : memref<1x32xf32, #tpu.memory_space<vmem>>, vector<1x32xf32>
    %c0_57 = arith.constant 0 : index
    %c0_58 = arith.constant 0 : index
    %29 = vector.load %arg45[%c0_57, %c0_58] : memref<32x16xf32, #tpu.memory_space<vmem>>, vector<32x16xf32>
    %c0_59 = arith.constant 0 : index
    %c0_60 = arith.constant 0 : index
    %30 = vector.load %arg46[%c0_59, %c0_60] : memref<1x16xf32, #tpu.memory_space<vmem>>, vector<1x16xf32>
    %c0_61 = arith.constant 0 : index
    %c0_62 = arith.constant 0 : index
    %31 = vector.load %arg47[%c0_61, %c0_62] : memref<16x8xf32, #tpu.memory_space<vmem>>, vector<16x8xf32>
    %c0_63 = arith.constant 0 : index
    %c0_64 = arith.constant 0 : index
    %32 = vector.load %arg48[%c0_63, %c0_64] : memref<1x8xf32, #tpu.memory_space<vmem>>, vector<1x8xf32>
    %c0_65 = arith.constant 0 : index
    %c0_66 = arith.constant 0 : index
    %33 = vector.load %arg49[%c0_65, %c0_66] : memref<8x1xf32, #tpu.memory_space<vmem>>, vector<8x1xf32>
    %c0_67 = arith.constant 0 : index
    %c0_68 = arith.constant 0 : index
    %34 = vector.load %arg50[%c0_67, %c0_68] : memref<1x1xf32, #tpu.memory_space<vmem>>, vector<1x1xf32>
    %c0_69 = arith.constant 0 : index
    %c0_70 = arith.constant 0 : index
    %35 = vector.load %arg51[%c0_69, %c0_70] : memref<32x32xf32, #tpu.memory_space<vmem>>, vector<32x32xf32>
    %c0_71 = arith.constant 0 : index
    %c0_72 = arith.constant 0 : index
    %36 = vector.load %arg52[%c0_71, %c0_72] : memref<32x32xf32, #tpu.memory_space<vmem>>, vector<32x32xf32>
    %c0_73 = arith.constant 0 : index
    %c0_74 = arith.constant 0 : index
    %37 = vector.load %arg53[%c0_73, %c0_74] : memref<1x32xf32, #tpu.memory_space<vmem>>, vector<1x32xf32>
    %c0_75 = arith.constant 0 : index
    %c0_76 = arith.constant 0 : index
    %38 = vector.load %arg54[%c0_75, %c0_76] : memref<32x32xf32, #tpu.memory_space<vmem>>, vector<32x32xf32>
    %c0_77 = arith.constant 0 : index
    %c0_78 = arith.constant 0 : index
    %39 = vector.load %arg55[%c0_77, %c0_78] : memref<1x32xf32, #tpu.memory_space<vmem>>, vector<1x32xf32>
    %c0_79 = arith.constant 0 : index
    %c0_80 = arith.constant 0 : index
    %40 = vector.load %arg56[%c0_79, %c0_80] : memref<32x32xf32, #tpu.memory_space<vmem>>, vector<32x32xf32>
    %c0_81 = arith.constant 0 : index
    %c0_82 = arith.constant 0 : index
    %41 = vector.load %arg57[%c0_81, %c0_82] : memref<1x32xf32, #tpu.memory_space<vmem>>, vector<1x32xf32>
    %c0_83 = arith.constant 0 : index
    %c0_84 = arith.constant 0 : index
    %42 = vector.load %arg58[%c0_83, %c0_84] : memref<32x32xf32, #tpu.memory_space<vmem>>, vector<32x32xf32>
    %c0_85 = arith.constant 0 : index
    %c0_86 = arith.constant 0 : index
    %43 = vector.load %arg59[%c0_85, %c0_86] : memref<1x32xf32, #tpu.memory_space<vmem>>, vector<1x32xf32>
    %c0_87 = arith.constant 0 : index
    %c0_88 = arith.constant 0 : index
    %44 = vector.load %arg60[%c0_87, %c0_88] : memref<1x32xf32, #tpu.memory_space<vmem>>, vector<1x32xf32>
    %c0_89 = arith.constant 0 : index
    %c0_90 = arith.constant 0 : index
    %45 = vector.load %arg61[%c0_89, %c0_90] : memref<1x32xf32, #tpu.memory_space<vmem>>, vector<1x32xf32>
    %c0_91 = arith.constant 0 : index
    %c0_92 = arith.constant 0 : index
    %46 = vector.load %arg62[%c0_91, %c0_92] : memref<32x32xf32, #tpu.memory_space<vmem>>, vector<32x32xf32>
    %c0_93 = arith.constant 0 : index
    %c0_94 = arith.constant 0 : index
    %47 = vector.load %arg63[%c0_93, %c0_94] : memref<1x32xf32, #tpu.memory_space<vmem>>, vector<1x32xf32>
    %c0_95 = arith.constant 0 : index
    %c0_96 = arith.constant 0 : index
    %48 = vector.load %arg64[%c0_95, %c0_96] : memref<32x1xf32, #tpu.memory_space<vmem>>, vector<32x1xf32>
    %c0_97 = arith.constant 0 : index
    %c0_98 = arith.constant 0 : index
    %49 = vector.load %arg65[%c0_97, %c0_98] : memref<1x1xf32, #tpu.memory_space<vmem>>, vector<1x1xf32>
    %c0_99 = arith.constant 0 : index
    %c0_100 = arith.constant 0 : index
    %50 = vector.load %arg66[%c0_99, %c0_100] : memref<2x32xf32, #tpu.memory_space<vmem>>, vector<2x32xf32>
    %c0_101 = arith.constant 0 : index
    %c0_102 = arith.constant 0 : index
    %51 = vector.load %arg67[%c0_101, %c0_102] : memref<1x32xf32, #tpu.memory_space<vmem>>, vector<1x32xf32>
    %c0_103 = arith.constant 0 : index
    %c0_104 = arith.constant 0 : index
    %52 = vector.load %arg68[%c0_103, %c0_104] : memref<32x32xf32, #tpu.memory_space<vmem>>, vector<32x32xf32>
    %c0_105 = arith.constant 0 : index
    %c0_106 = arith.constant 0 : index
    %53 = vector.load %arg69[%c0_105, %c0_106] : memref<1x32xf32, #tpu.memory_space<vmem>>, vector<1x32xf32>
    %c0_107 = arith.constant 0 : index
    %c0_108 = arith.constant 0 : index
    %54 = vector.load %arg70[%c0_107, %c0_108] : memref<32x1xf32, #tpu.memory_space<vmem>>, vector<32x1xf32>
    %c0_109 = arith.constant 0 : index
    %c0_110 = arith.constant 0 : index
    %55 = vector.load %arg71[%c0_109, %c0_110] : memref<1x1xf32, #tpu.memory_space<vmem>>, vector<1x1xf32>
    %c0_111 = arith.constant 0 : index
    %c0_112 = arith.constant 0 : index
    %56 = vector.load %arg72[%c0_111, %c0_112] : memref<1x32xf32, #tpu.memory_space<vmem>>, vector<1x32xf32>
    %c0_113 = arith.constant 0 : index
    %c0_114 = arith.constant 0 : index
    %57 = vector.load %arg73[%c0_113, %c0_114] : memref<1x32xf32, #tpu.memory_space<vmem>>, vector<1x32xf32>
    %c0_115 = arith.constant 0 : index
    %c0_116 = arith.constant 0 : index
    %58 = vector.load %arg74[%c0_115, %c0_116] : memref<32x32xf32, #tpu.memory_space<vmem>>, vector<32x32xf32>
    %c0_117 = arith.constant 0 : index
    %c0_118 = arith.constant 0 : index
    %59 = vector.load %arg75[%c0_117, %c0_118] : memref<1x32xf32, #tpu.memory_space<vmem>>, vector<1x32xf32>
    %c0_119 = arith.constant 0 : index
    %c0_120 = arith.constant 0 : index
    %60 = vector.load %arg76[%c0_119, %c0_120] : memref<32x32xf32, #tpu.memory_space<vmem>>, vector<32x32xf32>
    %c0_121 = arith.constant 0 : index
    %c0_122 = arith.constant 0 : index
    %61 = vector.load %arg77[%c0_121, %c0_122] : memref<1x32xf32, #tpu.memory_space<vmem>>, vector<1x32xf32>
    %c0_123 = arith.constant 0 : index
    %c0_124 = arith.constant 0 : index
    %62 = vector.load %arg0[%c0_123, %c0_124] : memref<16x1xf32, #tpu.memory_space<vmem>>, vector<16x1xf32>
    %c0_125 = arith.constant 0 : index
    %c0_126 = arith.constant 0 : index
    %63 = vector.load %arg1[%c0_125, %c0_126] : memref<48x2xf32, #tpu.memory_space<vmem>>, vector<48x2xf32>
    %c0_127 = arith.constant 0 : index
    %c0_128 = arith.constant 0 : index
    %64 = vector.load %arg2[%c0_127, %c0_128] : memref<24x1xf32, #tpu.memory_space<vmem>>, vector<24x1xf32>
    %c0_129 = arith.constant 0 : index
    %c0_130 = arith.constant 0 : index
    %65 = vector.load %arg3[%c0_129, %c0_130] : memref<8x16xbf16, #tpu.memory_space<vmem>>, vector<8x16xbf16>
    %c0_131 = arith.constant 0 : index
    %c0_132 = arith.constant 0 : index
    %66 = vector.load %arg4[%c0_131, %c0_132] : memref<48x16xbf16, #tpu.memory_space<vmem>>, vector<48x16xbf16>
    %c0_133 = arith.constant 0 : index
    %c0_134 = arith.constant 0 : index
    %67 = vector.load %arg5[%c0_133, %c0_134] : memref<48x16xbf16, #tpu.memory_space<vmem>>, vector<48x16xbf16>
    %c0_135 = arith.constant 0 : index
    %c0_136 = arith.constant 0 : index
    %68 = vector.load %arg6[%c0_135, %c0_136] : memref<48x128xbf16, #tpu.memory_space<vmem>>, vector<48x128xbf16>
    %c0_137 = arith.constant 0 : index
    %c0_138 = arith.constant 0 : index
    %69 = vector.load %arg7[%c0_137, %c0_138] : memref<16x48xbf16, #tpu.memory_space<vmem>>, vector<16x48xbf16>
    %c0_139 = arith.constant 0 : index
    %c0_140 = arith.constant 0 : index
    %70 = vector.load %arg8[%c0_139, %c0_140] : memref<16x48xbf16, #tpu.memory_space<vmem>>, vector<16x48xbf16>
    %c0_141 = arith.constant 0 : index
    %c0_142 = arith.constant 0 : index
    %71 = vector.load %arg9[%c0_141, %c0_142] : memref<24x8xbf16, #tpu.memory_space<vmem>>, vector<24x8xbf16>
    %c0_143 = arith.constant 0 : index
    %c0_144 = arith.constant 0 : index
    %72 = vector.load %arg10[%c0_143, %c0_144] : memref<8x24xbf16, #tpu.memory_space<vmem>>, vector<8x24xbf16>
    %c0_145 = arith.constant 0 : index
    %c0_146 = arith.constant 0 : index
    %73 = vector.load %arg11[%c0_145, %c0_146] : memref<16x16xbf16, #tpu.memory_space<vmem>>, vector<16x16xbf16>
    %c0_147 = arith.constant 0 : index
    %c0_148 = arith.constant 0 : index
    %74 = vector.load %arg13[%c0_147, %c0_148] : memref<16x8xbf16, #tpu.memory_space<vmem>>, vector<16x8xbf16>
    %c0_149 = arith.constant 0 : index
    %c0_150 = arith.constant 0 : index
    %75 = vector.load %arg12[%c0_149, %c0_150] : memref<16x128xbf16, #tpu.memory_space<vmem>>, vector<16x128xbf16>
    %c0_151 = arith.constant 0 : index
    %c0_152 = arith.constant 0 : index
    %76 = vector.load %arg14[%c0_151, %c0_152] : memref<16x16xbf16, #tpu.memory_space<vmem>>, vector<16x16xbf16>
    %c0_153 = arith.constant 0 : index
    %c0_154 = arith.constant 0 : index
    %77 = vector.load %arg15[%c0_153, %c0_154] : memref<8x16xbf16, #tpu.memory_space<vmem>>, vector<8x16xbf16>
    %78 = vector.extract_strided_slice %63 {offsets = [0, 0], sizes = [48, 1], strides = [1, 1]} : vector<48x2xf32> to vector<48x1xf32>
    %79 = vector.extract_strided_slice %50 {offsets = [0, 0], sizes = [1, 32], strides = [1, 1]} : vector<2x32xf32> to vector<1x32xf32>
    %80 = vector.broadcast %78 : vector<48x1xf32> to vector<48x32xf32>
    %81 = vector.broadcast %79 : vector<1x32xf32> to vector<48x32xf32>
    %82 = arith.mulf %80, %81 : vector<48x32xf32>
    %83 = vector.extract_strided_slice %63 {offsets = [0, 1], sizes = [48, 1], strides = [1, 1]} : vector<48x2xf32> to vector<48x1xf32>
    %84 = vector.extract_strided_slice %50 {offsets = [1, 0], sizes = [1, 32], strides = [1, 1]} : vector<2x32xf32> to vector<1x32xf32>
    %85 = vector.broadcast %83 : vector<48x1xf32> to vector<48x32xf32>
    %86 = vector.broadcast %84 : vector<1x32xf32> to vector<48x32xf32>
    %87 = arith.mulf %85, %86 : vector<48x32xf32>
    %88 = arith.addf %82, %87 : vector<48x32xf32>
    %89 = vector.broadcast %51 : vector<1x32xf32> to vector<48x32xf32>
    %90 = arith.addf %88, %89 : vector<48x32xf32>
    %cst = arith.constant 0.000000e+00 : f32
    %91 = vector.broadcast %cst : f32 to vector<48x32xf32>
    %92 = arith.maximumf %90, %91 : vector<48x32xf32>
    %93 = arith.truncf %92 : vector<48x32xf32> to vector<48x32xbf16>
    %94 = arith.truncf %52 : vector<32x32xf32> to vector<32x32xbf16>
    %cst_155 = arith.constant dense<0.000000e+00> : vector<48x32xf32>
    %95 = tpu.matmul %93, %94, %cst_155 {dimension_numbers = #tpu.dot_dimension_numbers<[1], [0], [0], [1], [0, 0, 1, 1], [], []>} : vector<48x32xbf16>, vector<32x32xbf16>, vector<48x32xf32> -> vector<48x32xf32>
    %96 = vector.broadcast %53 : vector<1x32xf32> to vector<48x32xf32>
    %97 = arith.addf %95, %96 : vector<48x32xf32>
    %cst_156 = arith.constant 0.000000e+00 : f32
    %98 = vector.broadcast %cst_156 : f32 to vector<48x32xf32>
    %99 = arith.maximumf %97, %98 : vector<48x32xf32>
    %100 = arith.truncf %99 : vector<48x32xf32> to vector<48x32xbf16>
    %101 = arith.truncf %54 : vector<32x1xf32> to vector<32x1xbf16>
    %cst_157 = arith.constant dense<0.000000e+00> : vector<48x1xf32>
    %102 = tpu.matmul %100, %101, %cst_157 {dimension_numbers = #tpu.dot_dimension_numbers<[1], [0], [0], [1], [0, 0, 1, 1], [], []>} : vector<48x32xbf16>, vector<32x1xbf16>, vector<48x1xf32> -> vector<48x1xf32>
    %103 = vector.broadcast %55 : vector<1x1xf32> to vector<48x1xf32>
    %104 = arith.addf %102, %103 : vector<48x1xf32>
    %105 = arith.extf %65 : vector<8x16xbf16> to vector<8x16xf32>
    %cst_158 = arith.constant dense<0.000000e+00> : vector<8x1xf32>
    %106 = tpu.matmul %105, %62, %cst_158 {dimension_numbers = #tpu.dot_dimension_numbers<[1], [0], [0], [1], [0, 0, 1, 1], [], []>} : vector<8x16xf32>, vector<16x1xf32>, vector<8x1xf32> -> vector<8x1xf32>
    %107 = vector.broadcast %62 : vector<16x1xf32> to vector<16x32xf32>
    %108 = vector.broadcast %56 : vector<1x32xf32> to vector<16x32xf32>
    %109 = arith.mulf %107, %108 : vector<16x32xf32>
    %110 = vector.broadcast %57 : vector<1x32xf32> to vector<16x32xf32>
    %111 = arith.addf %109, %110 : vector<16x32xf32>
    %cst_159 = arith.constant 0.000000e+00 : f32
    %112 = vector.broadcast %cst_159 : f32 to vector<16x32xf32>
    %113 = arith.maximumf %111, %112 : vector<16x32xf32>
    %114 = arith.truncf %113 : vector<16x32xf32> to vector<16x32xbf16>
    %115 = arith.truncf %58 : vector<32x32xf32> to vector<32x32xbf16>
    %cst_160 = arith.constant dense<0.000000e+00> : vector<16x32xf32>
    %116 = tpu.matmul %114, %115, %cst_160 {dimension_numbers = #tpu.dot_dimension_numbers<[1], [0], [0], [1], [0, 0, 1, 1], [], []>} : vector<16x32xbf16>, vector<32x32xbf16>, vector<16x32xf32> -> vector<16x32xf32>
    %117 = vector.broadcast %59 : vector<1x32xf32> to vector<16x32xf32>
    %118 = arith.addf %116, %117 : vector<16x32xf32>
    %cst_161 = arith.constant 0.000000e+00 : f32
    %119 = vector.broadcast %cst_161 : f32 to vector<16x32xf32>
    %120 = arith.maximumf %118, %119 : vector<16x32xf32>
    %121 = arith.truncf %120 : vector<16x32xf32> to vector<16x32xbf16>
    %122 = arith.truncf %60 : vector<32x32xf32> to vector<32x32xbf16>
    %cst_162 = arith.constant dense<0.000000e+00> : vector<16x32xf32>
    %123 = tpu.matmul %121, %122, %cst_162 {dimension_numbers = #tpu.dot_dimension_numbers<[1], [0], [0], [1], [0, 0, 1, 1], [], []>} : vector<16x32xbf16>, vector<32x32xbf16>, vector<16x32xf32> -> vector<16x32xf32>
    %124 = vector.broadcast %61 : vector<1x32xf32> to vector<16x32xf32>
    %125 = arith.addf %123, %124 : vector<16x32xf32>
    %126 = vector.broadcast %106 : vector<8x1xf32> to vector<8x32xf32>
    %127 = vector.broadcast %56 : vector<1x32xf32> to vector<8x32xf32>
    %128 = arith.mulf %126, %127 : vector<8x32xf32>
    %129 = vector.broadcast %57 : vector<1x32xf32> to vector<8x32xf32>
    %130 = arith.addf %128, %129 : vector<8x32xf32>
    %cst_163 = arith.constant 0.000000e+00 : f32
    %131 = vector.broadcast %cst_163 : f32 to vector<8x32xf32>
    %132 = arith.maximumf %130, %131 : vector<8x32xf32>
    %133 = arith.truncf %132 : vector<8x32xf32> to vector<8x32xbf16>
    %134 = arith.truncf %58 : vector<32x32xf32> to vector<32x32xbf16>
    %cst_164 = arith.constant dense<0.000000e+00> : vector<8x32xf32>
    %135 = tpu.matmul %133, %134, %cst_164 {dimension_numbers = #tpu.dot_dimension_numbers<[1], [0], [0], [1], [0, 0, 1, 1], [], []>} : vector<8x32xbf16>, vector<32x32xbf16>, vector<8x32xf32> -> vector<8x32xf32>
    %136 = vector.broadcast %59 : vector<1x32xf32> to vector<8x32xf32>
    %137 = arith.addf %135, %136 : vector<8x32xf32>
    %cst_165 = arith.constant 0.000000e+00 : f32
    %138 = vector.broadcast %cst_165 : f32 to vector<8x32xf32>
    %139 = arith.maximumf %137, %138 : vector<8x32xf32>
    %140 = arith.truncf %139 : vector<8x32xf32> to vector<8x32xbf16>
    %141 = arith.truncf %60 : vector<32x32xf32> to vector<32x32xbf16>
    %cst_166 = arith.constant dense<0.000000e+00> : vector<8x32xf32>
    %142 = tpu.matmul %140, %141, %cst_166 {dimension_numbers = #tpu.dot_dimension_numbers<[1], [0], [0], [1], [0, 0, 1, 1], [], []>} : vector<8x32xbf16>, vector<32x32xbf16>, vector<8x32xf32> -> vector<8x32xf32>
    %143 = vector.broadcast %61 : vector<1x32xf32> to vector<8x32xf32>
    %144 = arith.addf %142, %143 : vector<8x32xf32>
    %145 = vector.broadcast %104 : vector<48x1xf32> to vector<48x32xf32>
    %146 = vector.broadcast %44 : vector<1x32xf32> to vector<48x32xf32>
    %147 = arith.mulf %145, %146 : vector<48x32xf32>
    %148 = vector.broadcast %45 : vector<1x32xf32> to vector<48x32xf32>
    %149 = arith.addf %147, %148 : vector<48x32xf32>
    %cst_167 = arith.constant 0.000000e+00 : f32
    %150 = vector.broadcast %cst_167 : f32 to vector<48x32xf32>
    %151 = arith.maximumf %149, %150 : vector<48x32xf32>
    %152 = arith.truncf %151 : vector<48x32xf32> to vector<48x32xbf16>
    %153 = arith.truncf %46 : vector<32x32xf32> to vector<32x32xbf16>
    %cst_168 = arith.constant dense<0.000000e+00> : vector<48x32xf32>
    %154 = tpu.matmul %152, %153, %cst_168 {dimension_numbers = #tpu.dot_dimension_numbers<[1], [0], [0], [1], [0, 0, 1, 1], [], []>} : vector<48x32xbf16>, vector<32x32xbf16>, vector<48x32xf32> -> vector<48x32xf32>
    %155 = vector.broadcast %47 : vector<1x32xf32> to vector<48x32xf32>
    %156 = arith.addf %154, %155 : vector<48x32xf32>
    %cst_169 = arith.constant 0.000000e+00 : f32
    %157 = vector.broadcast %cst_169 : f32 to vector<48x32xf32>
    %158 = arith.maximumf %156, %157 : vector<48x32xf32>
    %159 = arith.truncf %158 : vector<48x32xf32> to vector<48x32xbf16>
    %160 = arith.truncf %48 : vector<32x1xf32> to vector<32x1xbf16>
    %cst_170 = arith.constant dense<0.000000e+00> : vector<48x1xf32>
    %161 = tpu.matmul %159, %160, %cst_170 {dimension_numbers = #tpu.dot_dimension_numbers<[1], [0], [0], [1], [0, 0, 1, 1], [], []>} : vector<48x32xbf16>, vector<32x1xbf16>, vector<48x1xf32> -> vector<48x1xf32>
    %162 = vector.broadcast %49 : vector<1x1xf32> to vector<48x1xf32>
    %163 = arith.addf %161, %162 : vector<48x1xf32>
    %164 = arith.truncf %163 : vector<48x1xf32> to vector<48x1xbf16>
    %165 = vector.broadcast %64 : vector<24x1xf32> to vector<24x32xf32>
    %166 = vector.broadcast %44 : vector<1x32xf32> to vector<24x32xf32>
    %167 = arith.mulf %165, %166 : vector<24x32xf32>
    %168 = vector.broadcast %45 : vector<1x32xf32> to vector<24x32xf32>
    %169 = arith.addf %167, %168 : vector<24x32xf32>
    %cst_171 = arith.constant 0.000000e+00 : f32
    %170 = vector.broadcast %cst_171 : f32 to vector<24x32xf32>
    %171 = arith.maximumf %169, %170 : vector<24x32xf32>
    %172 = arith.truncf %171 : vector<24x32xf32> to vector<24x32xbf16>
    %173 = arith.truncf %46 : vector<32x32xf32> to vector<32x32xbf16>
    %cst_172 = arith.constant dense<0.000000e+00> : vector<24x32xf32>
    %174 = tpu.matmul %172, %173, %cst_172 {dimension_numbers = #tpu.dot_dimension_numbers<[1], [0], [0], [1], [0, 0, 1, 1], [], []>} : vector<24x32xbf16>, vector<32x32xbf16>, vector<24x32xf32> -> vector<24x32xf32>
    %175 = vector.broadcast %47 : vector<1x32xf32> to vector<24x32xf32>
    %176 = arith.addf %174, %175 : vector<24x32xf32>
    %cst_173 = arith.constant 0.000000e+00 : f32
    %177 = vector.broadcast %cst_173 : f32 to vector<24x32xf32>
    %178 = arith.maximumf %176, %177 : vector<24x32xf32>
    %179 = arith.truncf %178 : vector<24x32xf32> to vector<24x32xbf16>
    %180 = arith.truncf %48 : vector<32x1xf32> to vector<32x1xbf16>
    %cst_174 = arith.constant dense<0.000000e+00> : vector<24x1xf32>
    %181 = tpu.matmul %179, %180, %cst_174 {dimension_numbers = #tpu.dot_dimension_numbers<[1], [0], [0], [1], [0, 0, 1, 1], [], []>} : vector<24x32xbf16>, vector<32x1xbf16>, vector<24x1xf32> -> vector<24x1xf32>
    %182 = vector.broadcast %49 : vector<1x1xf32> to vector<24x1xf32>
    %183 = arith.addf %181, %182 : vector<24x1xf32>
    %184 = arith.truncf %183 : vector<24x1xf32> to vector<24x1xbf16>
    %185 = vector.broadcast %164 : vector<48x1xbf16> to vector<48x16xbf16>
    %186 = arith.mulf %185, %66 : vector<48x16xbf16>
    %cst_175 = arith.constant dense<0.000000e+00> : vector<16x16xf32>
    %187 = tpu.matmul %70, %186, %cst_175 {dimension_numbers = #tpu.dot_dimension_numbers<[1], [0], [0], [1], [0, 0, 1, 1], [], []>} : vector<16x48xbf16>, vector<48x16xbf16>, vector<16x16xf32> -> vector<16x16xf32>
    %188 = arith.truncf %187 : vector<16x16xf32> to vector<16x16xbf16>
    %189 = vector.broadcast %184 : vector<24x1xbf16> to vector<24x8xbf16>
    %190 = arith.mulf %189, %71 : vector<24x8xbf16>
    %cst_176 = arith.constant dense<0.000000e+00> : vector<8x8xf32>
    %191 = tpu.matmul %72, %190, %cst_176 {dimension_numbers = #tpu.dot_dimension_numbers<[1], [0], [0], [1], [0, 0, 1, 1], [], []>} : vector<8x24xbf16>, vector<24x8xbf16>, vector<8x8xf32> -> vector<8x8xf32>
    %192 = arith.truncf %191 : vector<8x8xf32> to vector<8x8xbf16>
    %193 = arith.truncf %125 : vector<16x32xf32> to vector<16x32xbf16>
    %cst_177 = arith.constant dense<0.000000e+00> : vector<16x32xf32>
    %194 = tpu.matmul %188, %193, %cst_177 {dimension_numbers = #tpu.dot_dimension_numbers<[1], [0], [0], [1], [0, 0, 1, 1], [], []>} : vector<16x16xbf16>, vector<16x32xbf16>, vector<16x32xf32> -> vector<16x32xf32>
    %195 = arith.truncf %194 : vector<16x32xf32> to vector<16x32xbf16>
    %cst_178 = arith.constant dense<0.000000e+00> : vector<16x32xf32>
    %196 = tpu.matmul %188, %195, %cst_178 {dimension_numbers = #tpu.dot_dimension_numbers<[1], [0], [0], [1], [0, 0, 1, 1], [], []>} : vector<16x16xbf16>, vector<16x32xbf16>, vector<16x32xf32> -> vector<16x32xf32>
    %197 = arith.truncf %196 : vector<16x32xf32> to vector<16x32xbf16>
    %198 = arith.truncf %9 : vector<32x32xf32> to vector<32x32xbf16>
    %cst_179 = arith.constant dense<0.000000e+00> : vector<16x32xf32>
    %199 = tpu.matmul %193, %198, %cst_179 {dimension_numbers = #tpu.dot_dimension_numbers<[1], [0], [0], [1], [0, 0, 1, 1], [], []>} : vector<16x32xbf16>, vector<32x32xbf16>, vector<16x32xf32> -> vector<16x32xf32>
    %200 = arith.truncf %10 : vector<32x32xf32> to vector<32x32xbf16>
    %cst_180 = arith.constant dense<0.000000e+00> : vector<16x32xf32>
    %201 = tpu.matmul %195, %200, %cst_180 {dimension_numbers = #tpu.dot_dimension_numbers<[1], [0], [0], [1], [0, 0, 1, 1], [], []>} : vector<16x32xbf16>, vector<32x32xbf16>, vector<16x32xf32> -> vector<16x32xf32>
    %202 = arith.addf %199, %201 : vector<16x32xf32>
    %203 = arith.truncf %11 : vector<32x32xf32> to vector<32x32xbf16>
    %cst_181 = arith.constant dense<0.000000e+00> : vector<16x32xf32>
    %204 = tpu.matmul %197, %203, %cst_181 {dimension_numbers = #tpu.dot_dimension_numbers<[1], [0], [0], [1], [0, 0, 1, 1], [], []>} : vector<16x32xbf16>, vector<32x32xbf16>, vector<16x32xf32> -> vector<16x32xf32>
    %205 = arith.addf %202, %204 : vector<16x32xf32>
    %206 = vector.broadcast %12 : vector<1x32xf32> to vector<16x32xf32>
    %207 = arith.addf %205, %206 : vector<16x32xf32>
    %208 = arith.truncf %144 : vector<8x32xf32> to vector<8x32xbf16>
    %cst_182 = arith.constant dense<0.000000e+00> : vector<16x32xf32>
    %209 = tpu.matmul %74, %208, %cst_182 {dimension_numbers = #tpu.dot_dimension_numbers<[1], [0], [0], [1], [0, 0, 1, 1], [], []>} : vector<16x8xbf16>, vector<8x32xbf16>, vector<16x32xf32> -> vector<16x32xf32>
    %210 = arith.truncf %207 : vector<16x32xf32> to vector<16x32xbf16>
    %cst_183 = arith.constant dense<0.000000e+00> : vector<16x32xf32>
    %211 = tpu.matmul %73, %210, %cst_183 {dimension_numbers = #tpu.dot_dimension_numbers<[1], [0], [0], [1], [0, 0, 1, 1], [], []>} : vector<16x16xbf16>, vector<16x32xbf16>, vector<16x32xf32> -> vector<16x32xf32>
    %212 = arith.truncf %209 : vector<16x32xf32> to vector<16x32xbf16>
    %213 = arith.truncf %35 : vector<32x32xf32> to vector<32x32xbf16>
    %cst_184 = arith.constant dense<0.000000e+00> : vector<16x32xf32>
    %214 = tpu.matmul %212, %213, %cst_184 {dimension_numbers = #tpu.dot_dimension_numbers<[1], [0], [0], [1], [0, 0, 1, 1], [], []>} : vector<16x32xbf16>, vector<32x32xbf16>, vector<16x32xf32> -> vector<16x32xf32>
    %215 = arith.truncf %211 : vector<16x32xf32> to vector<16x32xbf16>
    %216 = arith.truncf %36 : vector<32x32xf32> to vector<32x32xbf16>
    %cst_185 = arith.constant dense<0.000000e+00> : vector<16x32xf32>
    %217 = tpu.matmul %215, %216, %cst_185 {dimension_numbers = #tpu.dot_dimension_numbers<[1], [0], [0], [1], [0, 0, 1, 1], [], []>} : vector<16x32xbf16>, vector<32x32xbf16>, vector<16x32xf32> -> vector<16x32xf32>
    %218 = arith.addf %214, %217 : vector<16x32xf32>
    %219 = vector.broadcast %37 : vector<1x32xf32> to vector<16x32xf32>
    %220 = arith.addf %218, %219 : vector<16x32xf32>
    %cst_186 = arith.constant 0.000000e+00 : f32
    %221 = vector.broadcast %cst_186 : f32 to vector<16x32xf32>
    %222 = arith.maximumf %220, %221 : vector<16x32xf32>
    %223 = arith.truncf %222 : vector<16x32xf32> to vector<16x32xbf16>
    %224 = arith.truncf %38 : vector<32x32xf32> to vector<32x32xbf16>
    %cst_187 = arith.constant dense<0.000000e+00> : vector<16x32xf32>
    %225 = tpu.matmul %223, %224, %cst_187 {dimension_numbers = #tpu.dot_dimension_numbers<[1], [0], [0], [1], [0, 0, 1, 1], [], []>} : vector<16x32xbf16>, vector<32x32xbf16>, vector<16x32xf32> -> vector<16x32xf32>
    %226 = vector.broadcast %39 : vector<1x32xf32> to vector<16x32xf32>
    %227 = arith.addf %225, %226 : vector<16x32xf32>
    %228 = arith.truncf %227 : vector<16x32xf32> to vector<16x32xbf16>
    %cst_188 = arith.constant dense<0.000000e+00> : vector<8x32xf32>
    %229 = tpu.matmul %77, %228, %cst_188 {dimension_numbers = #tpu.dot_dimension_numbers<[1], [0], [0], [1], [0, 0, 1, 1], [], []>} : vector<8x16xbf16>, vector<16x32xbf16>, vector<8x32xf32> -> vector<8x32xf32>
    %230 = arith.truncf %229 : vector<8x32xf32> to vector<8x32xbf16>
    %cst_189 = arith.constant dense<0.000000e+00> : vector<8x32xf32>
    %231 = tpu.matmul %192, %230, %cst_189 {dimension_numbers = #tpu.dot_dimension_numbers<[1], [0], [0], [1], [0, 0, 1, 1], [], []>} : vector<8x8xbf16>, vector<8x32xbf16>, vector<8x32xf32> -> vector<8x32xf32>
    %232 = arith.truncf %231 : vector<8x32xf32> to vector<8x32xbf16>
    %cst_190 = arith.constant dense<0.000000e+00> : vector<8x32xf32>
    %233 = tpu.matmul %192, %232, %cst_190 {dimension_numbers = #tpu.dot_dimension_numbers<[1], [0], [0], [1], [0, 0, 1, 1], [], []>} : vector<8x8xbf16>, vector<8x32xbf16>, vector<8x32xf32> -> vector<8x32xf32>
    %234 = arith.truncf %233 : vector<8x32xf32> to vector<8x32xbf16>
    %235 = arith.truncf %5 : vector<32x32xf32> to vector<32x32xbf16>
    %cst_191 = arith.constant dense<0.000000e+00> : vector<8x32xf32>
    %236 = tpu.matmul %230, %235, %cst_191 {dimension_numbers = #tpu.dot_dimension_numbers<[1], [0], [0], [1], [0, 0, 1, 1], [], []>} : vector<8x32xbf16>, vector<32x32xbf16>, vector<8x32xf32> -> vector<8x32xf32>
    %237 = arith.truncf %6 : vector<32x32xf32> to vector<32x32xbf16>
    %cst_192 = arith.constant dense<0.000000e+00> : vector<8x32xf32>
    %238 = tpu.matmul %232, %237, %cst_192 {dimension_numbers = #tpu.dot_dimension_numbers<[1], [0], [0], [1], [0, 0, 1, 1], [], []>} : vector<8x32xbf16>, vector<32x32xbf16>, vector<8x32xf32> -> vector<8x32xf32>
    %239 = arith.addf %236, %238 : vector<8x32xf32>
    %240 = arith.truncf %7 : vector<32x32xf32> to vector<32x32xbf16>
    %cst_193 = arith.constant dense<0.000000e+00> : vector<8x32xf32>
    %241 = tpu.matmul %234, %240, %cst_193 {dimension_numbers = #tpu.dot_dimension_numbers<[1], [0], [0], [1], [0, 0, 1, 1], [], []>} : vector<8x32xbf16>, vector<32x32xbf16>, vector<8x32xf32> -> vector<8x32xf32>
    %242 = arith.addf %239, %241 : vector<8x32xf32>
    %243 = vector.broadcast %8 : vector<1x32xf32> to vector<8x32xf32>
    %244 = arith.addf %242, %243 : vector<8x32xf32>
    %cst_194 = arith.constant dense<0.000000e+00> : vector<32xf32>
    %245 = vector.multi_reduction <add>, %207, %cst_194 [0] : vector<16x32xf32> to vector<32xf32>
    %246 = vector.shape_cast %245 : vector<32xf32> to vector<1x32xf32>
    %cst_195 = arith.constant 1.600000e+01 : f32
    %247 = vector.broadcast %cst_195 : f32 to vector<1x32xf32>
    %248 = arith.divf %246, %247 : vector<1x32xf32>
    %249 = vector.broadcast %248 : vector<1x32xf32> to vector<16x32xf32>
    %250 = arith.subf %207, %249 : vector<16x32xf32>
    %251 = arith.mulf %250, %250 : vector<16x32xf32>
    %cst_196 = arith.constant dense<0.000000e+00> : vector<32xf32>
    %252 = vector.multi_reduction <add>, %251, %cst_196 [0] : vector<16x32xf32> to vector<32xf32>
    %253 = vector.shape_cast %252 : vector<32xf32> to vector<1x32xf32>
    %cst_197 = arith.constant 1.600000e+01 : f32
    %254 = vector.broadcast %cst_197 : f32 to vector<1x32xf32>
    %255 = arith.divf %253, %254 : vector<1x32xf32>
    %256 = vector.broadcast %248 : vector<1x32xf32> to vector<16x32xf32>
    %257 = arith.subf %207, %256 : vector<16x32xf32>
    %cst_198 = arith.constant 9.99999974E-6 : f32
    %258 = vector.broadcast %cst_198 : f32 to vector<1x32xf32>
    %259 = arith.addf %255, %258 : vector<1x32xf32>
    %260 = math.rsqrt %259 : vector<1x32xf32>
    %261 = vector.broadcast %260 : vector<1x32xf32> to vector<16x32xf32>
    %262 = arith.mulf %257, %261 : vector<16x32xf32>
    %263 = arith.truncf %262 : vector<16x32xf32> to vector<16x32xbf16>
    %cst_199 = arith.constant dense<0.000000e+00> : vector<32xf32>
    %264 = vector.multi_reduction <add>, %244, %cst_199 [0] : vector<8x32xf32> to vector<32xf32>
    %265 = vector.shape_cast %264 : vector<32xf32> to vector<1x32xf32>
    %cst_200 = arith.constant 8.000000e+00 : f32
    %266 = vector.broadcast %cst_200 : f32 to vector<1x32xf32>
    %267 = arith.divf %265, %266 : vector<1x32xf32>
    %268 = vector.broadcast %267 : vector<1x32xf32> to vector<8x32xf32>
    %269 = arith.subf %244, %268 : vector<8x32xf32>
    %270 = arith.mulf %269, %269 : vector<8x32xf32>
    %cst_201 = arith.constant dense<0.000000e+00> : vector<32xf32>
    %271 = vector.multi_reduction <add>, %270, %cst_201 [0] : vector<8x32xf32> to vector<32xf32>
    %272 = vector.shape_cast %271 : vector<32xf32> to vector<1x32xf32>
    %cst_202 = arith.constant 8.000000e+00 : f32
    %273 = vector.broadcast %cst_202 : f32 to vector<1x32xf32>
    %274 = arith.divf %272, %273 : vector<1x32xf32>
    %275 = vector.broadcast %267 : vector<1x32xf32> to vector<8x32xf32>
    %276 = arith.subf %244, %275 : vector<8x32xf32>
    %cst_203 = arith.constant 9.99999974E-6 : f32
    %277 = vector.broadcast %cst_203 : f32 to vector<1x32xf32>
    %278 = arith.addf %274, %277 : vector<1x32xf32>
    %279 = math.rsqrt %278 : vector<1x32xf32>
    %280 = vector.broadcast %279 : vector<1x32xf32> to vector<8x32xf32>
    %281 = arith.mulf %276, %280 : vector<8x32xf32>
    %282 = arith.truncf %281 : vector<8x32xf32> to vector<8x32xbf16>
    %cst_204 = arith.constant dense<0.000000e+00> : vector<16x32xf32>
    %283 = tpu.matmul %73, %263, %cst_204 {dimension_numbers = #tpu.dot_dimension_numbers<[1], [0], [0], [1], [0, 0, 1, 1], [], []>} : vector<16x16xbf16>, vector<16x32xbf16>, vector<16x32xf32> -> vector<16x32xf32>
    %cst_205 = arith.constant dense<0.000000e+00> : vector<16x32xf32>
    %284 = tpu.matmul %74, %282, %cst_205 {dimension_numbers = #tpu.dot_dimension_numbers<[1], [0], [0], [1], [0, 0, 1, 1], [], []>} : vector<16x8xbf16>, vector<8x32xbf16>, vector<16x32xf32> -> vector<16x32xf32>
    %285 = arith.truncf %283 : vector<16x32xf32> to vector<16x32xbf16>
    %286 = arith.truncf %0 : vector<32x32xf32> to vector<32x32xbf16>
    %cst_206 = arith.constant dense<0.000000e+00> : vector<16x32xf32>
    %287 = tpu.matmul %285, %286, %cst_206 {dimension_numbers = #tpu.dot_dimension_numbers<[1], [0], [0], [1], [0, 0, 1, 1], [], []>} : vector<16x32xbf16>, vector<32x32xbf16>, vector<16x32xf32> -> vector<16x32xf32>
    %288 = arith.truncf %284 : vector<16x32xf32> to vector<16x32xbf16>
    %289 = arith.truncf %1 : vector<32x32xf32> to vector<32x32xbf16>
    %cst_207 = arith.constant dense<0.000000e+00> : vector<16x32xf32>
    %290 = tpu.matmul %288, %289, %cst_207 {dimension_numbers = #tpu.dot_dimension_numbers<[1], [0], [0], [1], [0, 0, 1, 1], [], []>} : vector<16x32xbf16>, vector<32x32xbf16>, vector<16x32xf32> -> vector<16x32xf32>
    %291 = arith.addf %287, %290 : vector<16x32xf32>
    %292 = vector.broadcast %2 : vector<1x32xf32> to vector<16x32xf32>
    %293 = arith.addf %291, %292 : vector<16x32xf32>
    %cst_208 = arith.constant 0.000000e+00 : f32
    %294 = vector.broadcast %cst_208 : f32 to vector<16x32xf32>
    %295 = arith.maximumf %293, %294 : vector<16x32xf32>
    %296 = arith.truncf %295 : vector<16x32xf32> to vector<16x32xbf16>
    %297 = arith.truncf %3 : vector<32x32xf32> to vector<32x32xbf16>
    %cst_209 = arith.constant dense<0.000000e+00> : vector<16x32xf32>
    %298 = tpu.matmul %296, %297, %cst_209 {dimension_numbers = #tpu.dot_dimension_numbers<[1], [0], [0], [1], [0, 0, 1, 1], [], []>} : vector<16x32xbf16>, vector<32x32xbf16>, vector<16x32xf32> -> vector<16x32xf32>
    %299 = vector.broadcast %4 : vector<1x32xf32> to vector<16x32xf32>
    %300 = arith.addf %298, %299 : vector<16x32xf32>
    %301 = arith.truncf %300 : vector<16x32xf32> to vector<16x32xbf16>
    %cst_210 = arith.constant dense<0.000000e+00> : vector<16x32xf32>
    %302 = tpu.matmul %76, %301, %cst_210 {dimension_numbers = #tpu.dot_dimension_numbers<[1], [0], [0], [1], [0, 0, 1, 1], [], []>} : vector<16x16xbf16>, vector<16x32xbf16>, vector<16x32xf32> -> vector<16x32xf32>
    %303 = arith.truncf %302 : vector<16x32xf32> to vector<16x32xbf16>
    %cst_211 = arith.constant dense<0.000000e+00> : vector<16x32xf32>
    %304 = tpu.matmul %188, %303, %cst_211 {dimension_numbers = #tpu.dot_dimension_numbers<[1], [0], [0], [1], [0, 0, 1, 1], [], []>} : vector<16x16xbf16>, vector<16x32xbf16>, vector<16x32xf32> -> vector<16x32xf32>
    %305 = arith.truncf %304 : vector<16x32xf32> to vector<16x32xbf16>
    %cst_212 = arith.constant dense<0.000000e+00> : vector<16x32xf32>
    %306 = tpu.matmul %188, %305, %cst_212 {dimension_numbers = #tpu.dot_dimension_numbers<[1], [0], [0], [1], [0, 0, 1, 1], [], []>} : vector<16x16xbf16>, vector<16x32xbf16>, vector<16x32xf32> -> vector<16x32xf32>
    %307 = arith.truncf %306 : vector<16x32xf32> to vector<16x32xbf16>
    %308 = arith.truncf %13 : vector<32x32xf32> to vector<32x32xbf16>
    %cst_213 = arith.constant dense<0.000000e+00> : vector<16x32xf32>
    %309 = tpu.matmul %303, %308, %cst_213 {dimension_numbers = #tpu.dot_dimension_numbers<[1], [0], [0], [1], [0, 0, 1, 1], [], []>} : vector<16x32xbf16>, vector<32x32xbf16>, vector<16x32xf32> -> vector<16x32xf32>
    %310 = arith.truncf %14 : vector<32x32xf32> to vector<32x32xbf16>
    %cst_214 = arith.constant dense<0.000000e+00> : vector<16x32xf32>
    %311 = tpu.matmul %305, %310, %cst_214 {dimension_numbers = #tpu.dot_dimension_numbers<[1], [0], [0], [1], [0, 0, 1, 1], [], []>} : vector<16x32xbf16>, vector<32x32xbf16>, vector<16x32xf32> -> vector<16x32xf32>
    %312 = arith.addf %309, %311 : vector<16x32xf32>
    %313 = arith.truncf %15 : vector<32x32xf32> to vector<32x32xbf16>
    %cst_215 = arith.constant dense<0.000000e+00> : vector<16x32xf32>
    %314 = tpu.matmul %307, %313, %cst_215 {dimension_numbers = #tpu.dot_dimension_numbers<[1], [0], [0], [1], [0, 0, 1, 1], [], []>} : vector<16x32xbf16>, vector<32x32xbf16>, vector<16x32xf32> -> vector<16x32xf32>
    %315 = arith.addf %312, %314 : vector<16x32xf32>
    %316 = vector.broadcast %16 : vector<1x32xf32> to vector<16x32xf32>
    %317 = arith.addf %315, %316 : vector<16x32xf32>
    %318 = arith.truncf %42 : vector<32x32xf32> to vector<32x32xbf16>
    %cst_216 = arith.constant dense<0.000000e+00> : vector<8x32xf32>
    %319 = tpu.matmul %282, %318, %cst_216 {dimension_numbers = #tpu.dot_dimension_numbers<[1], [0], [0], [1], [0, 0, 1, 1], [], []>} : vector<8x32xbf16>, vector<32x32xbf16>, vector<8x32xf32> -> vector<8x32xf32>
    %320 = vector.broadcast %43 : vector<1x32xf32> to vector<8x32xf32>
    %321 = arith.addf %319, %320 : vector<8x32xf32>
    %322 = arith.truncf %317 : vector<16x32xf32> to vector<16x32xbf16>
    %323 = arith.truncf %40 : vector<32x32xf32> to vector<32x32xbf16>
    %cst_217 = arith.constant dense<0.000000e+00> : vector<16x32xf32>
    %324 = tpu.matmul %322, %323, %cst_217 {dimension_numbers = #tpu.dot_dimension_numbers<[1], [0], [0], [1], [0, 0, 1, 1], [], []>} : vector<16x32xbf16>, vector<32x32xbf16>, vector<16x32xf32> -> vector<16x32xf32>
    %325 = vector.broadcast %41 : vector<1x32xf32> to vector<16x32xf32>
    %326 = arith.addf %324, %325 : vector<16x32xf32>
    %327 = arith.truncf %326 : vector<16x32xf32> to vector<16x32xbf16>
    %328 = arith.truncf %321 : vector<8x32xf32> to vector<8x32xbf16>
    %cst_218 = arith.constant dense<0.000000e+00> : vector<16x32xf32>
    %329 = tpu.matmul %74, %328, %cst_218 {dimension_numbers = #tpu.dot_dimension_numbers<[1], [0], [0], [1], [0, 0, 1, 1], [], []>} : vector<16x8xbf16>, vector<8x32xbf16>, vector<16x32xf32> -> vector<16x32xf32>
    %cst_219 = arith.constant dense<0.000000e+00> : vector<16x32xf32>
    %330 = tpu.matmul %73, %327, %cst_219 {dimension_numbers = #tpu.dot_dimension_numbers<[1], [0], [0], [1], [0, 0, 1, 1], [], []>} : vector<16x16xbf16>, vector<16x32xbf16>, vector<16x32xf32> -> vector<16x32xf32>
    %331 = arith.truncf %329 : vector<16x32xf32> to vector<16x32xbf16>
    %332 = arith.truncf %26 : vector<32x32xf32> to vector<32x32xbf16>
    %cst_220 = arith.constant dense<0.000000e+00> : vector<16x32xf32>
    %333 = tpu.matmul %331, %332, %cst_220 {dimension_numbers = #tpu.dot_dimension_numbers<[1], [0], [0], [1], [0, 0, 1, 1], [], []>} : vector<16x32xbf16>, vector<32x32xbf16>, vector<16x32xf32> -> vector<16x32xf32>
    %334 = arith.truncf %330 : vector<16x32xf32> to vector<16x32xbf16>
    %335 = arith.truncf %27 : vector<32x32xf32> to vector<32x32xbf16>
    %cst_221 = arith.constant dense<0.000000e+00> : vector<16x32xf32>
    %336 = tpu.matmul %334, %335, %cst_221 {dimension_numbers = #tpu.dot_dimension_numbers<[1], [0], [0], [1], [0, 0, 1, 1], [], []>} : vector<16x32xbf16>, vector<32x32xbf16>, vector<16x32xf32> -> vector<16x32xf32>
    %337 = arith.addf %333, %336 : vector<16x32xf32>
    %338 = vector.broadcast %28 : vector<1x32xf32> to vector<16x32xf32>
    %339 = arith.addf %337, %338 : vector<16x32xf32>
    %cst_222 = arith.constant 0.000000e+00 : f32
    %340 = vector.broadcast %cst_222 : f32 to vector<16x32xf32>
    %341 = arith.maximumf %339, %340 : vector<16x32xf32>
    %342 = arith.truncf %341 : vector<16x32xf32> to vector<16x32xbf16>
    %343 = arith.truncf %29 : vector<32x16xf32> to vector<32x16xbf16>
    %cst_223 = arith.constant dense<0.000000e+00> : vector<16x16xf32>
    %344 = tpu.matmul %342, %343, %cst_223 {dimension_numbers = #tpu.dot_dimension_numbers<[1], [0], [0], [1], [0, 0, 1, 1], [], []>} : vector<16x32xbf16>, vector<32x16xbf16>, vector<16x16xf32> -> vector<16x16xf32>
    %345 = vector.broadcast %30 : vector<1x16xf32> to vector<16x16xf32>
    %346 = arith.addf %344, %345 : vector<16x16xf32>
    %cst_224 = arith.constant 0.000000e+00 : f32
    %347 = vector.broadcast %cst_224 : f32 to vector<16x16xf32>
    %348 = arith.maximumf %346, %347 : vector<16x16xf32>
    %349 = arith.truncf %348 : vector<16x16xf32> to vector<16x16xbf16>
    %350 = arith.truncf %31 : vector<16x8xf32> to vector<16x8xbf16>
    %cst_225 = arith.constant dense<0.000000e+00> : vector<16x8xf32>
    %351 = tpu.matmul %349, %350, %cst_225 {dimension_numbers = #tpu.dot_dimension_numbers<[1], [0], [0], [1], [0, 0, 1, 1], [], []>} : vector<16x16xbf16>, vector<16x8xbf16>, vector<16x8xf32> -> vector<16x8xf32>
    %352 = vector.broadcast %32 : vector<1x8xf32> to vector<16x8xf32>
    %353 = arith.addf %351, %352 : vector<16x8xf32>
    %cst_226 = arith.constant 0.000000e+00 : f32
    %354 = vector.broadcast %cst_226 : f32 to vector<16x8xf32>
    %355 = arith.maximumf %353, %354 : vector<16x8xf32>
    %356 = arith.truncf %355 : vector<16x8xf32> to vector<16x8xbf16>
    %357 = arith.truncf %33 : vector<8x1xf32> to vector<8x1xbf16>
    %cst_227 = arith.constant dense<0.000000e+00> : vector<16x1xf32>
    %358 = tpu.matmul %356, %357, %cst_227 {dimension_numbers = #tpu.dot_dimension_numbers<[1], [0], [0], [1], [0, 0, 1, 1], [], []>} : vector<16x8xbf16>, vector<8x1xbf16>, vector<16x1xf32> -> vector<16x1xf32>
    %359 = vector.broadcast %34 : vector<1x1xf32> to vector<16x1xf32>
    %360 = arith.addf %358, %359 : vector<16x1xf32>
    %361 = arith.truncf %360 : vector<16x1xf32> to vector<16x1xbf16>
    %362 = vector.broadcast %361 : vector<16x1xbf16> to vector<16x128xbf16>
    %363 = arith.mulf %362, %75 : vector<16x128xbf16>
    %cst_228 = arith.constant dense<0.000000e+00> : vector<8x128xf32>
    %364 = tpu.matmul %77, %363, %cst_228 {dimension_numbers = #tpu.dot_dimension_numbers<[1], [0], [0], [1], [0, 0, 1, 1], [], []>} : vector<8x16xbf16>, vector<16x128xbf16>, vector<8x128xf32> -> vector<8x128xf32>
    %cst_229 = arith.constant dense<0.000000e+00> : vector<128xf32>
    %365 = vector.multi_reduction <add>, %364, %cst_229 [0] : vector<8x128xf32> to vector<128xf32>
    %366 = vector.shape_cast %365 : vector<128xf32> to vector<1x128xf32>
    %367 = vector.broadcast %366 : vector<1x128xf32> to vector<8x128xf32>
    %368 = arith.divf %364, %367 : vector<8x128xf32>
    %cst_230 = arith.constant dense<0.000000e+00> : vector<48x32xf32>
    %369 = tpu.matmul %66, %327, %cst_230 {dimension_numbers = #tpu.dot_dimension_numbers<[1], [0], [0], [1], [0, 0, 1, 1], [], []>} : vector<48x16xbf16>, vector<16x32xbf16>, vector<48x32xf32> -> vector<48x32xf32>
    %cst_231 = arith.constant dense<0.000000e+00> : vector<48x32xf32>
    %370 = tpu.matmul %67, %327, %cst_231 {dimension_numbers = #tpu.dot_dimension_numbers<[1], [0], [0], [1], [0, 0, 1, 1], [], []>} : vector<48x16xbf16>, vector<16x32xbf16>, vector<48x32xf32> -> vector<48x32xf32>
    %371 = arith.truncf %369 : vector<48x32xf32> to vector<48x32xbf16>
    %372 = arith.truncf %17 : vector<32x32xf32> to vector<32x32xbf16>
    %cst_232 = arith.constant dense<0.000000e+00> : vector<48x32xf32>
    %373 = tpu.matmul %371, %372, %cst_232 {dimension_numbers = #tpu.dot_dimension_numbers<[1], [0], [0], [1], [0, 0, 1, 1], [], []>} : vector<48x32xbf16>, vector<32x32xbf16>, vector<48x32xf32> -> vector<48x32xf32>
    %374 = arith.truncf %370 : vector<48x32xf32> to vector<48x32xbf16>
    %375 = arith.truncf %18 : vector<32x32xf32> to vector<32x32xbf16>
    %cst_233 = arith.constant dense<0.000000e+00> : vector<48x32xf32>
    %376 = tpu.matmul %374, %375, %cst_233 {dimension_numbers = #tpu.dot_dimension_numbers<[1], [0], [0], [1], [0, 0, 1, 1], [], []>} : vector<48x32xbf16>, vector<32x32xbf16>, vector<48x32xf32> -> vector<48x32xf32>
    %377 = arith.addf %373, %376 : vector<48x32xf32>
    %378 = vector.broadcast %19 : vector<1x32xf32> to vector<48x32xf32>
    %379 = arith.addf %377, %378 : vector<48x32xf32>
    %cst_234 = arith.constant 0.000000e+00 : f32
    %380 = vector.broadcast %cst_234 : f32 to vector<48x32xf32>
    %381 = arith.maximumf %379, %380 : vector<48x32xf32>
    %382 = arith.truncf %381 : vector<48x32xf32> to vector<48x32xbf16>
    %383 = arith.truncf %20 : vector<32x16xf32> to vector<32x16xbf16>
    %cst_235 = arith.constant dense<0.000000e+00> : vector<48x16xf32>
    %384 = tpu.matmul %382, %383, %cst_235 {dimension_numbers = #tpu.dot_dimension_numbers<[1], [0], [0], [1], [0, 0, 1, 1], [], []>} : vector<48x32xbf16>, vector<32x16xbf16>, vector<48x16xf32> -> vector<48x16xf32>
    %385 = vector.broadcast %21 : vector<1x16xf32> to vector<48x16xf32>
    %386 = arith.addf %384, %385 : vector<48x16xf32>
    %cst_236 = arith.constant 0.000000e+00 : f32
    %387 = vector.broadcast %cst_236 : f32 to vector<48x16xf32>
    %388 = arith.maximumf %386, %387 : vector<48x16xf32>
    %389 = arith.truncf %388 : vector<48x16xf32> to vector<48x16xbf16>
    %390 = arith.truncf %22 : vector<16x8xf32> to vector<16x8xbf16>
    %cst_237 = arith.constant dense<0.000000e+00> : vector<48x8xf32>
    %391 = tpu.matmul %389, %390, %cst_237 {dimension_numbers = #tpu.dot_dimension_numbers<[1], [0], [0], [1], [0, 0, 1, 1], [], []>} : vector<48x16xbf16>, vector<16x8xbf16>, vector<48x8xf32> -> vector<48x8xf32>
    %392 = vector.broadcast %23 : vector<1x8xf32> to vector<48x8xf32>
    %393 = arith.addf %391, %392 : vector<48x8xf32>
    %cst_238 = arith.constant 0.000000e+00 : f32
    %394 = vector.broadcast %cst_238 : f32 to vector<48x8xf32>
    %395 = arith.maximumf %393, %394 : vector<48x8xf32>
    %396 = arith.truncf %395 : vector<48x8xf32> to vector<48x8xbf16>
    %397 = arith.truncf %24 : vector<8x1xf32> to vector<8x1xbf16>
    %cst_239 = arith.constant dense<0.000000e+00> : vector<48x1xf32>
    %398 = tpu.matmul %396, %397, %cst_239 {dimension_numbers = #tpu.dot_dimension_numbers<[1], [0], [0], [1], [0, 0, 1, 1], [], []>} : vector<48x8xbf16>, vector<8x1xbf16>, vector<48x1xf32> -> vector<48x1xf32>
    %399 = vector.broadcast %25 : vector<1x1xf32> to vector<48x1xf32>
    %400 = arith.addf %398, %399 : vector<48x1xf32>
    %401 = arith.truncf %400 : vector<48x1xf32> to vector<48x1xbf16>
    %402 = vector.broadcast %401 : vector<48x1xbf16> to vector<48x128xbf16>
    %403 = arith.mulf %402, %68 : vector<48x128xbf16>
    %cst_240 = arith.constant dense<0.000000e+00> : vector<16x128xf32>
    %404 = tpu.matmul %69, %403, %cst_240 {dimension_numbers = #tpu.dot_dimension_numbers<[1], [0], [0], [1], [0, 0, 1, 1], [], []>} : vector<16x48xbf16>, vector<48x128xbf16>, vector<16x128xf32> -> vector<16x128xf32>
    %c0_241 = arith.constant 0 : index
    %c0_242 = arith.constant 0 : index
    %405 = vector.load %arg78[%c0_241, %c0_242] : memref<16x128xf32, #tpu.memory_space<vmem>>, vector<16x128xf32>
    tpu.vector_store %arg78[%c0_241, %c0_242], %404 {strides = array<i32>} : memref<16x128xf32, #tpu.memory_space<vmem>>, vector<16x128xf32>,
    %c0_243 = arith.constant 0 : index
    %c0_244 = arith.constant 0 : index
    %406 = vector.load %arg79[%c0_243, %c0_244] : memref<8x128xf32, #tpu.memory_space<vmem>>, vector<8x128xf32>
    tpu.vector_store %arg79[%c0_243, %c0_244], %368 {strides = array<i32>} : memref<8x128xf32, #tpu.memory_space<vmem>>, vector<8x128xf32>,
    return
  }
}

</mosaic_0001>

<bundles_post_ra>
// kernel: forward.1
= control target key start
LH: loop header
LB: loop body
LE: loop exit
PB: predicated region body
PF: predicated region fallthrough
CT: control target
= control target key end

     0   :  { %s4942_s6 = smov 1   ;;  %s4943_s10 = smov 2   ;;  %s6070_s0 = inlined_call_operand.smem [shape: u32[80], index: -1, kind: input, shape index: {}] }
   0x1   :  { %s5087_s5 = sld [smem:[%s6070_s0]]   ;;  %s4944_s14 = smov 3  }
   0x2   :  { %s5092_s9 = sld [smem:[%s6070_s0 + %s4942_s6]]   ;;  %s4945_s18 = smov 4  }
   0x3   :  { %s5097_s13 = sld [smem:[%s6070_s0 + %s4943_s10]]   ;;  %s4946_s22 = smov 5  }
   0x4   :  { %s5102_s17 = sld [smem:[%s6070_s0 + %s4944_s14]]   ;;  %s4947_s26 = smov 6  }
   0x5   :  { %s5107_s21 = sld [smem:[%s6070_s0 + %s4945_s18]]   ;;  %s4948_s30 = smov 7  }
   0x6   :  { %s5112_s25 = sld [smem:[%s6070_s0 + %s4946_s22]]   ;;  %s4949_s4 = smov 8  }
   0x7   :  { %6125 = sst [smem:[#allocation107_spill]] %s5087_s5  ;;  %s4950_s10 = smov 9  }
   0x8   :  { %6126 = sst [smem:[#allocation108_spill]] %s5092_s9  ;;  %s4951_s15 = smov 10  }
   0x9   :  { %6127 = sst [smem:[#allocation109_spill]] %s5097_s13  ;;  %s4952_s20 = smov 11  }
   0xa   :  { %6128 = sst [smem:[#allocation110_spill]] %s5102_s17  ;;  %s4954_s1 = smov 13  }
   0xb   :  { %s5117_s29 = sld [smem:[%s6070_s0 + %s4947_s26]]   ;;  %s4953_s26 = smov 12  }
   0xc   :  { %6129 = sst [smem:[#allocation111_spill]] %s5112_s25  ;;  %s4955_s7 = smov 14  }
   0xd   :  { %s5122_s3 = sld [smem:[%s6070_s0 + %s4948_s30]]   ;;  %s4957_s22 = smov 16  }
   0xe   :  { %s5127_s8 = sld [smem:[%s6070_s0 + %s4949_s4]]   ;;  %s4958_s28 = smov 17  }
   0xf   :  { %s5132_s14 = sld [smem:[%s6070_s0 + %s4950_s10]]   ;;  %s4983_s10 = smov 42  }
  0x10   :  { %s5137_s19 = sld [smem:[%s6070_s0 + %s4951_s15]]   ;;  %s4956_s15 = smov 15  }
  0x11   :  { %6130 = sst [smem:[#allocation112_spill]] %s5117_s29  ;;  %s4984_s16 = smov 43  }
  0x12   :  { %s5142_s24 = sld [smem:[%s6070_s0 + %s4952_s20]]   ;;  %s4985_s23 = smov 44  }
  0x13   :  { %s5147_s30 = sld [smem:[%s6070_s0 + %s4953_s26]]  }
  0x14   :  { %6131 = sst [smem:[#allocation113_spill]] %s5127_s8 }
  0x15   :  { %6132 = sst [smem:[#allocation114_spill]] %s5132_s14 }
  0x16   :  { %6133 = sst [smem:[#allocation115_spill]] %s5137_s19 }
  0x17   :  { %s5152_s6 = sld [smem:[%s6070_s0 + %s4954_s1]]   ;;  %s4986_s1 = smov 45  }
  0x18   :  { %6134 = sst [smem:[#allocation116_spill]] %s5142_s24 }
  0x19   :  { %s5157_s12 = sld [smem:[%s6070_s0 + %s4955_s7]]   ;;  %s4959_s7 = smov 18  }
  0x1a   :  { %s5162_s20 = sld [smem:[%s6070_s0 + %s4956_s15]]   ;;  %s4960_s15 = smov 19  }
  0x1b   :  { %s5167_s27 = sld [smem:[%s6070_s0 + %s4957_s22]]   ;;  %s4961_s22 = smov 20  }
  0x1c   :  { %s5172_s4 = sld [smem:[%s6070_s0 + %s4958_s28]]   ;;  %s4962_s28 = smov 21  }
  0x1d   :  { %6135 = sst [smem:[#allocation117_spill]] %s5152_s6 }
  0x1e   :  { %s5177_s29 = sld [smem:[%s6070_s0 + %s4959_s7]]   ;;  %s4963_s7 = smov 22  }
  0x1f   :  { %6136 = sst [smem:[#allocation118_spill]] %s5157_s12 }
  0x20   :  { %6137 = sst [smem:[#allocation119_spill]] %s5162_s20 }
  0x21   :  { %6138 = sst [smem:[#allocation120_spill]] %s5167_s27 }
  0x22   :  { %6139 = sst [smem:[#allocation121_spill]] %s5172_s4 }
  0x23   :  { %s5182_s12 = sld [smem:[%s6070_s0 + %s4960_s15]]   ;;  %s4964_s15 = smov 23  }
  0x24   :  { %s5187_s27 = sld [smem:[%s6070_s0 + %s4961_s22]]   ;;  %s4965_s22 = smov 24  }
  0x25   :  { %s5192_s4 = sld [smem:[%s6070_s0 + %s4962_s28]]   ;;  %s4966_s28 = smov 25  }
  0x26   :  { %s5197_s20 = sld [smem:[%s6070_s0 + %s4963_s7]]   ;;  %s4967_s7 = smov 26  }
  0x27   :  { %s5207_s24 = sld [smem:[%s6070_s0 + %s4965_s22]]   ;;  %s4969_s22 = smov 28  }
  0x28   :  { %s5227_s19 = sld [smem:[%s6070_s0 + %s4969_s22]]   ;;  %s4973_s22 = smov 32  }
  0x29   :  { %6140 = sst [smem:[#allocation122_spill]] %s5182_s12 }
  0x2a   :  { %6141 = sst [smem:[#allocation123_spill]] %s5187_s27 }
  0x2b   :  { %6142 = sst [smem:[#allocation124_spill]] %s5192_s4 }
  0x2c   :  { %6143 = sst [smem:[#allocation125_spill]] %s5197_s20 }
  0x2d   :  { %s5202_s12 = sld [smem:[%s6070_s0 + %s4964_s15]]   ;;  %s4968_s15 = smov 27  }
  0x2e   :  { %s5212_s4 = sld [smem:[%s6070_s0 + %s4966_s28]]   ;;  %s4970_s28 = smov 29  }
  0x2f   :  { %s5217_s20 = sld [smem:[%s6070_s0 + %s4967_s7]]   ;;  %s4971_s7 = smov 30  }
  0x30   :  { %6148 = sst [smem:[#allocation130_spill]] %s5227_s19 }
  0x31   :  { %s5237_s14 = sld [smem:[%s6070_s0 + %s4971_s7]]   ;;  %s4975_s7 = smov 34  }
  0x32   :  { %s5257_s5 = sld [smem:[%s6070_s0 + %s4975_s7]]   ;;  %s4979_s7 = smov 38  }
  0x33   :  { %6144 = sst [smem:[#allocation126_spill]] %s5202_s12 }
  0x34   :  { %6145 = sst [smem:[#allocation127_spill]] %s5212_s4 }
  0x35   :  { %6146 = sst [smem:[#allocation128_spill]] %s5217_s20 }
  0x36   :  { %s5222_s12 = sld [smem:[%s6070_s0 + %s4968_s15]]   ;;  %s4972_s15 = smov 31  }
  0x37   :  { %s5232_s4 = sld [smem:[%s6070_s0 + %s4970_s28]]   ;;  %s4974_s28 = smov 33  }
  0x38   :  { %6149 = sst [smem:[#allocation131_spill]] %s5237_s14 }
  0x39   :  { %s5247_s20 = sld [smem:[%s6070_s0 + %s4973_s22]]   ;;  %s4977_s22 = smov 36  }
  0x3a   :  { %s5252_s17 = sld [smem:[%s6070_s0 + %s4974_s28]]   ;;  %s4978_s28 = smov 37  }
  0x3b   :  { %6151 = sst [smem:[#allocation133_spill]] %s5257_s5 }
  0x3c   :  { %6147 = sst [smem:[#allocation129_spill]] %s5222_s12 }
  0x3d   :  { %s5242_s12 = sld [smem:[%s6070_s0 + %s4972_s15]]   ;;  %s4976_s15 = smov 35  }
  0x3e   :  { %s5262_s9 = sld [smem:[%s6070_s0 + %s4976_s15]]   ;;  %s4980_s15 = smov 39  }
  0x3f   :  { %6150 = sst [smem:[#allocation132_spill]] %s5247_s20 }
  0x40   :  { %s5267_s20 = sld [smem:[%s6070_s0 + %s4977_s22]]   ;;  %s4981_s22 = smov 40  }
  0x41   :  { %s5272_s14 = sld [smem:[%s6070_s0 + %s4978_s28]]   ;;  %s4982_s28 = smov 41  }
  0x42   :  { %s5277_s5 = sld [smem:[%s6070_s0 + %s4979_s7]]   ;;  %s4991_s7 = smov 51  }
  0x43   :  { %s5282_s19 = sld [smem:[%s6070_s0 + %s4980_s15]]  }
  0x44   :  { %s5300_s27 = sld [smem:[%s6070_s0 + %s4984_s16]]   ;;  %s4988_s16 = smov 47  }
  0x45   :  { %s5310_s6 = sld [smem:[%s6070_s0 + %s4986_s1]]   ;;  %s4990_s1 = smov 49  }
  0x46   :  { %6152 = sst [smem:[#allocation134_spill]] %s5267_s20 }
  0x47   :  { %6153 = sst [smem:[#allocation135_spill]] %s5272_s14 }
  0x48   :  { %6154 = sst [smem:[#allocation136_spill]] %s5277_s5 }
  0x49   :  { %s5287_s20 = sld [smem:[%s6070_s0 + %s4981_s22]]  }
  0x4a   :  { %s3331_s14 = sld [smem:[%s6070_s0 + %s4982_s28]]  }
  0x4b   :  { %s5295_s5 = sld [smem:[%s6070_s0 + %s4983_s10]]   ;;  %s4987_s10 = smov 46  }
  0x4c   :  { %6158 = sst [smem:[#allocation140_spill]] %s5310_s6  ;;  %s4994_s6 = smov 54  }
  0x4d   :  { %s5320_s8 = sld [smem:[%s6070_s0 + %s4988_s16]]  }
  0x4e   :  { %s5335_s16 = sld [smem:[%s6070_s0 + %s4991_s7]]   ;;  %s5019_s7 = smov 65  }
  0x4f   :  { %6155 = sst [smem:[#allocation137_spill]] %s5287_s20 }
  0x50   :  { %s5305_s20 = sld [smem:[%s6070_s0 + %s4985_s23]]   ;;  %v165_v0 = vstv %s3331_s14  ;;  %s4989_s23 = smov 48  }
  0x51   :  { %6156 = sst [smem:[#allocation138_spill]] %s5295_s5  ;;  %166 = vst [vmem:[#allocation2] sm:$0x1] %v165_v0  ;;  %s4992_s14 = smov 52  }
  0x52   :  { %s5315_s5 = sld [smem:[%s6070_s0 + %s4987_s10]]  }
  0x53   :  { %6159 = sst [smem:[#allocation141_spill]] %s5320_s8  ;;  %s4997_s8 = smov 57  }
  0x54   :  { %s5325_s28 = sld [smem:[%s6070_s0 + %s4989_s23]]   ;;  %s4993_s23 = smov 53  }
  0x55   :  { %s5330_s10 = sld [smem:[%s6070_s0 + %s4990_s1]]  }
  0x56   :  { %6157 = sst [smem:[#allocation139_spill]] %s5305_s20  ;;  %s4995_s20 = smov 55  }
  0x57   :  { %6162 = sst [smem:[#allocation144_spill]] %s5335_s16 }
  0x58   :  { %s5340_s22 = sld [smem:[%s6070_s0 + %s4992_s14]]   ;;  %s4996_s14 = smov 56  }
  0x59   :  { %s5355_s16 = sld [smem:[%s6070_s0 + %s4995_s20]]   ;;  %s4999_s20 = smov 59  }
  0x5a   :  { %6160 = sst [smem:[#allocation142_spill]] %s5325_s28 }
  0x5b   :  { %6161 = sst [smem:[#allocation143_spill]] %s5330_s10 }
  0x5c   :  { %s5345_s28 = sld [smem:[%s6070_s0 + %s4993_s23]]  }
  0x5d   :  { %s5350_s10 = sld [smem:[%s6070_s0 + %s4994_s6]]   ;;  %s4998_s6 = smov 58  }
  0x5e   :  { %s5360_s25 = sld [smem:[%s6070_s0 + %s4996_s14]]   ;;  %s5000_s14 = smov 60  }
  0x5f   :  { %6165 = sst [smem:[#allocation147_spill]] %s5355_s16 }
  0x60   :  { %s5370_s13 = sld [smem:[%s6070_s0 + %s4998_s6]]   ;;  %s5002_s6 = smov 62  }
  0x61   :  { %s5375_s16 = sld [smem:[%s6070_s0 + %s4999_s20]]   ;;  %s5003_s20 = smov 63  }
  0x62   :  { %6163 = sst [smem:[#allocation145_spill]] %s5345_s28 }
  0x63   :  { %6164 = sst [smem:[#allocation146_spill]] %s5350_s10  ;;  %s5020_s10 = smov 71  }
  0x64   :  { %6166 = sst [smem:[#allocation148_spill]] %s5360_s25 }
  0x65   :  { %s5365_s28 = sld [smem:[%s6070_s0 + %s4997_s8]]   ;;  %s5001_s8 = smov 61  }
  0x66   :  { %6168 = sst [smem:[#allocation150_spill]] %s5370_s13 }
  0x67   :  { %6169 = sst [smem:[#allocation151_spill]] %s5375_s16 }
  0x68   :  { %s5380_s25 = sld [smem:[%s6070_s0 + %s5000_s14]]   ;;  %s5004_s14 = smov 64  }
  0x69   :  { %s5390_s13 = sld [smem:[%s6070_s0 + %s5002_s6]]   ;;  %s5006_s6 = smov 67  }
  0x6a   :  { %s5395_s16 = sld [smem:[%s6070_s0 + %s5003_s20]]   ;;  %s5007_s20 = smov 68  }
  0x6b   :  { %6167 = sst [smem:[#allocation149_spill]] %s5365_s28 }
  0x6c   :  { %s5385_s28 = sld [smem:[%s6070_s0 + %s5001_s8]]   ;;  %s5005_s8 = smov 66  }
  0x6d   :  { %s3361_s18 = sld [smem:[%s6070_s0 + %s5020_s10]]  }
  0x6e   :  { %6170 = sst [smem:[#allocation152_spill]] %s5380_s25 }
  0x6f   :  { %6172 = sst [smem:[#allocation154_spill]] %s5390_s13 }
  0x70   :  { %6173 = sst [smem:[#allocation155_spill]] %s5395_s16 }
  0x71   :  { %s5400_s25 = sld [smem:[%s6070_s0 + %s5004_s14]]   ;;  %s5008_s14 = smov 69  }
  0x72   :  { %6171 = sst [smem:[#allocation153_spill]] %s5385_s28 }
  0x73   :  { %s5405_s28 = sld [smem:[%s6070_s0 + %s5005_s8]]   ;;  %s5009_s8 = smov 70   ;;  %v171_v3 = vstv %s3361_s18 }
  0x74   :  { %s5410_s13 = sld [smem:[%s6070_s0 + %s5006_s6]]   ;;  %s5010_s6 = smov 72   ;;  %172 = vst [vmem:[#allocation5] sm:$0x1] %v171_v3 }
  0x75   :  { %s5415_s16 = sld [smem:[%s6070_s0 + %s5007_s20]]   ;;  %s5011_s20 = smov 73  }
  0x77   :  { %6174 = sst [smem:[#allocation156_spill]] %s5400_s25 }
  0x78   :  { %s5420_s25 = sld [smem:[%s6070_s0 + %s5008_s14]]   ;;  %s5012_s14 = smov 74  }
  0x79   :  { %6175 = sst [smem:[#allocation157_spill]] %s5405_s28 }
  0x7a   :  { %6176 = sst [smem:[#allocation158_spill]] %s5410_s13 }
  0x7b   :  { %6177 = sst [smem:[#allocation159_spill]] %s5415_s16 }
  0x7c   :  { %s5425_s28 = sld [smem:[%s6070_s0 + %s5009_s8]]   ;;  %s5013_s8 = smov 75  }
  0x7d   :  { %s5430_s13 = sld [smem:[%s6070_s0 + %s5010_s6]]   ;;  %s5014_s6 = smov 76  }
  0x7e   :  { %6178 = sst [smem:[#allocation160_spill]] %s5420_s25 }
  0x7f   :  { %s5435_s16 = sld [smem:[%s6070_s0 + %s5011_s20]]   ;;  %s5015_s20 = smov 77  }
  0x80   :  { %s5440_s25 = sld [smem:[%s6070_s0 + %s5012_s14]]   ;;  %s5016_s14 = smov 78  }
  0x82   :  { %6179 = sst [smem:[#allocation161_spill]] %s5425_s28 }
  0x83   :  { %6180 = sst [smem:[#allocation162_spill]] %s5430_s13 }
  0x84   :  { %s5445_s28 = sld [smem:[%s6070_s0 + %s5013_s8]]   ;;  %s5017_s8 = smov 79  }
  0x85   :  { %6181 = sst [smem:[#allocation163_spill]] %s5435_s16 }
  0x86   :  { %6182 = sst [smem:[#allocation164_spill]] %s5440_s25 }
  0x87   :  { %s5450_s13 = sld [smem:[%s6070_s0 + %s5014_s6]]   ;;  %s5018_s6 = smov 50  }
  0x88   :  { %s5455_s16 = sld [smem:[%s6070_s0 + %s5015_s20]]  }
  0x89   :  { %s5460_s25 = sld [smem:[%s6070_s0 + %s5016_s14]]  }
  0x8a   :  { %6183 = sst [smem:[#allocation165_spill]] %s5445_s28 }
  0x8b   :  { %s5465_s28 = sld [smem:[%s6070_s0 + %s5017_s8]]  }
  0x8d   :  { %6184 = sst [smem:[#allocation166_spill]] %s5450_s13 }
  0x8e   :  { %6185 = sst [smem:[#allocation167_spill]] %s5455_s16 }
  0x8f   :  { %s3340_s13 = sld [smem:[%s6070_s0 + %s5018_s6]]  }
  0x90   :  { %s3355_s16 = sld [smem:[%s6070_s0 + %s5019_s7]]  }
  0x95   :  { %v167_v1 = vstv %s3340_s13 }
  0x96   :  { %168 = vst [vmem:[#allocation3] sm:$0x1] %v167_v1  ;;  %v169_v2 = vstv %s3355_s16 }
  0x97   :  { %170 = vst [vmem:[#allocation4] sm:$0x1] %v169_v2 }
  0x98   :  { %173 = vsyncpa [#allocation7], 0 }
  0x99   :  { %174 = vsyncpa [#allocation10], 0 }
  0x9a   :  { %175 = vsyncpa [#allocation13], 0 }
  0x9b   :  { %176 = vsyncpa [#allocation16], 0 }
  0x9c   :  { %177 = vsyncpa [#allocation19], 0 }
  0x9d   :  { %178 = vsyncpa [#allocation22], 0 }
  0x9e   :  { %179 = vsyncpa [#allocation25], 0 }
  0x9f   :  { %180 = vsyncpa [#allocation28], 0 }
  0xa0   :  { %181 = vsyncpa [#allocation31], 0 }
  0xa1   :  { %182 = vsyncpa [#allocation34], 0 }
  0xa2   :  { %183 = vsyncpa [#allocation37], 0 }
  0xa3   :  { %184 = vsyncpa [#allocation40], 0 }
  0xa4   :  { %185 = vsyncpa [#allocation43], 0 }
  0xa5   :  { %186 = vsyncpa [#allocation46], 0 }
  0xa6   :  { %187 = vsyncpa [#allocation49], 0 }
  0xa7   :  { %188 = vsyncpa [#allocation52], 0 }
  0xa8   :  { %189 = vsyncpa [#allocation55], 0 }
  0xa9   :  { %190 = vsyncpa [#allocation58], 0 }
  0xaa   :  { %191 = vsyncpa [#allocation61], 0 }
  0xab   :  { %192 = vsyncpa [#allocation64], 0 }
  0xac   :  { %193 = vsyncpa [#allocation67], 0 }
  0xad   :  { %194 = vsyncpa [#allocation70], 0 }
  0xae   :  { %195 = vsyncpa [#allocation73], 0 }
  0xaf   :  { %196 = vsyncpa [#allocation76], 0 }
  0xb0   :  { %197 = vsyncpa [#allocation8], 0  ;;  %s222_s0 = sshll.u32 %s5107_s21, 4  ;;  %s223_s0 = int_to_ptr.hbm [resolvable:$true] %s222_s0 }
  0xb1   :  { %198 = vsyncpa [#allocation80], 0  ;;  %s5021_s13 = smov [#allocation9]   ;;  %s250_s16 = sshll.u32 %s5122_s3, 4  ;;  %s251_s16 = int_to_ptr.hbm [resolvable:$true] %s250_s16 }
  0xb2   :  { %s224_s10 = sshll.u32 %s5021_s13, 4  ;;  %s3714_s8 = sshra.s32 %s223_s0, 4  ;;  %s225_s10 = int_to_ptr.vmem [resolvable:$true] %s224_s10  ;;  %s3715_s8 = int_to_ptr.hbm [resolvable:$true] %s3714_s8 }
  0xb3   :  { %s3716_s23 = scalar_lea.hbm %s3715_s8, 24  ;;  %s3718_s26 = scalar_lea.hbm %s5107_s21, 24 }
  0xb4   :  { %p3717_p0 = scmp.ne.s32.totalorder %s3715_s8, %s3716_s23  ;;  %p3719_p1 = scmp.lt.s32.totalorder %s3715_s8, %s5107_s21 }
  0xb5   :  { %p3720_p2 = scmp.lt.s32.totalorder %s3718_s26, %s3716_s23 }
  0xb7   :  { %p3721_p3 = por %p3720_p2, %p3719_p1 }
  0xb9   :  { %p3722_p4 = pnand %p3721_p3, %p3717_p0 }
  0xbb   :  { %3725 = shalt.err (!%p3722_p4)
}
  0xbc   :  { %s5022_s6 = smov 64   ;;  %s5023_s1 = smov 4  }
  0xbd   :  { %230 = dma.hbm_to_vmem [thread:$0]  %s223_s0, 384, %s225_s10, [#allocation10], %s5022_s6, %s5022_s6, %s5023_s1  }
  0xbe   :  { %s5024_s2 = smov [#allocation12]   ;;  %s282_s20 = sshll.u32 %s5147_s30, 4  ;;  %s5484_s20 = int_to_ptr.hbm [resolvable:$true] %s282_s20 }
  0xbf   :  { %s252_s7 = sshll.u32 %s5024_s2, 4  ;;  %s3738_s21 = sshra.s32 %s251_s16, 4  ;;  %s253_s7 = int_to_ptr.vmem [resolvable:$true] %s252_s7  ;;  %s3739_s21 = int_to_ptr.hbm [resolvable:$true] %s3738_s21 }
  0xc0   :  { %s3740_s11 = scalar_lea.hbm %s3739_s21, 8  ;;  %s3742_s15 = scalar_lea.hbm %s5122_s3, 8 }
  0xc1   :  { %p3741_p5 = scmp.ne.s32.totalorder %s3739_s21, %s3740_s11  ;;  %p3743_p6 = scmp.lt.s32.totalorder %s3739_s21, %s5122_s3 }
  0xc2   :  { %p3744_p7 = scmp.lt.s32.totalorder %s3742_s15, %s3740_s11 }
  0xc4   :  { %p3745_p8 = por %p3744_p7, %p3743_p6 }
  0xc6   :  { %p3746_p9 = pnand %p3745_p8, %p3741_p5 }
  0xc8   :  { %3749 = shalt.err (!%p3746_p9)
}
  0xc9   :  { %258 = dma.hbm_to_vmem [thread:$0]  %s251_s16, 128, %s253_s7, [#allocation13], %s5022_s6, %s5022_s6, %s5023_s1  }
  0xca   :  { %s317_s14 = sshll.u32 %s5177_s29, 4  ;;  %s5025_s18 = smov [#allocation15]   ;;  %s318_s14 = int_to_ptr.hbm [resolvable:$true] %s317_s14 }
  0xcb   :  { %s284_s0 = sshll.u32 %s5025_s18, 4  ;;  %s3762_s13 = sshra.s32 %s5484_s20, 4  ;;  %s285_s0 = int_to_ptr.vmem [resolvable:$true] %s284_s0  ;;  %s3763_s13 = int_to_ptr.hbm [resolvable:$true] %s3762_s13 }
  0xcc   :  { %s3764_s3 = scalar_lea.hbm %s3763_s13, 8  ;;  %s3766_s10 = scalar_lea.hbm %s5147_s30, 8 }
  0xcd   :  { %p3765_p10 = scmp.ne.s32.totalorder %s3763_s13, %s3764_s3  ;;  %p3767_p11 = scmp.lt.s32.totalorder %s3763_s13, %s5147_s30 }
  0xce   :  { %p3768_p12 = scmp.lt.s32.totalorder %s3766_s10, %s3764_s3 }
  0xd0   :  { %p3769_p13 = por %p3768_p12, %p3767_p11 }
  0xd2   :  { %p3770_p0 = pnand %p3769_p13, %p3765_p10 }
  0xd4   :  { %3773 = shalt.err (!%p3770_p0)
}
  0xd5   :  { %290 = dma.hbm_to_vmem [thread:$0]  %s5484_s20, 128, %s285_s0, [#allocation16], %s5022_s6, %s5022_s6, %s5023_s1  }
  0xd6   :  { %s5026_s16 = smov [#allocation18]   ;;  %s347_s23 = sshll.u32 %s5207_s24, 4  ;;  %s348_s23 = int_to_ptr.hbm [resolvable:$true] %s347_s23 }
  0xd7   :  { %s319_s8 = sshll.u32 %s5026_s16, 4  ;;  %s3786_s26 = sshra.s32 %s318_s14, 4  ;;  %s320_s8 = int_to_ptr.vmem [resolvable:$true] %s319_s8  ;;  %s3787_s26 = int_to_ptr.hbm [resolvable:$true] %s3786_s26 }
  0xd8   :  { %s3788_s30 = scalar_lea.hbm %s3787_s26, 1  ;;  %s3790_s2 = scalar_lea.hbm %s5177_s29, 1 }
  0xd9   :  { %p3789_p1 = scmp.ne.s32.totalorder %s3787_s26, %s3788_s30  ;;  %p3791_p2 = scmp.lt.s32.totalorder %s3787_s26, %s5177_s29 }
  0xda   :  { %p3792_p3 = scmp.lt.s32.totalorder %s3790_s2, %s3788_s30 }
  0xdc   :  { %p3793_p4 = por %p3792_p3, %p3791_p2 }
  0xde   :  { %p3794_p5 = pnand %p3793_p4, %p3789_p1 }
  0xe0   :  { %3797 = shalt.err (!%p3794_p5)
}
  0xe1   :  { %322 = dma.hbm_to_vmem [thread:$0]  %s318_s14, 16, %s320_s8, [#allocation19]  }
  0xe2   :  { %s5027_s7 = smov [#allocation21]   ;;  %s374_s21 = sshll.u32 %s5232_s4, 4  ;;  %s375_s21 = int_to_ptr.hbm [resolvable:$true] %s374_s21 }
  0xe3   :  { %s349_s20 = sshll.u32 %s5027_s7, 4  ;;  %s3810_s11 = sshra.s32 %s348_s23, 4  ;;  %s350_s20 = int_to_ptr.vmem [resolvable:$true] %s349_s20  ;;  %s3811_s11 = int_to_ptr.hbm [resolvable:$true] %s3810_s11 }
  0xe4   :  { %s3812_s15 = scalar_lea.hbm %s3811_s11, 1  ;;  %s3814_s18 = scalar_lea.hbm %s5207_s24, 1 }
  0xe5   :  { %p3813_p6 = scmp.ne.s32.totalorder %s3811_s11, %s3812_s15  ;;  %p3815_p7 = scmp.lt.s32.totalorder %s3811_s11, %s5207_s24 }
  0xe6   :  { %p3816_p8 = scmp.lt.s32.totalorder %s3814_s18, %s3812_s15 }
  0xe8   :  { %p3817_p9 = por %p3816_p8, %p3815_p7 }
  0xea   :  { %p3818_p10 = pnand %p3817_p9, %p3813_p6 }
  0xec   :  { %3821 = shalt.err (!%p3818_p10)
}
  0xed   :  { %352 = dma.hbm_to_vmem [thread:$0]  %s348_s23, 16, %s350_s20, [#allocation22]  }
  0xee   :  { %s5028_s29 = smov [#allocation24]   ;;  %s400_s0 = sshll.u32 %s5242_s12, 4  ;;  %s5506_s0 = int_to_ptr.hbm [resolvable:$true] %s400_s0 }
  0xef   :  { %s376_s14 = sshll.u32 %s5028_s29, 4  ;;  %s3834_s13 = sshra.s32 %s375_s21, 4  ;;  %s377_s14 = int_to_ptr.vmem [resolvable:$true] %s376_s14  ;;  %s3835_s13 = int_to_ptr.hbm [resolvable:$true] %s3834_s13 }
  0xf0   :  { %s3836_s3 = scalar_lea.hbm %s3835_s13, 32  ;;  %s3838_s24 = scalar_lea.hbm %s5232_s4, 32 }
  0xf1   :  { %p3837_p11 = scmp.ne.s32.totalorder %s3835_s13, %s3836_s3  ;;  %p3839_p12 = scmp.lt.s32.totalorder %s3835_s13, %s5232_s4 }
  0xf2   :  { %p3840_p13 = scmp.lt.s32.totalorder %s3838_s24, %s3836_s3 }
  0xf4   :  { %p3841_p0 = por %p3840_p13, %p3839_p12 }
  0xf6   :  { %p3842_p1 = pnand %p3841_p0, %p3837_p11 }
  0xf8   :  { %3845 = shalt.err (!%p3842_p1)
}
  0xf9   :  { %s5029_s10 = smov 128   ;;  %s5030_s16 = smov 8  }
  0xfa   :  { %382 = dma.hbm_to_vmem [thread:$0]  %s375_s21, 512, %s377_s14, [#allocation25], %s5029_s10, %s5029_s10, %s5030_s16  }
  0xfb   :  { %s424_s8 = sshll.u32 %s5252_s17, 4  ;;  %s5031_s23 = smov [#allocation27]   ;;  %s5514_s8 = int_to_ptr.hbm [resolvable:$true] %s424_s8 }
  0xfc   :  { %s402_s26 = sshll.u32 %s5031_s23, 4  ;;  %s3858_s4 = sshra.s32 %s5506_s0, 4  ;;  %s403_s26 = int_to_ptr.vmem [resolvable:$true] %s402_s26  ;;  %s3859_s4 = int_to_ptr.hbm [resolvable:$true] %s3858_s4 }
  0xfd   :  { %s3860_s30 = scalar_lea.hbm %s3859_s4, 32  ;;  %s3862_s2 = scalar_lea.hbm %s5242_s12, 32 }
  0xfe   :  { %p3861_p2 = scmp.ne.s32.totalorder %s3859_s4, %s3860_s30  ;;  %p3863_p3 = scmp.lt.s32.totalorder %s3859_s4, %s5242_s12 }
  0xff   :  { %p3864_p4 = scmp.lt.s32.totalorder %s3862_s2, %s3860_s30 }
 0x101   :  { %p3865_p5 = por %p3864_p4, %p3863_p3 }
 0x103   :  { %p3866_p6 = pnand %p3865_p5, %p3861_p2 }
 0x105   :  { %3869 = shalt.err (!%p3866_p6)
}
 0x106   :  { %408 = dma.hbm_to_vmem [thread:$0]  %s5506_s0, 512, %s403_s26, [#allocation28], %s5029_s10, %s5029_s10, %s5030_s16  }
 0x107   :  { %s5032_s7 = smov [#allocation30]   ;;  %s451_s21 = sshll.u32 %s5262_s9, 4  ;;  %s452_s21 = int_to_ptr.hbm [resolvable:$true] %s451_s21 }
 0x108   :  { %s426_s20 = sshll.u32 %s5032_s7, 4  ;;  %s3882_s11 = sshra.s32 %s5514_s8, 4  ;;  %s427_s20 = int_to_ptr.vmem [resolvable:$true] %s426_s20  ;;  %s3883_s11 = int_to_ptr.hbm [resolvable:$true] %s3882_s11 }
 0x109   :  { %s3884_s12 = scalar_lea.hbm %s3883_s11, 32  ;;  %s3886_s15 = scalar_lea.hbm %s5252_s17, 32 }
 0x10a   :  { %p3885_p7 = scmp.ne.s32.totalorder %s3883_s11, %s3884_s12  ;;  %p3887_p8 = scmp.lt.s32.totalorder %s3883_s11, %s5252_s17 }
 0x10b   :  { %p3888_p9 = scmp.lt.s32.totalorder %s3886_s15, %s3884_s12 }
 0x10d   :  { %p3889_p10 = por %p3888_p9, %p3887_p8 }
 0x10f   :  { %p3890_p11 = pnand %p3889_p10, %p3885_p7 }
 0x111   :  { %3893 = shalt.err (!%p3890_p11)
}
 0x112   :  { %432 = dma.hbm_to_vmem [thread:$0]  %s5514_s8, 512, %s427_s20, [#allocation31], %s5029_s10, %s5029_s10, %s5030_s16  }
 0x113   :  { %s477_s18 = sshll.u32 %s5282_s19, 4  ;;  %s5033_s29 = smov [#allocation33]   ;;  %s478_s18 = int_to_ptr.hbm [resolvable:$true] %s477_s18 }
 0x114   :  { %s453_s14 = sshll.u32 %s5033_s29, 4  ;;  %s3906_s0 = sshra.s32 %s452_s21, 4  ;;  %s454_s14 = int_to_ptr.vmem [resolvable:$true] %s453_s14  ;;  %s3907_s0 = int_to_ptr.hbm [resolvable:$true] %s3906_s0 }
 0x115   :  { %s3908_s17 = scalar_lea.hbm %s3907_s0, 1  ;;  %s3910_s13 = scalar_lea.hbm %s5262_s9, 1 }
 0x116   :  { %p3909_p12 = scmp.ne.s32.totalorder %s3907_s0, %s3908_s17  ;;  %p3911_p13 = scmp.lt.s32.totalorder %s3907_s0, %s5262_s9 }
 0x117   :  { %p3912_p0 = scmp.lt.s32.totalorder %s3910_s13, %s3908_s17 }
 0x119   :  { %p3913_p1 = por %p3912_p0, %p3911_p13 }
 0x11b   :  { %p3914_p2 = pnand %p3913_p1, %p3909_p12 }
 0x11d   :  { %3917 = shalt.err (!%p3914_p2)
}
 0x11e   :  { %456 = dma.hbm_to_vmem [thread:$0]  %s452_s21, 16, %s454_s14, [#allocation34]  }
 0x11f   :  { %s5034_s3 = smov [#allocation36]   ;;  %s504_s8 = sshll.u32 %s5300_s27, 4  ;;  %s5535_s8 = int_to_ptr.hbm [resolvable:$true] %s504_s8 }
 0x120   :  { %s479_s24 = sshll.u32 %s5034_s3, 4  ;;  %s3930_s23 = sshra.s32 %s478_s18, 4  ;;  %s480_s24 = int_to_ptr.vmem [resolvable:$true] %s479_s24  ;;  %s3931_s23 = int_to_ptr.hbm [resolvable:$true] %s3930_s23 }
 0x121   :  { %s3932_s26 = scalar_lea.hbm %s3931_s23, 1  ;;  %s3934_s4 = scalar_lea.hbm %s5282_s19, 1 }
 0x122   :  { %p3933_p3 = scmp.ne.s32.totalorder %s3931_s23, %s3932_s26  ;;  %p3935_p4 = scmp.lt.s32.totalorder %s3931_s23, %s5282_s19 }
 0x123   :  { %p3936_p5 = scmp.lt.s32.totalorder %s3934_s4, %s3932_s26 }
 0x125   :  { %p3937_p6 = por %p3936_p5, %p3935_p4 }
 0x127   :  { %p3938_p7 = pnand %p3937_p6, %p3933_p3 }
 0x129   :  { %3941 = shalt.err (!%p3938_p7)
}
 0x12a   :  { %482 = dma.hbm_to_vmem [thread:$0]  %s478_s18, 16, %s480_s24, [#allocation37]  }
 0x12b   :  { %s531_s9 = sshll.u32 %s5315_s5, 4  ;;  %s5035_s30 = smov [#allocation39]   ;;  %s532_s9 = int_to_ptr.hbm [resolvable:$true] %s531_s9 }
 0x12c   :  { %s506_s2 = sshll.u32 %s5035_s30, 4  ;;  %s3954_s7 = sshra.s32 %s5535_s8, 4  ;;  %s507_s2 = int_to_ptr.vmem [resolvable:$true] %s506_s2  ;;  %s3955_s7 = int_to_ptr.hbm [resolvable:$true] %s3954_s7 }
 0x12d   :  { %s3956_s20 = scalar_lea.hbm %s3955_s7, 32  ;;  %s3958_s21 = scalar_lea.hbm %s5300_s27, 32 }
 0x12e   :  { %p3957_p8 = scmp.ne.s32.totalorder %s3955_s7, %s3956_s20  ;;  %p3959_p9 = scmp.lt.s32.totalorder %s3955_s7, %s5300_s27 }
 0x12f   :  { %p3960_p10 = scmp.lt.s32.totalorder %s3958_s21, %s3956_s20 }
 0x131   :  { %p3961_p11 = por %p3960_p10, %p3959_p9 }
 0x133   :  { %p3962_p12 = pnand %p3961_p11, %p3957_p8 }
 0x135   :  { %3965 = shalt.err (!%p3962_p12)
}
 0x136   :  { %512 = dma.hbm_to_vmem [thread:$0]  %s5535_s8, 512, %s507_s2, [#allocation40], %s5029_s10, %s5029_s10, %s5030_s16  }
 0x137   :  { %s5036_s19 = smov [#allocation42]   ;;  %s560_s12 = sshll.u32 %s5340_s22, 4  ;;  %s5548_s12 = int_to_ptr.hbm [resolvable:$true] %s560_s12 }
 0x138   :  { %s533_s11 = sshll.u32 %s5036_s19, 4  ;;  %s3978_s15 = sshra.s32 %s532_s9, 4  ;;  %s534_s11 = int_to_ptr.vmem [resolvable:$true] %s533_s11  ;;  %s3979_s15 = int_to_ptr.hbm [resolvable:$true] %s3978_s15 }
 0x139   :  { %s3980_s27 = scalar_lea.hbm %s3979_s15, 1  ;;  %s3982_s18 = scalar_lea.hbm %s5315_s5, 1 }
 0x13a   :  { %p3981_p13 = scmp.ne.s32.totalorder %s3979_s15, %s3980_s27  ;;  %p3983_p0 = scmp.lt.s32.totalorder %s3979_s15, %s5315_s5 }
 0x13b   :  { %p3984_p1 = scmp.lt.s32.totalorder %s3982_s18, %s3980_s27 }
 0x13d   :  { %p3985_p2 = por %p3984_p1, %p3983_p0 }
 0x13f   :  { %p3986_p3 = pnand %p3985_p2, %p3981_p13 }
 0x141   :  { %3989 = shalt.err (!%p3986_p3)
}
 0x142   :  { %536 = dma.hbm_to_vmem [thread:$0]  %s532_s9, 16, %s534_s11, [#allocation43]  }
 0x143   :  { %s6186_s29 = sld [smem:[#allocation146_spill]]  ;;  %s5037_s0 = smov [#allocation45]  }
 0x144   :  { %s562_s17 = sshll.u32 %s5037_s0, 4  ;;  %s4002_s13 = sshra.s32 %s5548_s12, 4  ;;  %s563_s17 = int_to_ptr.vmem [resolvable:$true] %s562_s17  ;;  %s4003_s13 = int_to_ptr.hbm [resolvable:$true] %s4002_s13 }
 0x145   :  { %s4004_s3 = scalar_lea.hbm %s4003_s13, 32  ;;  %s4006_s5 = scalar_lea.hbm %s5340_s22, 32 }
 0x146   :  { %p4005_p4 = scmp.ne.s32.totalorder %s4003_s13, %s4004_s3  ;;  %p4007_p5 = scmp.lt.s32.totalorder %s4003_s13, %s5340_s22 }
 0x147   :  { %p4008_p6 = scmp.lt.s32.totalorder %s4006_s5, %s4004_s3 }
 0x149   :  { %s584_s14 = sshll.u32 %s6186_s29, 4  ;;  %p4009_p7 = por %p4008_p6, %p4007_p5  ;;  %s5553_s14 = int_to_ptr.hbm [resolvable:$true] %s584_s14 }
 0x14b   :  { %p4010_p8 = pnand %p4009_p7, %p4005_p4 }
 0x14d   :  { %4013 = shalt.err (!%p4010_p8)
}
 0x14e   :  { %s6187_s24 = sld [smem:[#allocation148_spill]]  ;;  %s5038_s8 = smov [#allocation48]  }
 0x14f   :  { %568 = dma.hbm_to_vmem [thread:$0]  %s5548_s12, 512, %s563_s17, [#allocation46], %s5029_s10, %s5029_s10, %s5030_s16  }
 0x150   :  { %s586_s23 = sshll.u32 %s5038_s8, 4  ;;  %s4026_s22 = sshra.s32 %s5553_s14, 4  ;;  %s587_s23 = int_to_ptr.vmem [resolvable:$true] %s586_s23  ;;  %s4027_s22 = int_to_ptr.hbm [resolvable:$true] %s4026_s22 }
 0x151   :  { %s4028_s4 = scalar_lea.hbm %s4027_s22, 32  ;;  %s4030_s9 = scalar_lea.hbm %s6186_s29, 32 }
 0x152   :  { %p4029_p9 = scmp.ne.s32.totalorder %s4027_s22, %s4028_s4  ;;  %p4031_p10 = scmp.lt.s32.totalorder %s4027_s22, %s6186_s29 }
 0x153   :  { %p4032_p11 = scmp.lt.s32.totalorder %s4030_s9, %s4028_s4 }
 0x154   :  { %s608_s26 = sshll.u32 %s6187_s24, 4  ;;  %s5563_s26 = int_to_ptr.hbm [resolvable:$true] %s608_s26 }
 0x155   :  { %p4033_p12 = por %p4032_p11, %p4031_p10 }
 0x157   :  { %p4034_p13 = pnand %p4033_p12, %p4029_p9 }
 0x159   :  { %4037 = shalt.err (!%p4034_p13)
}
 0x15a   :  { %s6188_s30 = sld [smem:[#allocation150_spill]]  ;;  %s5039_s7 = smov [#allocation51]  }
 0x15b   :  { %592 = dma.hbm_to_vmem [thread:$0]  %s5553_s14, 512, %s587_s23, [#allocation49], %s5029_s10, %s5029_s10, %s5030_s16  }
 0x15c   :  { %s610_s20 = sshll.u32 %s5039_s7, 4  ;;  %s4050_s21 = sshra.s32 %s5563_s26, 4  ;;  %s611_s20 = int_to_ptr.vmem [resolvable:$true] %s610_s20  ;;  %s4051_s21 = int_to_ptr.hbm [resolvable:$true] %s4050_s21 }
 0x15d   :  { %s4052_s19 = scalar_lea.hbm %s4051_s21, 32  ;;  %s4054_s11 = scalar_lea.hbm %s6187_s24, 32 }
 0x15e   :  { %p4053_p0 = scmp.ne.s32.totalorder %s4051_s21, %s4052_s19  ;;  %p4055_p1 = scmp.lt.s32.totalorder %s4051_s21, %s6187_s24 }
 0x15f   :  { %p4056_p2 = scmp.lt.s32.totalorder %s4054_s11, %s4052_s19 }
 0x160   :  { %s632_s2 = sshll.u32 %s6188_s30, 4  ;;  %s5573_s2 = int_to_ptr.hbm [resolvable:$true] %s632_s2 }
 0x161   :  { %p4057_p3 = por %p4056_p2, %p4055_p1 }
 0x163   :  { %p4058_p4 = pnand %p4057_p3, %p4053_p0 }
 0x165   :  { %4061 = shalt.err (!%p4058_p4)
}
 0x166   :  { %s6189_s12 = sld [smem:[#allocation152_spill]]  ;;  %s5040_s15 = smov [#allocation54]  }
 0x167   :  { %616 = dma.hbm_to_vmem [thread:$0]  %s5563_s26, 512, %s611_s20, [#allocation52], %s5029_s10, %s5029_s10, %s5030_s16  }
 0x168   :  { %s634_s27 = sshll.u32 %s5040_s15, 4  ;;  %s4074_s29 = sshra.s32 %s5573_s2, 4  ;;  %s635_s27 = int_to_ptr.vmem [resolvable:$true] %s634_s27  ;;  %s4075_s29 = int_to_ptr.hbm [resolvable:$true] %s4074_s29 }
 0x169   :  { %s4076_s14 = scalar_lea.hbm %s4075_s29, 32  ;;  %s4078_s0 = scalar_lea.hbm %s6188_s30, 32 }
 0x16a   :  { %p4077_p5 = scmp.ne.s32.totalorder %s4075_s29, %s4076_s14  ;;  %p4079_p6 = scmp.lt.s32.totalorder %s4075_s29, %s6188_s30 }
 0x16b   :  { %p4080_p7 = scmp.lt.s32.totalorder %s4078_s0, %s4076_s14 }
 0x16c   :  { %s657_s18 = sshll.u32 %s6189_s12, 4  ;;  %s658_s18 = int_to_ptr.hbm [resolvable:$true] %s657_s18 }
 0x16d   :  { %p4081_p8 = por %p4080_p7, %p4079_p6 }
 0x16f   :  { %p4082_p9 = pnand %p4081_p8, %p4077_p5 }
 0x171   :  { %4085 = shalt.err (!%p4082_p9)
}
 0x172   :  { %s6190_s17 = sld [smem:[#allocation154_spill]]  ;;  %s5041_s3 = smov [#allocation57]  }
 0x173   :  { %640 = dma.hbm_to_vmem [thread:$0]  %s5573_s2, 512, %s635_s27, [#allocation55], %s5029_s10, %s5029_s10, %s5030_s16  }
 0x174   :  { %s659_s5 = sshll.u32 %s5041_s3, 4  ;;  %s4098_s24 = sshra.s32 %s658_s18, 4  ;;  %s660_s5 = int_to_ptr.vmem [resolvable:$true] %s659_s5  ;;  %s4099_s24 = int_to_ptr.hbm [resolvable:$true] %s4098_s24 }
 0x175   :  { %s4100_s8 = scalar_lea.hbm %s4099_s24, 1  ;;  %s4102_s23 = scalar_lea.hbm %s6189_s12, 1 }
 0x176   :  { %p4101_p10 = scmp.ne.s32.totalorder %s4099_s24, %s4100_s8  ;;  %p4103_p11 = scmp.lt.s32.totalorder %s4099_s24, %s6189_s12 }
 0x177   :  { %p4104_p12 = scmp.lt.s32.totalorder %s4102_s23, %s4100_s8 }
 0x178   :  { %s678_s13 = sshll.u32 %s6190_s17, 4  ;;  %s5591_s13 = int_to_ptr.hbm [resolvable:$true] %s678_s13 }
 0x179   :  { %p4105_p13 = por %p4104_p12, %p4103_p11 }
 0x17b   :  { %p4106_p0 = pnand %p4105_p13, %p4101_p10 }
 0x17d   :  { %4109 = shalt.err (!%p4106_p0)
}
 0x17e   :  { %662 = dma.hbm_to_vmem [thread:$0]  %s658_s18, 16, %s660_s5, [#allocation58]  }
 0x17f   :  { %s6191_s26 = sld [smem:[#allocation157_spill]]  ;;  %s5042_s22 = smov [#allocation60]  }
 0x180   :  { %s680_s4 = sshll.u32 %s5042_s22, 4  ;;  %s4122_s30 = sshra.s32 %s5591_s13, 4  ;;  %s681_s4 = int_to_ptr.vmem [resolvable:$true] %s680_s4  ;;  %s4123_s30 = int_to_ptr.hbm [resolvable:$true] %s4122_s30 }
 0x181   :  { %s4124_s2 = scalar_lea.hbm %s4123_s30, 32  ;;  %s4126_s7 = scalar_lea.hbm %s6190_s17, 32 }
 0x182   :  { %p4125_p1 = scmp.ne.s32.totalorder %s4123_s30, %s4124_s2  ;;  %p4127_p2 = scmp.lt.s32.totalorder %s4123_s30, %s6190_s17 }
 0x183   :  { %p4128_p3 = scmp.lt.s32.totalorder %s4126_s7, %s4124_s2 }
 0x185   :  { %s707_s9 = sshll.u32 %s6191_s26, 4  ;;  %p4129_p4 = por %p4128_p3, %p4127_p2  ;;  %s708_s9 = int_to_ptr.hbm [resolvable:$true] %s707_s9 }
 0x187   :  { %p4130_p5 = pnand %p4129_p4, %p4125_p1 }
 0x189   :  { %4133 = shalt.err (!%p4130_p5)
}
 0x18a   :  { %s6192_s20 = sld [smem:[#allocation159_spill]]  ;;  %s5043_s19 = smov [#allocation63]  }
 0x18b   :  { %686 = dma.hbm_to_vmem [thread:$0]  %s5591_s13, 512, %s681_s4, [#allocation61], %s5029_s10, %s5029_s10, %s5030_s16  }
 0x18c   :  { %s709_s11 = sshll.u32 %s5043_s19, 4  ;;  %s4146_s12 = sshra.s32 %s708_s9, 4  ;;  %s710_s11 = int_to_ptr.vmem [resolvable:$true] %s709_s11  ;;  %s4147_s12 = int_to_ptr.hbm [resolvable:$true] %s4146_s12 }
 0x18d   :  { %s4148_s15 = scalar_lea.hbm %s4147_s12, 2  ;;  %s4150_s27 = scalar_lea.hbm %s6191_s26, 2 }
 0x18e   :  { %p4149_p6 = scmp.ne.s32.totalorder %s4147_s12, %s4148_s15  ;;  %p4151_p7 = scmp.lt.s32.totalorder %s4147_s12, %s6191_s26 }
 0x18f   :  { %p4152_p8 = scmp.lt.s32.totalorder %s4150_s27, %s4148_s15 }
 0x190   :  { %s728_s21 = sshll.u32 %s6192_s20, 4  ;;  %s5604_s21 = int_to_ptr.hbm [resolvable:$true] %s728_s21 }
 0x191   :  { %p4153_p9 = por %p4152_p8, %p4151_p7 }
 0x193   :  { %p4154_p10 = pnand %p4153_p9, %p4149_p6 }
 0x195   :  { %4157 = shalt.err (!%p4154_p10)
}
 0x196   :  { %712 = dma.hbm_to_vmem [thread:$0]  %s708_s9, 32, %s710_s11, [#allocation64]  }
 0x197   :  { %s6193_s18 = sld [smem:[#allocation162_spill]]  ;;  %s5044_s29 = smov [#allocation66]  }
 0x198   :  { %s730_s14 = sshll.u32 %s5044_s29, 4  ;;  %s4170_s17 = sshra.s32 %s5604_s21, 4  ;;  %s731_s14 = int_to_ptr.vmem [resolvable:$true] %s730_s14  ;;  %s4171_s17 = int_to_ptr.hbm [resolvable:$true] %s4170_s17 }
 0x199   :  { %s4172_s13 = scalar_lea.hbm %s4171_s17, 32  ;;  %s4174_s3 = scalar_lea.hbm %s6192_s20, 32 }
 0x19a   :  { %p4173_p11 = scmp.ne.s32.totalorder %s4171_s17, %s4172_s13  ;;  %p4175_p12 = scmp.lt.s32.totalorder %s4171_s17, %s6192_s20 }
 0x19b   :  { %p4176_p13 = scmp.lt.s32.totalorder %s4174_s3, %s4172_s13 }
 0x19d   :  { %s757_s0 = sshll.u32 %s6193_s18, 4  ;;  %p4177_p0 = por %p4176_p13, %p4175_p12  ;;  %s758_s0 = int_to_ptr.hbm [resolvable:$true] %s757_s0 }
 0x19f   :  { %p4178_p1 = pnand %p4177_p0, %p4173_p11 }
 0x1a1   :  { %4181 = shalt.err (!%p4178_p1)
}
 0x1a2   :  { %s6194_s5 = sld [smem:[#allocation164_spill]]  ;;  %s5045_s8 = smov [#allocation69]  }
 0x1a3   :  { %736 = dma.hbm_to_vmem [thread:$0]  %s5604_s21, 512, %s731_s14, [#allocation67], %s5029_s10, %s5029_s10, %s5030_s16  }
 0x1a4   :  { %s759_s23 = sshll.u32 %s5045_s8, 4  ;;  %s4194_s26 = sshra.s32 %s758_s0, 4  ;;  %s760_s23 = int_to_ptr.vmem [resolvable:$true] %s759_s23  ;;  %s4195_s26 = int_to_ptr.hbm [resolvable:$true] %s4194_s26 }
 0x1a5   :  { %s4196_s22 = scalar_lea.hbm %s4195_s26, 1  ;;  %s4198_s4 = scalar_lea.hbm %s6193_s18, 1 }
 0x1a6   :  { %p4197_p2 = scmp.ne.s32.totalorder %s4195_s26, %s4196_s22  ;;  %p4199_p3 = scmp.lt.s32.totalorder %s4195_s26, %s6193_s18 }
 0x1a7   :  { %p4200_p4 = scmp.lt.s32.totalorder %s4198_s4, %s4196_s22 }
 0x1a8   :  { %s778_s24 = sshll.u32 %s6194_s5, 4  ;;  %s5617_s24 = int_to_ptr.hbm [resolvable:$true] %s778_s24 }
 0x1a9   :  { %p4201_p5 = por %p4200_p4, %p4199_p3 }
 0x1ab   :  { %p4202_p6 = pnand %p4201_p5, %p4197_p2 }
 0x1ad   :  { %4205 = shalt.err (!%p4202_p6)
}
 0x1ae   :  { %762 = dma.hbm_to_vmem [thread:$0]  %s758_s0, 16, %s760_s23, [#allocation70]  }
 0x1af   :  { %s6195_s9 = sld [smem:[#allocation166_spill]]  ;;  %s5046_s30 = smov [#allocation72]  }
 0x1b0   :  { %s780_s2 = sshll.u32 %s5046_s30, 4  ;;  %s4218_s20 = sshra.s32 %s5617_s24, 4  ;;  %s781_s2 = int_to_ptr.vmem [resolvable:$true] %s780_s2  ;;  %s4219_s20 = int_to_ptr.hbm [resolvable:$true] %s4218_s20 }
 0x1b1   :  { %s4220_s21 = scalar_lea.hbm %s4219_s20, 32  ;;  %s4222_s19 = scalar_lea.hbm %s6194_s5, 32 }
 0x1b2   :  { %p4221_p7 = scmp.ne.s32.totalorder %s4219_s20, %s4220_s21  ;;  %p4223_p8 = scmp.lt.s32.totalorder %s4219_s20, %s6194_s5 }
 0x1b3   :  { %p4224_p9 = scmp.lt.s32.totalorder %s4222_s19, %s4220_s21 }
 0x1b5   :  { %s802_s7 = sshll.u32 %s6195_s9, 4  ;;  %p4225_p10 = por %p4224_p9, %p4223_p8  ;;  %s5622_s7 = int_to_ptr.hbm [resolvable:$true] %s802_s7 }
 0x1b7   :  { %p4226_p11 = pnand %p4225_p10, %p4221_p7 }
 0x1b9   :  { %4229 = shalt.err (!%p4226_p11)
}
 0x1ba   :  { %s6196_s11 = sld [smem:[#allocation109_spill]]  ;;  %s5047_s15 = smov [#allocation75]  }
 0x1bb   :  { %786 = dma.hbm_to_vmem [thread:$0]  %s5617_s24, 512, %s781_s2, [#allocation73], %s5029_s10, %s5029_s10, %s5030_s16  }
 0x1bc   :  { %s804_s27 = sshll.u32 %s5047_s15, 4  ;;  %s4242_s18 = sshra.s32 %s5622_s7, 4  ;;  %s805_s27 = int_to_ptr.vmem [resolvable:$true] %s804_s27  ;;  %s4243_s18 = int_to_ptr.hbm [resolvable:$true] %s4242_s18 }
 0x1bd   :  { %s4244_s29 = scalar_lea.hbm %s4243_s18, 32  ;;  %s4246_s14 = scalar_lea.hbm %s6195_s9, 32 }
 0x1be   :  { %p4245_p12 = scmp.ne.s32.totalorder %s4243_s18, %s4244_s29  ;;  %p4247_p13 = scmp.lt.s32.totalorder %s4243_s18, %s6195_s9 }
 0x1bf   :  { %p4248_p0 = scmp.lt.s32.totalorder %s4246_s14, %s4244_s29 }
 0x1c0   :  { %s207_s12 = sshll.u32 %s6196_s11, 4  ;;  %s5632_s12 = int_to_ptr.hbm [resolvable:$true] %s207_s12 }
 0x1c1   :  { %p4249_p1 = por %p4248_p0, %p4247_p13 }
 0x1c3   :  { %p4250_p2 = pnand %p4249_p1, %p4245_p12 }
 0x1c5   :  { %4253 = shalt.err (!%p4250_p2)
}
 0x1c6   :  { %s6197_s0 = sld [smem:[#allocation111_spill]]  ;;  %s5048_s17 = smov [#allocation6]  }
 0x1c7   :  { %810 = dma.hbm_to_vmem [thread:$0]  %s5622_s7, 512, %s805_s27, [#allocation76], %s5029_s10, %s5029_s10, %s5030_s16  }
 0x1c8   :  { %s209_s13 = sshll.u32 %s5048_s17, 4  ;;  %s4266_s5 = sshra.s32 %s5632_s12, 4  ;;  %s210_s13 = int_to_ptr.vmem [resolvable:$true] %s209_s13  ;;  %s4267_s5 = int_to_ptr.hbm [resolvable:$true] %s4266_s5 }
 0x1c9   :  { %s4268_s24 = scalar_lea.hbm %s4267_s5, 24  ;;  %s4270_s8 = scalar_lea.hbm %s6196_s11, 24 }
 0x1ca   :  { %p4269_p3 = scmp.ne.s32.totalorder %s4267_s5, %s4268_s24  ;;  %p4271_p4 = scmp.lt.s32.totalorder %s4267_s5, %s6196_s11 }
 0x1cb   :  { %p4272_p5 = scmp.lt.s32.totalorder %s4270_s8, %s4268_s24 }
 0x1cc   :  { %s235_s3 = sshll.u32 %s6197_s0, 4  ;;  %s5642_s3 = int_to_ptr.hbm [resolvable:$true] %s235_s3 }
 0x1cd   :  { %p4273_p6 = por %p4272_p5, %p4271_p4 }
 0x1cf   :  { %p4274_p7 = pnand %p4273_p6, %p4269_p3 }
 0x1d1   :  { %4277 = shalt.err (!%p4274_p7)
}
 0x1d2   :  { %s6198_s23 = sld [smem:[#allocation113_spill]]  ;;  %s5049_s22 = smov [#allocation11]  }
 0x1d3   :  { %215 = dma.hbm_to_vmem [thread:$0]  %s5632_s12, 384, %s210_s13, [#allocation7], %s5029_s10, %s5029_s10, %s5030_s16  }
 0x1d4   :  { %s237_s4 = sshll.u32 %s5049_s22, 4  ;;  %s4290_s9 = sshra.s32 %s5642_s3, 4  ;;  %s238_s4 = int_to_ptr.vmem [resolvable:$true] %s237_s4  ;;  %s4291_s9 = int_to_ptr.hbm [resolvable:$true] %s4290_s9 }
 0x1d5   :  { %s4292_s30 = scalar_lea.hbm %s4291_s9, 24  ;;  %s4294_s2 = scalar_lea.hbm %s6197_s0, 24 }
 0x1d6   :  { %p4293_p8 = scmp.ne.s32.totalorder %s4291_s9, %s4292_s30  ;;  %p4295_p9 = scmp.lt.s32.totalorder %s4291_s9, %s6197_s0 }
 0x1d7   :  { %p4296_p10 = scmp.lt.s32.totalorder %s4294_s2, %s4292_s30 }
 0x1d8   :  { %s263_s26 = sshll.u32 %s6198_s23, 4  ;;  %s5652_s26 = int_to_ptr.hbm [resolvable:$true] %s263_s26 }
 0x1d9   :  { %p4297_p11 = por %p4296_p10, %p4295_p9 }
 0x1db   :  { %p4298_p12 = pnand %p4297_p11, %p4293_p8 }
 0x1dd   :  { %4301 = shalt.err (!%p4298_p12)
}
 0x1de   :  { %s6199_s7 = sld [smem:[#allocation117_spill]]  ;;  %s5050_s20 = smov [#allocation14]  }
 0x1df   :  { %243 = dma.hbm_to_vmem [thread:$0]  %s5642_s3, 384, %s238_s4, [#allocation10], %s5022_s6, %s5022_s6, %s5023_s1  }
 0x1e0   :  { %s265_s21 = sshll.u32 %s5050_s20, 4  ;;  %s4314_s11 = sshra.s32 %s5652_s26, 4  ;;  %s266_s21 = int_to_ptr.vmem [resolvable:$true] %s265_s21  ;;  %s4315_s11 = int_to_ptr.hbm [resolvable:$true] %s4314_s11 }
 0x1e1   :  { %s4316_s12 = scalar_lea.hbm %s4315_s11, 8  ;;  %s4318_s15 = scalar_lea.hbm %s6198_s23, 8 }
 0x1e2   :  { %p4317_p13 = scmp.ne.s32.totalorder %s4315_s11, %s4316_s12  ;;  %p4319_p0 = scmp.lt.s32.totalorder %s4315_s11, %s6198_s23 }
 0x1e3   :  { %p4320_p1 = scmp.lt.s32.totalorder %s4318_s15, %s4316_s12 }
 0x1e4   :  { %s295_s19 = sshll.u32 %s6199_s7, 4  ;;  %s5662_s19 = int_to_ptr.hbm [resolvable:$true] %s295_s19 }
 0x1e5   :  { %p4321_p2 = por %p4320_p1, %p4319_p0 }
 0x1e7   :  { %p4322_p3 = pnand %p4321_p2, %p4317_p13 }
 0x1e9   :  { %4325 = shalt.err (!%p4322_p3)
}
 0x1ea   :  { %s6200_s27 = sld [smem:[#allocation123_spill]]  ;;  %s5051_s29 = smov [#allocation17]  }
 0x1eb   :  { %271 = dma.hbm_to_vmem [thread:$0]  %s5652_s26, 128, %s266_s21, [#allocation13], %s5022_s6, %s5022_s6, %s5023_s1  }
 0x1ec   :  { %s297_s14 = sshll.u32 %s5051_s29, 4  ;;  %s4338_s0 = sshra.s32 %s5662_s19, 4  ;;  %s298_s14 = int_to_ptr.vmem [resolvable:$true] %s297_s14  ;;  %s4339_s0 = int_to_ptr.hbm [resolvable:$true] %s4338_s0 }
 0x1ed   :  { %s4340_s17 = scalar_lea.hbm %s4339_s0, 8  ;;  %s4342_s13 = scalar_lea.hbm %s6199_s7, 8 }
 0x1ee   :  { %p4341_p4 = scmp.ne.s32.totalorder %s4339_s0, %s4340_s17  ;;  %p4343_p5 = scmp.lt.s32.totalorder %s4339_s0, %s6199_s7 }
 0x1ef   :  { %p4344_p6 = scmp.lt.s32.totalorder %s4342_s13, %s4340_s17 }
 0x1f0   :  { %s330_s18 = sshll.u32 %s6200_s27, 4  ;;  %s331_s18 = int_to_ptr.hbm [resolvable:$true] %s330_s18 }
 0x1f1   :  { %p4345_p7 = por %p4344_p6, %p4343_p5 }
 0x1f3   :  { %p4346_p8 = pnand %p4345_p7, %p4341_p4 }
 0x1f5   :  { %4349 = shalt.err (!%p4346_p8)
}
 0x1f6   :  { %s6201_s3 = sld [smem:[#allocation130_spill]]  ;;  %s5052_s5 = smov [#allocation20]  }
 0x1f7   :  { %303 = dma.hbm_to_vmem [thread:$0]  %s5662_s19, 128, %s298_s14, [#allocation16], %s5022_s6, %s5022_s6, %s5023_s1  }
 0x1f8   :  { %s332_s24 = sshll.u32 %s5052_s5, 4  ;;  %s4362_s23 = sshra.s32 %s331_s18, 4  ;;  %s333_s24 = int_to_ptr.vmem [resolvable:$true] %s332_s24  ;;  %s4363_s23 = int_to_ptr.hbm [resolvable:$true] %s4362_s23 }
 0x1f9   :  { %s4364_s26 = scalar_lea.hbm %s4363_s23, 1  ;;  %s4366_s22 = scalar_lea.hbm %s6200_s27, 1 }
 0x1fa   :  { %p4365_p9 = scmp.ne.s32.totalorder %s4363_s23, %s4364_s26  ;;  %p4367_p10 = scmp.lt.s32.totalorder %s4363_s23, %s6200_s27 }
 0x1fb   :  { %p4368_p11 = scmp.lt.s32.totalorder %s4366_s22, %s4364_s26 }
 0x1fc   :  { %s364_s8 = sshll.u32 %s6201_s3, 4  ;;  %s365_s8 = int_to_ptr.hbm [resolvable:$true] %s364_s8 }
 0x1fd   :  { %p4369_p12 = por %p4368_p11, %p4367_p10 }
 0x1ff   :  { %p4370_p13 = pnand %p4369_p12, %p4365_p9 }
 0x201   :  { %4373 = shalt.err (!%p4370_p13)
}
 0x202   :  { %335 = dma.hbm_to_vmem [thread:$0]  %s331_s18, 16, %s333_s24, [#allocation19]  }
 0x203   :  { %s6202_s4 = sld [smem:[#allocation131_spill]]  ;;  %s5053_s1 = smov [#allocation23]  }
 0x204   :  { %s366_s9 = sshll.u32 %s5053_s1, 4  ;;  %s4386_s30 = sshra.s32 %s365_s8, 4  ;;  %s367_s9 = int_to_ptr.vmem [resolvable:$true] %s366_s9  ;;  %s4387_s30 = int_to_ptr.hbm [resolvable:$true] %s4386_s30 }
 0x205   :  { %s4388_s2 = scalar_lea.hbm %s4387_s30, 1  ;;  %s4390_s7 = scalar_lea.hbm %s6201_s3, 1 }
 0x206   :  { %p4389_p0 = scmp.ne.s32.totalorder %s4387_s30, %s4388_s2  ;;  %p4391_p1 = scmp.lt.s32.totalorder %s4387_s30, %s6201_s3 }
 0x207   :  { %p4392_p2 = scmp.lt.s32.totalorder %s4390_s7, %s4388_s2 }
 0x209   :  { %s387_s6 = sshll.u32 %s6202_s4, 4  ;;  %p4393_p3 = por %p4392_p2, %p4391_p1  ;;  %s5683_s6 = int_to_ptr.hbm [resolvable:$true] %s387_s6 }
 0x20b   :  { %p4394_p4 = pnand %p4393_p3, %p4389_p0 }
 0x20d   :  { %4397 = shalt.err (!%p4394_p4)
}
 0x20e   :  { %369 = dma.hbm_to_vmem [thread:$0]  %s365_s8, 16, %s367_s9, [#allocation22]  }
 0x20f   :  { %s6203_s20 = sld [smem:[#allocation132_spill]]  ;;  %s5054_s21 = smov [#allocation26]  }
 0x210   :  { %s389_s19 = sshll.u32 %s5054_s21, 4  ;;  %s4410_s12 = sshra.s32 %s5683_s6, 4  ;;  %s390_s19 = int_to_ptr.vmem [resolvable:$true] %s389_s19  ;;  %s4411_s12 = int_to_ptr.hbm [resolvable:$true] %s4410_s12 }
 0x211   :  { %s4412_s15 = scalar_lea.hbm %s4411_s12, 32  ;;  %s4414_s27 = scalar_lea.hbm %s6202_s4, 32 }
 0x212   :  { %p4413_p5 = scmp.ne.s32.totalorder %s4411_s12, %s4412_s15  ;;  %p4415_p6 = scmp.lt.s32.totalorder %s4411_s12, %s6202_s4 }
 0x213   :  { %p4416_p7 = scmp.lt.s32.totalorder %s4414_s27, %s4412_s15 }
 0x215   :  { %s414_s11 = sshll.u32 %s6203_s20, 4  ;;  %p4417_p8 = por %p4416_p7, %p4415_p6  ;;  %s415_s11 = int_to_ptr.hbm [resolvable:$true] %s414_s11 }
 0x217   :  { %p4418_p9 = pnand %p4417_p8, %p4413_p5 }
 0x219   :  { %4421 = shalt.err (!%p4418_p9)
}
 0x21a   :  { %s6204_s18 = sld [smem:[#allocation133_spill]]  ;;  %s5055_s14 = smov [#allocation29]  }
 0x21b   :  { %395 = dma.hbm_to_vmem [thread:$0]  %s5683_s6, 512, %s390_s19, [#allocation25], %s5029_s10, %s5029_s10, %s5030_s16  }
 0x21c   :  { %s416_s0 = sshll.u32 %s5055_s14, 4  ;;  %s4434_s17 = sshra.s32 %s415_s11, 4  ;;  %s417_s0 = int_to_ptr.vmem [resolvable:$true] %s416_s0  ;;  %s4435_s17 = int_to_ptr.hbm [resolvable:$true] %s4434_s17 }
 0x21d   :  { %s4436_s13 = scalar_lea.hbm %s4435_s17, 1  ;;  %s4438_s3 = scalar_lea.hbm %s6203_s20, 1 }
 0x21e   :  { %p4437_p10 = scmp.ne.s32.totalorder %s4435_s17, %s4436_s13  ;;  %p4439_p11 = scmp.lt.s32.totalorder %s4435_s17, %s6203_s20 }
 0x21f   :  { %p4440_p12 = scmp.lt.s32.totalorder %s4438_s3, %s4436_s13 }
 0x220   :  { %s437_s29 = sshll.u32 %s6204_s18, 4  ;;  %s5696_s29 = int_to_ptr.hbm [resolvable:$true] %s437_s29 }
 0x221   :  { %p4441_p13 = por %p4440_p12, %p4439_p11 }
 0x223   :  { %p4442_p0 = pnand %p4441_p13, %p4437_p10 }
 0x225   :  { %4445 = shalt.err (!%p4442_p0)
}
 0x226   :  { %419 = dma.hbm_to_vmem [thread:$0]  %s415_s11, 16, %s417_s0, [#allocation28]  }
 0x227   :  { %s6205_s5 = sld [smem:[#allocation135_spill]]  ;;  %s5056_s24 = smov [#allocation32]  }
 0x228   :  { %s439_s8 = sshll.u32 %s5056_s24, 4  ;;  %s4458_s26 = sshra.s32 %s5696_s29, 4  ;;  %s440_s8 = int_to_ptr.vmem [resolvable:$true] %s439_s8  ;;  %s4459_s26 = int_to_ptr.hbm [resolvable:$true] %s4458_s26 }
 0x229   :  { %s4460_s22 = scalar_lea.hbm %s4459_s26, 32  ;;  %s4462_s4 = scalar_lea.hbm %s6204_s18, 32 }
 0x22a   :  { %p4461_p1 = scmp.ne.s32.totalorder %s4459_s26, %s4460_s22  ;;  %p4463_p2 = scmp.lt.s32.totalorder %s4459_s26, %s6204_s18 }
 0x22b   :  { %p4464_p3 = scmp.lt.s32.totalorder %s4462_s4, %s4460_s22 }
 0x22d   :  { %s464_s23 = sshll.u32 %s6205_s5, 4  ;;  %p4465_p4 = por %p4464_p3, %p4463_p2  ;;  %s465_s23 = int_to_ptr.hbm [resolvable:$true] %s464_s23 }
 0x22f   :  { %p4466_p5 = pnand %p4465_p4, %p4461_p1 }
 0x231   :  { %4469 = shalt.err (!%p4466_p5)
}
 0x232   :  { %s6206_s6 = sld [smem:[#allocation138_spill]]  ;;  %s5057_s9 = smov [#allocation35]  }
 0x233   :  { %445 = dma.hbm_to_vmem [thread:$0]  %s5696_s29, 512, %s440_s8, [#allocation31], %s5029_s10, %s5029_s10, %s5030_s16  }
 0x234   :  { %s466_s30 = sshll.u32 %s5057_s9, 4  ;;  %s4482_s2 = sshra.s32 %s465_s23, 4  ;;  %s467_s30 = int_to_ptr.vmem [resolvable:$true] %s466_s30  ;;  %s4483_s2 = int_to_ptr.hbm [resolvable:$true] %s4482_s2 }
 0x235   :  { %s4484_s7 = scalar_lea.hbm %s4483_s2, 1  ;;  %s4486_s20 = scalar_lea.hbm %s6205_s5, 1 }
 0x236   :  { %p4485_p6 = scmp.ne.s32.totalorder %s4483_s2, %s4484_s7  ;;  %p4487_p7 = scmp.lt.s32.totalorder %s4483_s2, %s6205_s5 }
 0x237   :  { %p4488_p8 = scmp.lt.s32.totalorder %s4486_s20, %s4484_s7 }
 0x238   :  { %s491_s1 = sshll.u32 %s6206_s6, 4  ;;  %s5709_s1 = int_to_ptr.hbm [resolvable:$true] %s491_s1 }
 0x239   :  { %p4489_p9 = por %p4488_p8, %p4487_p7 }
 0x23b   :  { %p4490_p10 = pnand %p4489_p9, %p4485_p6 }
 0x23d   :  { %4493 = shalt.err (!%p4490_p10)
}
 0x23e   :  { %469 = dma.hbm_to_vmem [thread:$0]  %s465_s23, 16, %s467_s30, [#allocation34]  }
 0x23f   :  { %s6207_s21 = sld [smem:[#allocation139_spill]]  ;;  %s5058_s19 = smov [#allocation38]  }
 0x240   :  { %s493_s11 = sshll.u32 %s5058_s19, 4  ;;  %s4506_s15 = sshra.s32 %s5709_s1, 4  ;;  %s494_s11 = int_to_ptr.vmem [resolvable:$true] %s493_s11  ;;  %s4507_s15 = int_to_ptr.hbm [resolvable:$true] %s4506_s15 }
 0x241   :  { %s4508_s27 = scalar_lea.hbm %s4507_s15, 32  ;;  %s4510_s18 = scalar_lea.hbm %s6206_s6, 32 }
 0x242   :  { %p4509_p11 = scmp.ne.s32.totalorder %s4507_s15, %s4508_s27  ;;  %p4511_p12 = scmp.lt.s32.totalorder %s4507_s15, %s6206_s6 }
 0x243   :  { %p4512_p13 = scmp.lt.s32.totalorder %s4510_s18, %s4508_s27 }
 0x245   :  { %s518_s12 = sshll.u32 %s6207_s21, 4  ;;  %p4513_p0 = por %p4512_p13, %p4511_p12  ;;  %s519_s12 = int_to_ptr.hbm [resolvable:$true] %s518_s12 }
 0x247   :  { %p4514_p1 = pnand %p4513_p0, %p4509_p11 }
 0x249   :  { %4517 = shalt.err (!%p4514_p1)
}
 0x24a   :  { %s6208_s29 = sld [smem:[#allocation142_spill]]  ;;  %s5059_s0 = smov [#allocation41]  }
 0x24b   :  { %499 = dma.hbm_to_vmem [thread:$0]  %s5709_s1, 512, %s494_s11, [#allocation37], %s5029_s10, %s5029_s10, %s5030_s16  }
 0x24c   :  { %s520_s17 = sshll.u32 %s5059_s0, 4  ;;  %s4530_s13 = sshra.s32 %s519_s12, 4  ;;  %s521_s17 = int_to_ptr.vmem [resolvable:$true] %s520_s17  ;;  %s4531_s13 = int_to_ptr.hbm [resolvable:$true] %s4530_s13 }
 0x24d   :  { %s4532_s3 = scalar_lea.hbm %s4531_s13, 1  ;;  %s4534_s5 = scalar_lea.hbm %s6207_s21, 1 }
 0x24e   :  { %p4533_p2 = scmp.ne.s32.totalorder %s4531_s13, %s4532_s3  ;;  %p4535_p3 = scmp.lt.s32.totalorder %s4531_s13, %s6207_s21 }
 0x24f   :  { %p4536_p4 = scmp.lt.s32.totalorder %s4534_s5, %s4532_s3 }
 0x250   :  { %s544_s14 = sshll.u32 %s6208_s29, 4  ;;  %s545_s14 = int_to_ptr.hbm [resolvable:$true] %s544_s14 }
 0x251   :  { %p4537_p5 = por %p4536_p4, %p4535_p3 }
 0x253   :  { %p4538_p6 = pnand %p4537_p5, %p4533_p2 }
 0x255   :  { %4541 = shalt.err (!%p4538_p6)
}
 0x256   :  { %523 = dma.hbm_to_vmem [thread:$0]  %s519_s12, 16, %s521_s17, [#allocation40]  }
 0x257   :  { %s6209_s24 = sld [smem:[#allocation145_spill]]  ;;  %s5060_s8 = smov [#allocation44]  }
 0x258   :  { %s546_s23 = sshll.u32 %s5060_s8, 4  ;;  %s4554_s22 = sshra.s32 %s545_s14, 4  ;;  %s547_s23 = int_to_ptr.vmem [resolvable:$true] %s546_s23  ;;  %s4555_s22 = int_to_ptr.hbm [resolvable:$true] %s4554_s22 }
 0x259   :  { %s4556_s4 = scalar_lea.hbm %s4555_s22, 1  ;;  %s4558_s6 = scalar_lea.hbm %s6208_s29, 1 }
 0x25a   :  { %p4557_p7 = scmp.ne.s32.totalorder %s4555_s22, %s4556_s4  ;;  %p4559_p8 = scmp.lt.s32.totalorder %s4555_s22, %s6208_s29 }
 0x25b   :  { %p4560_p9 = scmp.lt.s32.totalorder %s4558_s6, %s4556_s4 }
 0x25d   :  { %s574_s26 = sshll.u32 %s6209_s24, 4  ;;  %p4561_p10 = por %p4560_p9, %p4559_p8  ;;  %s575_s26 = int_to_ptr.hbm [resolvable:$true] %s574_s26 }
 0x25f   :  { %p4562_p11 = pnand %p4561_p10, %p4557_p7 }
 0x261   :  { %4565 = shalt.err (!%p4562_p11)
}
 0x262   :  { %549 = dma.hbm_to_vmem [thread:$0]  %s545_s14, 16, %s547_s23, [#allocation43]  }
 0x263   :  { %s6210_s1 = sld [smem:[#allocation147_spill]]  ;;  %s5061_s30 = smov [#allocation47]  }
 0x264   :  { %s576_s2 = sshll.u32 %s5061_s30, 4  ;;  %s4578_s7 = sshra.s32 %s575_s26, 4  ;;  %s577_s2 = int_to_ptr.vmem [resolvable:$true] %s576_s2  ;;  %s4579_s7 = int_to_ptr.hbm [resolvable:$true] %s4578_s7 }
 0x265   :  { %s4580_s20 = scalar_lea.hbm %s4579_s7, 1  ;;  %s4582_s21 = scalar_lea.hbm %s6209_s24, 1 }
 0x266   :  { %p4581_p12 = scmp.ne.s32.totalorder %s4579_s7, %s4580_s20  ;;  %p4583_p13 = scmp.lt.s32.totalorder %s4579_s7, %s6209_s24 }
 0x267   :  { %p4584_p0 = scmp.lt.s32.totalorder %s4582_s21, %s4580_s20 }
 0x269   :  { %s598_s9 = sshll.u32 %s6210_s1, 4  ;;  %p4585_p1 = por %p4584_p0, %p4583_p13  ;;  %s599_s9 = int_to_ptr.hbm [resolvable:$true] %s598_s9 }
 0x26b   :  { %p4586_p2 = pnand %p4585_p1, %p4581_p12 }
 0x26d   :  { %4589 = shalt.err (!%p4586_p2)
}
 0x26e   :  { %579 = dma.hbm_to_vmem [thread:$0]  %s575_s26, 16, %s577_s2, [#allocation46]  }
 0x26f   :  { %s6211_s19 = sld [smem:[#allocation149_spill]]  ;;  %s5062_s11 = smov [#allocation50]  }
 0x270   :  { %s600_s12 = sshll.u32 %s5062_s11, 4  ;;  %s4602_s27 = sshra.s32 %s599_s9, 4  ;;  %s601_s12 = int_to_ptr.vmem [resolvable:$true] %s600_s12  ;;  %s4603_s27 = int_to_ptr.hbm [resolvable:$true] %s4602_s27 }
 0x271   :  { %s4604_s18 = scalar_lea.hbm %s4603_s27, 1  ;;  %s4606_s29 = scalar_lea.hbm %s6210_s1, 1 }
 0x272   :  { %p4605_p3 = scmp.ne.s32.totalorder %s4603_s27, %s4604_s18  ;;  %p4607_p4 = scmp.lt.s32.totalorder %s4603_s27, %s6210_s1 }
 0x273   :  { %p4608_p5 = scmp.lt.s32.totalorder %s4606_s29, %s4604_s18 }
 0x275   :  { %s622_s15 = sshll.u32 %s6211_s19, 4  ;;  %p4609_p6 = por %p4608_p5, %p4607_p4  ;;  %s623_s15 = int_to_ptr.hbm [resolvable:$true] %s622_s15 }
 0x277   :  { %p4610_p7 = pnand %p4609_p6, %p4605_p3 }
 0x279   :  { %4613 = shalt.err (!%p4610_p7)
}
 0x27a   :  { %603 = dma.hbm_to_vmem [thread:$0]  %s599_s9, 16, %s601_s12, [#allocation49]  }
 0x27b   :  { %s6212_s14 = sld [smem:[#allocation151_spill]]  ;;  %s5063_s17 = smov [#allocation53]  }
 0x27c   :  { %s624_s13 = sshll.u32 %s5063_s17, 4  ;;  %s4626_s3 = sshra.s32 %s623_s15, 4  ;;  %s625_s13 = int_to_ptr.vmem [resolvable:$true] %s624_s13  ;;  %s4627_s3 = int_to_ptr.hbm [resolvable:$true] %s4626_s3 }
 0x27d   :  { %s4628_s5 = scalar_lea.hbm %s4627_s3, 1  ;;  %s4630_s24 = scalar_lea.hbm %s6211_s19, 1 }
 0x27e   :  { %p4629_p8 = scmp.ne.s32.totalorder %s4627_s3, %s4628_s5  ;;  %p4631_p9 = scmp.lt.s32.totalorder %s4627_s3, %s6211_s19 }
 0x27f   :  { %p4632_p10 = scmp.lt.s32.totalorder %s4630_s24, %s4628_s5 }
 0x281   :  { %s646_s0 = sshll.u32 %s6212_s14, 4  ;;  %p4633_p11 = por %p4632_p10, %p4631_p9  ;;  %s647_s0 = int_to_ptr.hbm [resolvable:$true] %s646_s0 }
 0x283   :  { %p4634_p12 = pnand %p4633_p11, %p4629_p8 }
 0x285   :  { %4637 = shalt.err (!%p4634_p12)
}
 0x286   :  { %627 = dma.hbm_to_vmem [thread:$0]  %s623_s15, 16, %s625_s13, [#allocation52]  }
 0x287   :  { %s6213_s8 = sld [smem:[#allocation153_spill]]  ;;  %s5064_s23 = smov [#allocation56]  }
 0x288   :  { %s648_s26 = sshll.u32 %s5064_s23, 4  ;;  %s4650_s4 = sshra.s32 %s647_s0, 4  ;;  %s649_s26 = int_to_ptr.vmem [resolvable:$true] %s648_s26  ;;  %s4651_s4 = int_to_ptr.hbm [resolvable:$true] %s4650_s4 }
 0x289   :  { %s4652_s6 = scalar_lea.hbm %s4651_s4, 1  ;;  %s4654_s1 = scalar_lea.hbm %s6212_s14, 1 }
 0x28a   :  { %p4653_p13 = scmp.ne.s32.totalorder %s4651_s4, %s4652_s6  ;;  %p4655_p0 = scmp.lt.s32.totalorder %s4651_s4, %s6212_s14 }
 0x28b   :  { %p4656_p1 = scmp.lt.s32.totalorder %s4654_s1, %s4652_s6 }
 0x28d   :  { %s668_s22 = sshll.u32 %s6213_s8, 4  ;;  %p4657_p2 = por %p4656_p1, %p4655_p0  ;;  %s669_s22 = int_to_ptr.hbm [resolvable:$true] %s668_s22 }
 0x28f   :  { %p4658_p3 = pnand %p4657_p2, %p4653_p13 }
 0x291   :  { %4661 = shalt.err (!%p4658_p3)
}
 0x292   :  { %651 = dma.hbm_to_vmem [thread:$0]  %s647_s0, 16, %s649_s26, [#allocation55]  }
 0x293   :  { %s6214_s9 = sld [smem:[#allocation155_spill]]  ;;  %s5065_s2 = smov [#allocation59]  }
 0x294   :  { %s670_s7 = sshll.u32 %s5065_s2, 4  ;;  %s4674_s20 = sshra.s32 %s669_s22, 4  ;;  %s671_s7 = int_to_ptr.vmem [resolvable:$true] %s670_s7  ;;  %s4675_s20 = int_to_ptr.hbm [resolvable:$true] %s4674_s20 }
 0x295   :  { %s4676_s21 = scalar_lea.hbm %s4675_s20, 1  ;;  %s4678_s19 = scalar_lea.hbm %s6213_s8, 1 }
 0x296   :  { %p4677_p4 = scmp.ne.s32.totalorder %s4675_s20, %s4676_s21  ;;  %p4679_p5 = scmp.lt.s32.totalorder %s4675_s20, %s6213_s8 }
 0x297   :  { %p4680_p6 = scmp.lt.s32.totalorder %s4678_s19, %s4676_s21 }
 0x299   :  { %s692_s30 = sshll.u32 %s6214_s9, 4  ;;  %p4681_p7 = por %p4680_p6, %p4679_p5  ;;  %s693_s30 = int_to_ptr.hbm [resolvable:$true] %s692_s30 }
 0x29b   :  { %p4682_p8 = pnand %p4681_p7, %p4677_p4 }
 0x29d   :  { %4685 = shalt.err (!%p4682_p8)
}
 0x29e   :  { %673 = dma.hbm_to_vmem [thread:$0]  %s669_s22, 16, %s671_s7, [#allocation58]  }
 0x29f   :  { %s6215_s11 = sld [smem:[#allocation158_spill]]  ;;  %s5066_s12 = smov [#allocation62]  }
 0x2a0   :  { %s694_s15 = sshll.u32 %s5066_s12, 4  ;;  %s4698_s18 = sshra.s32 %s693_s30, 4  ;;  %s695_s15 = int_to_ptr.vmem [resolvable:$true] %s694_s15  ;;  %s4699_s18 = int_to_ptr.hbm [resolvable:$true] %s4698_s18 }
 0x2a1   :  { %s4700_s29 = scalar_lea.hbm %s4699_s18, 1  ;;  %s4702_s14 = scalar_lea.hbm %s6214_s9, 1 }
 0x2a2   :  { %p4701_p9 = scmp.ne.s32.totalorder %s4699_s18, %s4700_s29  ;;  %p4703_p10 = scmp.lt.s32.totalorder %s4699_s18, %s6214_s9 }
 0x2a3   :  { %p4704_p11 = scmp.lt.s32.totalorder %s4702_s14, %s4700_s29 }
 0x2a5   :  { %s718_s27 = sshll.u32 %s6215_s11, 4  ;;  %p4705_p12 = por %p4704_p11, %p4703_p10  ;;  %s719_s27 = int_to_ptr.hbm [resolvable:$true] %s718_s27 }
 0x2a7   :  { %p4706_p13 = pnand %p4705_p12, %p4701_p9 }
 0x2a9   :  { %4709 = shalt.err (!%p4706_p13)
}
 0x2aa   :  { %697 = dma.hbm_to_vmem [thread:$0]  %s693_s30, 16, %s695_s15, [#allocation61]  }
 0x2ab   :  { %s6216_s0 = sld [smem:[#allocation160_spill]]  ;;  %s5067_s13 = smov [#allocation65]  }
 0x2ac   :  { %s720_s3 = sshll.u32 %s5067_s13, 4  ;;  %s4722_s5 = sshra.s32 %s719_s27, 4  ;;  %s721_s3 = int_to_ptr.vmem [resolvable:$true] %s720_s3  ;;  %s4723_s5 = int_to_ptr.hbm [resolvable:$true] %s4722_s5 }
 0x2ad   :  { %s4724_s24 = scalar_lea.hbm %s4723_s5, 1  ;;  %s4726_s8 = scalar_lea.hbm %s6215_s11, 1 }
 0x2ae   :  { %p4725_p0 = scmp.ne.s32.totalorder %s4723_s5, %s4724_s24  ;;  %p4727_p1 = scmp.lt.s32.totalorder %s4723_s5, %s6215_s11 }
 0x2af   :  { %p4728_p2 = scmp.lt.s32.totalorder %s4726_s8, %s4724_s24 }
 0x2b1   :  { %s742_s17 = sshll.u32 %s6216_s0, 4  ;;  %p4729_p3 = por %p4728_p2, %p4727_p1  ;;  %s743_s17 = int_to_ptr.hbm [resolvable:$true] %s742_s17 }
 0x2b3   :  { %p4730_p4 = pnand %p4729_p3, %p4725_p0 }
 0x2b5   :  { %4733 = shalt.err (!%p4730_p4)
}
 0x2b6   :  { %723 = dma.hbm_to_vmem [thread:$0]  %s719_s27, 16, %s721_s3, [#allocation64]  }
 0x2b7   :  { %s6217_s23 = sld [smem:[#allocation163_spill]]  ;;  %s5068_s26 = smov [#allocation68]  }
 0x2b8   :  { %s744_s22 = sshll.u32 %s5068_s26, 4  ;;  %s4746_s6 = sshra.s32 %s743_s17, 4  ;;  %s745_s22 = int_to_ptr.vmem [resolvable:$true] %s744_s22  ;;  %s4747_s6 = int_to_ptr.hbm [resolvable:$true] %s4746_s6 }
 0x2b9   :  { %s4748_s1 = scalar_lea.hbm %s4747_s6, 1  ;;  %s4750_s9 = scalar_lea.hbm %s6216_s0, 1 }
 0x2ba   :  { %p4749_p5 = scmp.ne.s32.totalorder %s4747_s6, %s4748_s1  ;;  %p4751_p6 = scmp.lt.s32.totalorder %s4747_s6, %s6216_s0 }
 0x2bb   :  { %p4752_p7 = scmp.lt.s32.totalorder %s4750_s9, %s4748_s1 }
 0x2bd   :  { %s768_s4 = sshll.u32 %s6217_s23, 4  ;;  %p4753_p8 = por %p4752_p7, %p4751_p6  ;;  %s769_s4 = int_to_ptr.hbm [resolvable:$true] %s768_s4 }
 0x2bf   :  { %p4754_p9 = pnand %p4753_p8, %p4749_p5 }
 0x2c1   :  { %4757 = shalt.err (!%p4754_p9)
}
 0x2c2   :  { %747 = dma.hbm_to_vmem [thread:$0]  %s743_s17, 16, %s745_s22, [#allocation67]  }
 0x2c3   :  { %s6218_s30 = sld [smem:[#allocation165_spill]]  ;;  %s5069_s7 = smov [#allocation71]  }
 0x2c4   :  { %s770_s20 = sshll.u32 %s5069_s7, 4  ;;  %s4770_s21 = sshra.s32 %s769_s4, 4  ;;  %s771_s20 = int_to_ptr.vmem [resolvable:$true] %s770_s20  ;;  %s4771_s21 = int_to_ptr.hbm [resolvable:$true] %s4770_s21 }
 0x2c5   :  { %s4772_s19 = scalar_lea.hbm %s4771_s21, 1  ;;  %s4774_s11 = scalar_lea.hbm %s6217_s23, 1 }
 0x2c6   :  { %p4773_p10 = scmp.ne.s32.totalorder %s4771_s21, %s4772_s19  ;;  %p4775_p11 = scmp.lt.s32.totalorder %s4771_s21, %s6217_s23 }
 0x2c7   :  { %p4776_p12 = scmp.lt.s32.totalorder %s4774_s11, %s4772_s19 }
 0x2c9   :  { %s792_s2 = sshll.u32 %s6218_s30, 4  ;;  %p4777_p13 = por %p4776_p12, %p4775_p11  ;;  %s793_s2 = int_to_ptr.hbm [resolvable:$true] %s792_s2 }
 0x2cb   :  { %p4778_p0 = pnand %p4777_p13, %p4773_p10 }
 0x2cd   :  { %4781 = shalt.err (!%p4778_p0)
}
 0x2ce   :  { %773 = dma.hbm_to_vmem [thread:$0]  %s769_s4, 16, %s771_s20, [#allocation70]  }
 0x2cf   :  { %s6219_s12 = sld [smem:[#allocation167_spill]]  ;;  %s5070_s15 = smov [#allocation74]  }
 0x2d0   :  { %s794_s27 = sshll.u32 %s5070_s15, 4  ;;  %s4794_s29 = sshra.s32 %s793_s2, 4  ;;  %s795_s27 = int_to_ptr.vmem [resolvable:$true] %s794_s27  ;;  %s4795_s29 = int_to_ptr.hbm [resolvable:$true] %s4794_s29 }
 0x2d1   :  { %s4796_s14 = scalar_lea.hbm %s4795_s29, 1  ;;  %s4798_s0 = scalar_lea.hbm %s6218_s30, 1 }
 0x2d2   :  { %p4797_p1 = scmp.ne.s32.totalorder %s4795_s29, %s4796_s14  ;;  %p4799_p2 = scmp.lt.s32.totalorder %s4795_s29, %s6218_s30 }
 0x2d3   :  { %p4800_p3 = scmp.lt.s32.totalorder %s4798_s0, %s4796_s14 }
 0x2d5   :  { %s816_s18 = sshll.u32 %s6219_s12, 4  ;;  %p4801_p4 = por %p4800_p3, %p4799_p2  ;;  %s817_s18 = int_to_ptr.hbm [resolvable:$true] %s816_s18 }
 0x2d7   :  { %p4802_p5 = pnand %p4801_p4, %p4797_p1 }
 0x2d9   :  { %4805 = shalt.err (!%p4802_p5)
}
 0x2da   :  { %797 = dma.hbm_to_vmem [thread:$0]  %s793_s2, 16, %s795_s27, [#allocation73]  }
 0x2db   :  { %s5071_s17 = smov [#allocation77]   ;;  %s4818_s3 = sshra.s32 %s817_s18, 4  ;;  %s4819_s3 = int_to_ptr.hbm [resolvable:$true] %s4818_s3 }
 0x2dc   :  { %s818_s13 = sshll.u32 %s5071_s17, 4  ;;  %s4820_s5 = scalar_lea.hbm %s4819_s3, 1  ;;  %s819_s13 = int_to_ptr.vmem [resolvable:$true] %s818_s13 }
 0x2dd   :  { %p4821_p6 = scmp.ne.s32.totalorder %s4819_s3, %s4820_s5  ;;  %s4822_s24 = scalar_lea.hbm %s6219_s12, 1 }
 0x2de   :  { %p4823_p7 = scmp.lt.s32.totalorder %s4819_s3, %s6219_s12  ;;  %p4824_p8 = scmp.lt.s32.totalorder %s4822_s24, %s4820_s5 }
 0x2e0   :  { %p4825_p9 = por %p4824_p8, %p4823_p7 }
 0x2e2   :  { %p4826_p10 = pnand %p4825_p9, %p4821_p6 }
 0x2e4   :  { %4829 = shalt.err (!%p4826_p10)
}
 0x2e5   :  { %821 = dma.hbm_to_vmem [thread:$0]  %s817_s18, 16, %s819_s13, [#allocation76]  }
 0x2e6   :  { %4890 = dma.done.wait [#allocation7], 384  }
 0x2e7   :  { %4891 = vsyncadd [#allocation7], 4294966912 }
 0x2e8   :  { %4892 = dma.done.wait [#allocation10], 768  }
 0x2e9   :  { %4893 = vsyncadd [#allocation10], 4294966528 }
 0x2ea   :  { %4894 = dma.done.wait [#allocation13], 256  }
 0x2eb   :  { %4895 = vsyncadd [#allocation13], 4294967040 }
 0x2ec   :  { %4896 = dma.done.wait [#allocation16], 256  }
 0x2ed   :  { %4897 = vsyncadd [#allocation16], 4294967040 }
 0x2ee   :  { %4898 = dma.done.wait [#allocation19], 32  }
 0x2ef   :  { %4899 = vsyncadd [#allocation19], 4294967264 }
 0x2f0   :  { %4900 = dma.done.wait [#allocation22], 32  }
 0x2f1   :  { %4901 = vsyncadd [#allocation22], 4294967264 }
 0x2f2   :  { %4902 = dma.done.wait [#allocation25], 1024  }
 0x2f3   :  { %4903 = vsyncadd [#allocation25], 4294966272 }
 0x2f4   :  { %4904 = dma.done.wait [#allocation28], 528  }
 0x2f5   :  { %4905 = vsyncadd [#allocation28], 4294966768 }
 0x2f6   :  { %4906 = dma.done.wait [#allocation31], 1024  }
 0x2f7   :  { %4907 = vsyncadd [#allocation31], 4294966272 }
 0x2f8   :  { %4908 = dma.done.wait [#allocation34], 32  }
 0x2f9   :  { %4909 = vsyncadd [#allocation34], 4294967264 }
 0x2fa   :  { %4910 = dma.done.wait [#allocation37], 528  }
 0x2fb   :  { %4911 = vsyncadd [#allocation37], 4294966768 }
 0x2fc   :  { %4912 = dma.done.wait [#allocation40], 528  }
 0x2fd   :  { %4913 = vsyncadd [#allocation40], 4294966768 }
 0x2fe   :  { %4914 = dma.done.wait [#allocation43], 32  }
 0x2ff   :  { %4915 = vsyncadd [#allocation43], 4294967264 }
 0x300   :  { %4916 = dma.done.wait [#allocation46], 528  }
 0x301   :  { %4917 = vsyncadd [#allocation46], 4294966768 }
 0x302   :  { %4918 = dma.done.wait [#allocation49], 528  }
 0x303   :  { %4919 = vsyncadd [#allocation49], 4294966768 }
 0x304   :  { %4920 = dma.done.wait [#allocation52], 528  }
 0x305   :  { %4921 = vsyncadd [#allocation52], 4294966768 }
 0x306   :  { %4922 = dma.done.wait [#allocation55], 528  }
 0x307   :  { %4923 = vsyncadd [#allocation55], 4294966768 }
 0x308   :  { %4924 = dma.done.wait [#allocation58], 32  }
 0x309   :  { %4925 = vsyncadd [#allocation58], 4294967264 }
 0x30a   :  { %4926 = dma.done.wait [#allocation61], 528  }
 0x30b   :  { %4927 = vsyncadd [#allocation61], 4294966768 }
 0x30c   :  { %4928 = dma.done.wait [#allocation64], 48  }
 0x30d   :  { %4929 = vsyncadd [#allocation64], 4294967248 }
 0x30e   :  { %4930 = dma.done.wait [#allocation67], 528  }
 0x30f   :  { %4931 = vsyncadd [#allocation67], 4294966768 }
 0x310   :  { %4932 = dma.done.wait [#allocation70], 32  }
 0x311   :  { %4933 = vsyncadd [#allocation70], 4294967264 }
 0x312   :  { %4934 = dma.done.wait [#allocation73], 528  }
 0x313   :  { %4935 = vsyncadd [#allocation73], 4294966768 }
 0x314   :  { %4936 = dma.done.wait [#allocation76], 528  }
 0x315   :  { %4937 = vsyncadd [#allocation76], 4294966768  ;;  %s6220_s8 = sld [smem:[#allocation108_spill]]  ;;  %v5072_v4 = vmov 1   ;;  %v5073_v5 = vmov 0   ;;  %v1142_v14 = vld [vmem:[#allocation66 + $0x10] sm:$0xff] }
 0x316   :  { %s6221_s23 = sld [smem:[#allocation107_spill]]  ;;  %3669 = vset.pattern.permute.xlu1 %v5072_v4  ;;  %3668 = vset.pattern.permute.xlu0 %v5073_v5  ;;  %v1143_v15 = vld [vmem:[#allocation66 + $0x18] sm:$0xff]  ;;  %v1140_v17 = vld [vmem:[#allocation66] sm:$0xff]  ;;  %v1141_v18 = vld [vmem:[#allocation66 + $0x8] sm:$0xff]  ;;  %vm1306_vm0 = vcmask 261120   ;;  %vm1388_vm1 = vcmask 130048  }
 0x317   :  { %3670 = vset.pattern.permute.xlu2 %v5073_v5  ;;  %v1302_v16 = vpack.c.bf16 %v1143_v15, %v1142_v14  ;;  %v1301_v19 = vpack.c.bf16 %v1141_v18, %v1140_v17  ;;  %v1138_v21 = vld [vmem:[#allocation63] sm:$0x3]  ;;  %v1155_v28 = vld [vmem:[#allocation72 + $0x18] sm:$0xff]  ;;  %v1152_v32 = vld [vmem:[#allocation72] sm:$0xff]  ;;  %s6222_s26 = sld [smem:[#allocation110_spill]]  ;;  %vm1835_vm2 = vcmask 392192  }
 0x318   :  { %v1239_v23 = vperm.slane %v1138_v21, 0  ;;  %v1270_v24 = vperm.slane %v1138_v21, 1  ;;  %v1154_v27 = vld [vmem:[#allocation72 + $0x10] sm:$0xff]  ;;  %v1153_v33 = vld [vmem:[#allocation72 + $0x8] sm:$0xff]  ;;  %v3676_v36 = vld [vmem:[#allocation65] ss:$0 sm:$0xff] }
 0x319   :  { %1322 = vmatpush.bf16.msra.mxu0 %v1302_v16  ;;  %v1436_v29 = vpack.c.bf16 %v1155_v28, %v1154_v27  ;;  %v1435_v34 = vpack.c.bf16 %v1153_v33, %v1152_v32  ;;  %v5770_v59 = vld [vmem:[#allocation69] ss:$0 sm:$0xff]  ;;  %v5773_v1 = vld [vmem:[#allocation71] ss:$0 sm:$0xff]  ;;  %s6223_s22 = sld [smem:[#allocation161_spill]]  ;;  %vm1896_vm3 = vcmask 1043456  }
 0x31a   :  { %v1160_v32 = vld [vmem:[#allocation75 + $0x18] sm:$0xff]  ;;  %s6224_s4 = sld [smem:[#allocation156_spill]]  ;;  %vm1892_vm4 = vcmask 195584   ;;  %vm2018_vm5 = vcmask 64512  }
 0x31b   :  { %v1164_v6 = vld [vmem:[%s6220_s8] sm:$0xff]  ;;  %v1166_v7 = vld [vmem:[%s6220_s8 + $0x10] sm:$0xff]  ;;  %v1165_v8 = vld [vmem:[%s6220_s8 + $0x8] sm:$0xff]  ;;  %1449 = vmatpush.bf16.msra.mxu3 %v1436_v29  ;;  %s6225_s6 = sld [smem:[#allocation128_spill]] }
 0x31c   :  { %1247 = vperm.xlu1 %3669, %v1164_v6   ;;  %1211 = vperm.xlu0 %3668, %v1164_v6   ;;  %v1162_v9 = vld [vmem:[%s6221_s23] sm:$0xff]  ;;  %v1163_v10 = vld [vmem:[%s6221_s23 + $0x8] sm:$0xff]  ;;  %v1167_v11 = vld [vmem:[%s6220_s8 + $0x18] sm:$0xff]  ;;  %s6226_s1 = sld [smem:[#allocation114_spill]] }
 0x31d   :  { %1221 = vperm.xlu2 %3670, %v1166_v7   ;;  %1406 = vmatpush.msra.mxu2 %v1163_v10  ;;  %v1168_v12 = vld [vmem:[%s6220_s8 + $0x20] sm:$0xff]  ;;  %v1169_v13 = vld [vmem:[%s6220_s8 + $0x28] sm:$0xff]  ;;  %v3679_v33 = vld [vmem:[#allocation68] ss:$0 sm:$0xff]  ;;  %s6227_s9 = sld [smem:[#allocation127_spill]]  ;;  %s5077_s8 = smov [#allocation79]  }
 0x31e   :  { %1323 = vmatpush.bf16.msra.mxu0 %v1301_v19  ;;  %v1173_v55 = vld [vmem:[%s6222_s26] sm:$0xf]  ;;  %s6228_s30 = sld [smem:[#allocation115_spill]]  ;;  %s3251_s23 = sshll.u32 %s5077_s8, 4  ;;  %s3252_s23 = int_to_ptr.vmem [resolvable:$true] %s3251_s23 }
 0x31f   :  { %1407 = vmatpush.msra.mxu2 %v1162_v9  ;;  %1450 = vmatpush.bf16.msra.mxu3 %v1435_v34  ;;  %v1387_v56 = vunpack.c.l.bf16 %v1173_v55  ;;  %v1145_v27 = vld [vmem:[%s6223_s22] sm:$0xff]  ;;  %v1146_v28 = vld [vmem:[%s6223_s22 + $0x8] sm:$0xff]  ;;  %s6229_s2 = sld [smem:[#allocation129_spill]]  ;;  %s3253_s26 = sshll.u32 %s5465_s28, 4  ;;  %s3254_s26 = int_to_ptr.hbm [resolvable:$true] %s3253_s26 }
 0x320   :  { %s6230_s7 = sld [smem:[#allocation116_spill]] }
 0x321   :  { %3376 = vmatmul.msk.f32.vlgmr.msra.gmra.mxu2 %vm1388_vm1, %v1387_v56  ;;  %s6231_s20 = sld [smem:[#allocation144_spill]] }
 0x322   :  { %s6232_s21 = sld [smem:[#allocation119_spill]] }
 0x323   :  { %1500 = vmatpush.bf16.msrb.mxu3 %v1436_v29  ;;  %v1349_v29 = vpack.c.bf16 %v1146_v28, %v1145_v27  ;;  %v1129_v27 = vld [vmem:[#allocation60 + $0x8] sm:$0xff]  ;;  %s6233_s19 = sld [smem:[#allocation124_spill]] }
 0x324   :  { %1251 = vperm.xlu1 %3669, %v1165_v8   ;;  %1216 = vperm.xlu0 %3668, %v1165_v8   ;;  %s6234_s11 = sld [smem:[#allocation125_spill]] }
 0x325   :  { %1226 = vperm.xlu2 %3670, %v1167_v11   ;;  %s6235_s12 = sld [smem:[#allocation126_spill]] }
 0x326   :  { %s6236_s15 = sld [smem:[#allocation120_spill]] }
 0x327   :  { %1501 = vmatpush.bf16.msrb.mxu3 %v1435_v34  ;;  %s6237_s27 = sld [smem:[#allocation121_spill]] }
 0x328   :  { %s6238_s18 = sld [smem:[#allocation122_spill]] }
 0x329   :  { %s6239_s29 = sld [smem:[#allocation118_spill]] }
 0x32a   :  { %s6240_s14 = sld [smem:[#allocation140_spill]] }
 0x32b   :  { %s6241_s0 = sld [smem:[#allocation141_spill]] }
 0x32c   :  { %1259 = vperm.xlu1 %3669, %v1167_v11   ;;  %3671 = vset.pattern.permute.xlu0 %v5072_v4  ;;  %s6242_s17 = sld [smem:[#allocation143_spill]] }
 0x32d   :  { %1255 = vperm.xlu0 %3671, %v1166_v7   ;;  %1231 = vperm.xlu2 %3670, %v1168_v12   ;;  %s6243_s13 = sld [smem:[#allocation134_spill]] }
 0x32e   :  { %s6244_s3 = sld [smem:[#allocation136_spill]] }
 0x32f   :  { %s6245_s5 = sld [smem:[#allocation137_spill]] }
 0x330   :  { %s6246_s24 = sld [smem:[#allocation112_spill]] }
 0x334   :  { %3672 = vset.pattern.permute.xlu1 %v5073_v5 }
 0x335   :  { %1236 = vperm.xlu1 %3672, %v1169_v13   ;;  %1267 = vperm.xlu0 %3671, %v1169_v13  }
 0x336   :  { %3673 = vset.pattern.permute.xlu2 %v5072_v4 }
 0x337   :  { %1263 = vperm.xlu2 %3673, %v1168_v12  }
 0x33d   :  { %1414 = vperm.xlu1 %3672, %v1162_v9   ;;  %3675 = vset.pattern.permute.xlu0 %v5073_v5 }
 0x33f   :  { %3674 = vset.pattern.permute.xlu2 %v5073_v5 }
 0x340   :  { %1419 = vperm.xlu2 %3674, %v1163_v10  }
 0x377   :  { %v1222_v20 = vpop.permute.xlu2 %1221 }
 0x378   :  { %v1242_v54 = vmul.f32 %v1239_v23, %v1222_v20 }
 0x37f   :  { %v1227_v22 = vpop.permute.xlu2 %1226 }
 0x380   :  { %v1243_v48 = vmul.f32 %v1239_v23, %v1227_v22 }
 0x387   :  { %v1232_v37 = vpop.permute.xlu2 %1231 }
 0x388   :  { %v1244_v11 = vmul.f32 %v1239_v23, %v1232_v37 }
 0x38e   :  { %v1248_v25 = vpop.permute.xlu1 %1247  ;;  %v1212_v26 = vpop.permute.xlu0 %1211 }
 0x38f   :  { %v1271_v30 = vmul.f32 %v1270_v24, %v1248_v25  ;;  %v1240_v31 = vmul.f32 %v1239_v23, %v1212_v26  ;;  %v1148_v25 = vld [vmem:[%s6223_s22 + $0x18] sm:$0xff] }
 0x391   :  { %v1277_v35 = vadd.f32 %v1271_v30, %v1240_v31  ;;  %v1264_v49 = vpop.permute.xlu2 %1263  ;;  %v1159_v31 = vld [vmem:[#allocation75 + $0x10] sm:$0xff] }
 0x392   :  { %v1275_v12 = vmul.f32 %v1270_v24, %v1264_v49  ;;  %v1461_v34 = vpack.c.bf16 %v1160_v32, %v1159_v31 }
 0x393   :  { %v1286_v42 = vadd.f32 %v3676_v36, %v1277_v35  ;;  %v1157_v35 = vld [vmem:[#allocation75] sm:$0xff] }
 0x394   :  { %v1281_v17 = vadd.f32 %v1275_v12, %v1244_v11  ;;  %1474 = vmatpush.bf16.msrb.mxu2 %v1461_v34 }
 0x395   :  { %v1292_v45 = vmax.f32 %v1286_v42, 0.0 }
 0x396   :  { %v1252_v38 = vpop.permute.xlu1 %1251  ;;  %v1217_v39 = vpop.permute.xlu0 %1216  ;;  %v1290_v20 = vadd.f32 %v3676_v36, %v1281_v17 }
 0x397   :  { %v1272_v40 = vmul.f32 %v1270_v24, %v1252_v38  ;;  %v1241_v41 = vmul.f32 %v1239_v23, %v1217_v39 }
 0x398   :  { %v1296_v22 = vmax.f32 %v1290_v20, 0.0  ;;  %v1170_v20 = vld [vmem:[#allocation6] sm:$0xff] }
 0x399   :  { %v1278_v43 = vadd.f32 %v1272_v40, %v1241_v41 }
 0x39a   :  { %v1420_v63 = vpop.permute.xlu2 %1419 }
 0x39b   :  { %v1287_v44 = vadd.f32 %v3676_v36, %v1278_v43  ;;  %v1426_v0 = vmul.f32 %v5770_v59, %v1420_v63 }
 0x39d   :  { %v1293_v46 = vmax.f32 %v1287_v44, 0.0  ;;  %v1431_v5 = vadd.f32 %v5773_v1, %v1426_v0 }
 0x39e   :  { %v1260_v47 = vpop.permute.xlu1 %1259 }
 0x39f   :  { %v1274_v50 = vmul.f32 %v1270_v24, %v1260_v47  ;;  %v1256_v51 = vpop.permute.xlu0 %1255  ;;  %v1298_v52 = vpack.c.bf16 %v1293_v46, %v1292_v45  ;;  %v1433_v13 = vmax.f32 %v1431_v5, 0.0  ;;  %v3681_v5 = vld [vmem:[#allocation5] ss:$0 sm:$0xff] }
 0x3a0   :  { %v1273_v53 = vmul.f32 %v1270_v24, %v1256_v51 }
 0x3a1   :  { %3370 = vmatmul.msk.bf16.vlgmr.msra.gmra.mxu0 %vm1306_vm0, %v1298_v52  ;;  %v1280_v57 = vadd.f32 %v1274_v50, %v1243_v48 }
 0x3a2   :  { %v1279_v58 = vadd.f32 %v1273_v53, %v1242_v54  ;;  %v5786_v53 = vld [vmem:[#allocation74] ss:$0 sm:$0xff] }
 0x3a3   :  { %v1289_v60 = vadd.f32 %v3676_v36, %v1280_v57 }
 0x3a4   :  { %v1288_v61 = vadd.f32 %v3676_v36, %v1279_v58  ;;  %v1409_v44 = vpop.f32.mrf.mxu2 }
 0x3a5   :  { %v1295_v2 = vmax.f32 %v1289_v60, 0.0  ;;  %1484 = vperm.xlu0 %3675, %v1409_v44  }
 0x3a6   :  { %v1294_v3 = vmax.f32 %v1288_v61, 0.0 }
 0x3a7   :  { %v1237_v62 = vpop.permute.xlu1 %1236  ;;  %v1268_v4 = vpop.permute.xlu0 %1267 }
 0x3a8   :  { %v1245_v6 = vmul.f32 %v1239_v23, %v1237_v62  ;;  %v1276_v7 = vmul.f32 %v1270_v24, %v1268_v4  ;;  %v1299_v9 = vpack.c.bf16 %v1295_v2, %v1294_v3  ;;  %v1147_v24 = vld [vmem:[%s6223_s22 + $0x10] sm:$0xff]  ;;  %s4854_s22 = sshra.s32 %s3254_s26, 4  ;;  %s4855_s22 = int_to_ptr.hbm [resolvable:$true] %s4854_s22 }
 0x3a9   :  { %v1350_v26 = vpack.c.bf16 %v1148_v25, %v1147_v24  ;;  %v1130_v24 = vld [vmem:[#allocation60 + $0x10] sm:$0xff]  ;;  %p4859_p12 = scmp.lt.s32.totalorder %s4855_s22, %s5465_s28 }
 0x3aa   :  { %v1282_v15 = vadd.f32 %v1276_v7, %v1245_v6 }
 0x3ab   :  { %1369 = vmatpush.bf16.msra.mxu1 %v1350_v26  ;;  %v1128_v26 = vld [vmem:[#allocation60] sm:$0xff] }
 0x3ac   :  { %v1291_v19 = vadd.f32 %v3676_v36, %v1282_v15  ;;  %v1158_v36 = vld [vmem:[#allocation75 + $0x8] sm:$0xff]  ;;  %v1582_v28 = vpack.c.bf16 %v1129_v27, %v1128_v26 }
 0x3ad   :  { %v1460_v38 = vpack.c.bf16 %v1158_v36, %v1157_v35 }
 0x3ae   :  { %v1297_v21 = vmax.f32 %v1291_v19, 0.0 }
 0x3af   :  { %v1415_v8 = vpop.permute.xlu1 %1414  ;;  %1370 = vmatpush.bf16.msra.mxu1 %v1349_v29  ;;  %1475 = vmatpush.bf16.msrb.mxu2 %v1460_v38 }
 0x3b0   :  { %v1425_v10 = vmul.f32 %v5770_v59, %v1415_v8  ;;  %v1300_v23 = vpack.c.bf16 %v1297_v21, %v1296_v22 }
 0x3b1   :  { %3371 = vmatmul.msk.bf16.gmra.mxu0 %vm1306_vm0, %v1299_v9 }
 0x3b2   :  { %v1430_v14 = vadd.f32 %v5773_v1, %v1425_v10 }
 0x3b3   :  { %1518 = vmatpush.bf16.msra.mxu2 %v1461_v34 }
 0x3b4   :  { %v1432_v16 = vmax.f32 %v1430_v14, 0.0 }
 0x3b6   :  { %v1434_v18 = vpack.c.bf16 %v1433_v13, %v1432_v16 }
 0x3b7   :  { %1519 = vmatpush.bf16.msra.mxu2 %v1460_v38  ;;  %v5803_v38 = vld [vmem:[#allocation77] ss:$0 sm:$0xff] }
 0x3b8   :  { %3377 = vmatmul.msk.bf16.vlgmr.msra.gmra.mxu3 %vm1306_vm0, %v1434_v18 }
 0x3c1   :  { %3372 = vmatmul.msk.bf16.gmra.mxu0 %vm1306_vm0, %v1300_v23  ;;  %v1171_v23 = vld [vmem:[#allocation6 + $0x8] sm:$0xff] }
 0x417   :  { %v1485_v10 = vpop.permute.xlu0 %1484 }
 0x418   :  { %v1487_v11 = vmul.f32 %v5770_v59, %v1485_v10 }
 0x41a   :  { %v1488_v14 = vadd.f32 %v5773_v1, %v1487_v11  ;;  %v1131_v1 = vld [vmem:[#allocation60 + $0x18] sm:$0xff] }
 0x41b   :  { %v1583_v25 = vpack.c.bf16 %v1131_v1, %v1130_v24 }
 0x41c   :  { %v1489_v15 = vmax.f32 %v1488_v14, 0.0 }
 0x41d   :  { %1602 = vmatpush.bf16.msra.mxu3 %v1583_v25  ;;  %1711 = vmatpush.bf16.msrb.mxu0 %v1583_v25 }
 0x41e   :  { %v1325_v30 = vpop.f32.mrf.mxu0  ;;  %v1490_v16 = vpack.c.bf16 %v1489_v15, %v1489_v15 }
 0x41f   :  { %v1326_v37 = vadd.f32 %v3679_v33, %v1325_v30  ;;  %v5796_v30 = vld [vmem:[#allocation57] ss:$0 sm:$0xff] }
 0x420   :  { %3379 = vmatmul.msk.bf16.vlgmr.msrb.gmra.mxu3 %vm1306_vm0, %v1490_v16  ;;  %v1135_v16 = vld [vmem:[%s6224_s4 + $0x10] sm:$0xff] }
 0x421   :  { %v1340_v41 = vmax.f32 %v1326_v37, 0.0  ;;  %1603 = vmatpush.bf16.msra.mxu3 %v1582_v28  ;;  %1712 = vmatpush.bf16.msrb.mxu0 %v1582_v28 }
 0x425   :  { %3529 = vmatpush.bf16.msrb.mxu3 %v1583_v25 }
 0x426   :  { %v1327_v39 = vpop.f32.mrf.mxu0 }
 0x427   :  { %v1328_v40 = vadd.f32 %v3679_v33, %v1327_v39 }
 0x429   :  { %v1341_v42 = vmax.f32 %v1328_v40, 0.0  ;;  %3530 = vmatpush.bf16.msrb.mxu3 %v1582_v28 }
 0x42b   :  { %v1346_v43 = vpack.c.bf16 %v1341_v42, %v1340_v41 }
 0x42d   :  { %3373 = vmatmul.msk.bf16.vlgmr.msra.gmra.mxu1 %vm1306_vm0, %v1346_v43 }
 0x42e   :  { %v1330_v45 = vpop.f32.mrf.mxu0 }
 0x42f   :  { %v1331_v46 = vadd.f32 %v3679_v33, %v1330_v45 }
 0x431   :  { %v1342_v49 = vmax.f32 %v1331_v46, 0.0 }
 0x436   :  { %v1332_v47 = vpop.f32.mrf.mxu0 }
 0x437   :  { %v1333_v48 = vadd.f32 %v3679_v33, %v1332_v47 }
 0x439   :  { %v1343_v50 = vmax.f32 %v1333_v48, 0.0 }
 0x43b   :  { %v1452_v51 = vpop.f32.mrf.mxu3  ;;  %v1347_v52 = vpack.c.bf16 %v1343_v50, %v1342_v49 }
 0x43c   :  { %v1453_v55 = vadd.f32 %v5786_v53, %v1452_v51 }
 0x43d   :  { %3374 = vmatmul.msk.bf16.gmra.mxu1 %vm1306_vm0, %v1347_v52 }
 0x43e   :  { %v1335_v54 = vpop.f32.mrf.mxu0  ;;  %v1457_v57 = vmax.f32 %v1453_v55, 0.0 }
 0x43f   :  { %v1336_v60 = vadd.f32 %v3679_v33, %v1335_v54 }
 0x441   :  { %v1344_v2 = vmax.f32 %v1336_v60, 0.0 }
 0x443   :  { %v1454_v56 = vpop.f32.mrf.mxu3 }
 0x444   :  { %v1455_v58 = vadd.f32 %v5786_v53, %v1454_v56 }
 0x446   :  { %v1458_v61 = vmax.f32 %v1455_v58, 0.0  ;;  %v1337_v62 = vpop.f32.mrf.mxu0 }
 0x447   :  { %v1338_v63 = vadd.f32 %v3679_v33, %v1337_v62  ;;  %v5799_v33 = vld [vmem:[#allocation59] ss:$0 sm:$0xff] }
 0x448   :  { %v1459_v0 = vpack.c.bf16 %v1458_v61, %v1457_v57 }
 0x449   :  { %v1345_v3 = vmax.f32 %v1338_v63, 0.0 }
 0x44a   :  { %3378 = vmatmul.msk.bf16.vlgmr.msrb.gmra.mxu2 %vm1306_vm0, %v1459_v0 }
 0x44b   :  { %v1348_v4 = vpack.c.bf16 %v1345_v3, %v1344_v2 }
 0x44d   :  { %3375 = vmatmul.msk.bf16.gmra.mxu1 %vm1306_vm0, %v1348_v4 }
 0x4a3   :  { %v1503_v61 = vpop.f32.mrf.mxu3 }
 0x4a4   :  { %v1504_v62 = vadd.f32 %v5786_v53, %v1503_v61 }
 0x4a6   :  { %v1507_v2 = vmax.f32 %v1504_v62, 0.0 }
 0x4aa   :  { %v1372_v6 = vpop.f32.mrf.mxu1 }
 0x4ab   :  { %v1373_v7 = vadd.f32 %v3681_v5, %v1372_v6 }
 0x4ad   :  { %1527 = vperm.xlu1 %3672, %v1373_v7   ;;  %v1508_v7 = vpack.c.bf16 %v1507_v2, %v1507_v2 }
 0x4af   :  { %3380 = vmatmul.msk.bf16.vlgmr.msra.gmra.mxu2 %vm1306_vm0, %v1508_v7 }
 0x4b2   :  { %v1374_v8 = vpop.f32.mrf.mxu1 }
 0x4b3   :  { %v1375_v9 = vadd.f32 %v3681_v5, %v1374_v8 }
 0x4b5   :  { %1532 = vperm.xlu2 %3674, %v1375_v9  }
 0x4ba   :  { %v1377_v12 = vpop.f32.mrf.mxu1 }
 0x4bb   :  { %v1378_v13 = vadd.f32 %v3681_v5, %v1377_v12 }
 0x4bd   :  { %1537 = vperm.xlu1 %3672, %v1378_v13   ;;  %v1505_v13 = vpop.f32.mrf.mxu3 }
 0x4c2   :  { %v1379_v17 = vpop.f32.mrf.mxu1 }
 0x4c3   :  { %v1380_v18 = vadd.f32 %v3681_v5, %v1379_v17  ;;  %v1136_v17 = vld [vmem:[%s6224_s4 + $0x18] sm:$0xff] }
 0x4c5   :  { %1542 = vperm.xlu2 %3674, %v1380_v18   ;;  %v1630_v18 = vpack.c.bf16 %v1136_v17, %v1135_v16 }
 0x4c7   :  { %1649 = vmatpush.bf16.msrb.mxu2 %v1630_v18  ;;  %1740 = vmatpush.bf16.msrb.mxu1 %v1630_v18 }
 0x4ca   :  { %v1382_v19 = vpop.f32.mrf.mxu1 }
 0x4cb   :  { %v1383_v21 = vadd.f32 %v3681_v5, %v1382_v19  ;;  %v1133_v19 = vld [vmem:[%s6224_s4] sm:$0xff] }
 0x4cd   :  { %1547 = vperm.xlu0 %3675, %v1383_v21   ;;  %1675 = vperm.xlu2 %3674, %v1170_v20   ;;  %v1477_v29 = vpop.f32.mrf.mxu2  ;;  %v1134_v20 = vld [vmem:[%s6224_s4 + $0x8] sm:$0xff]  ;;  %s4856_s4 = scalar_lea.hbm %s4855_s22, 8 }
 0x4ce   :  { %v1478_v43 = vadd.f32 %v5803_v38, %v1477_v29  ;;  %v1629_v21 = vpack.c.bf16 %v1134_v20, %v1133_v19  ;;  %v5074_v19 = vmov 839922192   ;;  %p4857_p11 = scmp.ne.s32.totalorder %s4855_s22, %s4856_s4 }
 0x4cf   :  { %v1761_v20 = vunpack.c.l.s4 %v5074_v19 }
 0x4d0   :  { %1650 = vmatpush.bf16.msrb.mxu2 %v1629_v21  ;;  %1741 = vmatpush.bf16.msrb.mxu1 %v1629_v21 }
 0x4d2   :  { %v1384_v22 = vpop.f32.mrf.mxu1 }
 0x4d3   :  { %v1385_v59 = vadd.f32 %v3681_v5, %v1384_v22 }
 0x4d5   :  { %1680 = vperm.xlu0 %3675, %v1171_v23   ;;  %1552 = vperm.xlu1 %3672, %v1385_v59   ;;  %v1479_v35 = vpop.f32.mrf.mxu2  ;;  %v5833_v23 = vld [vmem:[#allocation62] ss:$0 sm:$0xff] }
 0x4d6   :  { %v1480_v40 = vadd.f32 %v5803_v38, %v1479_v35 }
 0x4d8   :  { %v5808_v45 = vpack.c.bf16 %v1480_v40, %v1478_v43 }
 0x50f   :  { %v1533_v31 = vpop.permute.xlu2 %1532 }
 0x510   :  { %v1559_v32 = vmul.f32 %v5796_v30, %v1533_v31 }
 0x512   :  { %v1568_v36 = vadd.f32 %v5799_v33, %v1559_v32 }
 0x514   :  { %v1574_v41 = vmax.f32 %v1568_v36, 0.0 }
 0x51f   :  { %v1528_v34 = vpop.permute.xlu1 %1527  ;;  %v1543_v46 = vpop.permute.xlu2 %1542 }
 0x520   :  { %v1558_v37 = vmul.f32 %v5796_v30, %v1528_v34  ;;  %v1561_v47 = vmul.f32 %v5796_v30, %v1543_v46 }
 0x522   :  { %v1567_v39 = vadd.f32 %v5799_v33, %v1558_v37  ;;  %v1570_v49 = vadd.f32 %v5799_v33, %v1561_v47 }
 0x524   :  { %v1573_v42 = vmax.f32 %v1567_v39, 0.0  ;;  %v1576_v52 = vmax.f32 %v1570_v49, 0.0 }
 0x526   :  { %v1579_v44 = vpack.c.bf16 %v1574_v41, %v1573_v42 }
 0x527   :  { %v1676_v57 = vpop.permute.xlu2 %1675 }
 0x528   :  { %3381 = vmatmul.msk.bf16.vlgmr.msra.gmra.mxu3 %vm1306_vm0, %v1579_v44  ;;  %v1688_v58 = vmul.f32 %v5796_v30, %v1676_v57 }
 0x529   :  { %1925 = vmatpush.bf16.msra.mxu3 %v5808_v45 }
 0x52a   :  { %v1691_v3 = vadd.f32 %v5799_v33, %v1688_v58  ;;  %v5849_v58 = vld [vmem:[#allocation4] ss:$0 sm:$0xff] }
 0x52c   :  { %v1694_v53 = vmax.f32 %v1691_v3, 0.0 }
 0x52f   :  { %v1538_v48 = vpop.permute.xlu1 %1537 }
 0x530   :  { %v1560_v50 = vmul.f32 %v5796_v30, %v1538_v48 }
 0x532   :  { %v1569_v51 = vadd.f32 %v5799_v33, %v1560_v50  ;;  %v5841_v39 = vpop.f32.mrf.mxu2 }
 0x534   :  { %v1575_v54 = vmax.f32 %v1569_v51, 0.0 }
 0x536   :  { %v1580_v55 = vpack.c.bf16 %v1576_v52, %v1575_v54 }
 0x538   :  { %3382 = vmatmul.msk.bf16.gmra.mxu3 %vm1306_vm0, %v1580_v55 }
 0x53a   :  { %v1523_v44 = vpop.f32.mrf.mxu2 }
 0x53f   :  { %v1548_v56 = vpop.permute.xlu0 %1547 }
 0x540   :  { %v1562_v60 = vmul.f32 %v5796_v30, %v1548_v56 }
 0x542   :  { %v1571_v4 = vadd.f32 %v5799_v33, %v1562_v60 }
 0x544   :  { %v1577_v10 = vmax.f32 %v1571_v4, 0.0 }
 0x547   :  { %v1681_v63 = vpop.permute.xlu0 %1680  ;;  %v1553_v0 = vpop.permute.xlu1 %1552 }
 0x548   :  { %v1689_v5 = vmul.f32 %v5796_v30, %v1681_v63  ;;  %v1563_v6 = vmul.f32 %v5796_v30, %v1553_v0 }
 0x54a   :  { %v1692_v8 = vadd.f32 %v5799_v33, %v1689_v5  ;;  %v1572_v9 = vadd.f32 %v5799_v33, %v1563_v6 }
 0x54c   :  { %v1695_v11 = vmax.f32 %v1692_v8, 0.0  ;;  %v1578_v12 = vmax.f32 %v1572_v9, 0.0 }
 0x54e   :  { %v1697_v14 = vpack.c.bf16 %v1695_v11, %v1694_v53  ;;  %v1581_v15 = vpack.c.bf16 %v1578_v12, %v1577_v10 }
 0x550   :  { %3383 = vmatmul.msk.bf16.gmra.mxu3 %vm1306_vm0, %v1581_v15  ;;  %3387 = vmatmul.msk.bf16.vlgmr.msrb.gmra.mxu0 %vm1306_vm0, %v1697_v14  ;;  %v1172_v14 = vld [vmem:[#allocation6 + $0x10] sm:$0xff] }
 0x5ab   :  { %v1605_v22 = vpop.f32.mrf.mxu3 }
 0x5ac   :  { %v1606_v59 = vadd.f32 %v5833_v23, %v1605_v22  ;;  %v5859_v22 = vunpack.c.0.s8 %v1761_v20 }
 0x5ae   :  { %v1620_v25 = vmax.f32 %v1606_v59, 0.0 }
 0x5b3   :  { %v1607_v24 = vpop.f32.mrf.mxu3 }
 0x5b4   :  { %v1608_v1 = vadd.f32 %v5833_v23, %v1607_v24 }
 0x5b6   :  { %v1621_v26 = vmax.f32 %v1608_v1, 0.0  ;;  %v1179_v1 = vld [vmem:[#allocation9 + $0x10] sm:$0xff]  }
 0x5b8   :  { %v1626_v27 = vpack.c.bf16 %v1621_v26, %v1620_v25  ;;  %v1820_v26 = vunpack.c.h.bf16 %v1179_v1 }
 0x5ba   :  { %3384 = vmatmul.msk.bf16.vlgmr.msrb.gmra.mxu2 %vm1306_vm0, %v1626_v27 }
 0x5bb   :  { %v1610_v28 = vpop.f32.mrf.mxu3 }
 0x5bc   :  { %v1611_v29 = vadd.f32 %v5833_v23, %v1610_v28  ;;  %v1819_v28 = vunpack.c.l.bf16 %v1179_v1 }
 0x5be   :  { %v1622_v34 = vmax.f32 %v1611_v29, 0.0 }
 0x5c3   :  { %v1612_v31 = vpop.f32.mrf.mxu3 }
 0x5c4   :  { %v1613_v32 = vadd.f32 %v5833_v23, %v1612_v31 }
 0x5c6   :  { %v1623_v35 = vmax.f32 %v1613_v32, 0.0 }
 0x5c8   :  { %v1627_v36 = vpack.c.bf16 %v1623_v35, %v1622_v34  ;;  %v1176_v34 = vld [vmem:[#allocation9 + $0x8] sm:$0xff]  }
 0x5ca   :  { %3385 = vmatmul.msk.bf16.gmra.mxu2 %vm1306_vm0, %v1627_v36 }
 0x5cd   :  { %v1714_v37 = vpop.f32.mrf.mxu0 }
 0x5ce   :  { %v1715_v41 = vadd.f32 %v5833_v23, %v1714_v37 }
 0x5d0   :  { %v1723_v46 = vmax.f32 %v1715_v41, 0.0 }
 0x5d3   :  { %v1615_v40 = vpop.f32.mrf.mxu3 }
 0x5d4   :  { %v1616_v48 = vadd.f32 %v5833_v23, %v1615_v40 }
 0x5d5   :  { %v1716_v42 = vpop.f32.mrf.mxu0 }
 0x5d6   :  { %v1717_v43 = vadd.f32 %v5833_v23, %v1716_v42  ;;  %v1624_v52 = vmax.f32 %v1616_v48, 0.0  ;;  %v1818_v48 = vunpack.c.h.bf16 %v1176_v34 }
 0x5d8   :  { %v1724_v47 = vmax.f32 %v1717_v43, 0.0  ;;  %v1817_v43 = vunpack.c.l.bf16 %v1176_v34 }
 0x5da   :  { %v1726_v49 = vpack.c.bf16 %v1724_v47, %v1723_v46 }
 0x5db   :  { %v1617_v50 = vpop.f32.mrf.mxu3 }
 0x5dc   :  { %v1618_v51 = vadd.f32 %v5833_v23, %v1617_v50  ;;  %3389 = vmatmul.msk.bf16.vlgmr.msrb.gmra.mxu1 %vm1306_vm0, %v1726_v49  ;;  %v1175_v50 = vld [vmem:[#allocation9] sm:$0xff]  }
 0x5de   :  { %v1625_v54 = vmax.f32 %v1618_v51, 0.0  ;;  %v1815_v51 = vunpack.c.l.bf16 %v1175_v50 }
 0x5e0   :  { %v1628_v55 = vpack.c.bf16 %v1625_v54, %v1624_v52 }
 0x5e2   :  { %3386 = vmatmul.msk.bf16.gmra.mxu2 %vm1306_vm0, %v1628_v55 }
 0x63d   :  { %v1652_v56 = vpop.f32.mrf.mxu2 }
 0x63e   :  { %v1653_v13 = vadd.f32 %v5849_v58, %v1652_v56  ;;  %v1816_v56 = vunpack.c.h.bf16 %v1175_v50 }
 0x640   :  { %v1667_v15 = vpack.c.bf16 %v1653_v13, %v1653_v13  ;;  %v1044_v13 = vld [vmem:[%s6225_s6 + $0x10] sm:$0xff] }
 0x645   :  { %v1654_v57 = vpop.f32.mrf.mxu2 }
 0x646   :  { %v1655_v63 = vadd.f32 %v5849_v58, %v1654_v57 }
 0x648   :  { %v1668_v0 = vpack.c.bf16 %v1655_v63, %v1655_v63 }
 0x64d   :  { %v1657_v60 = vpop.f32.mrf.mxu2 }
 0x64e   :  { %v1658_v61 = vadd.f32 %v5849_v58, %v1657_v60 }
 0x650   :  { %v1669_v62 = vpack.c.bf16 %v1658_v61, %v1658_v61 }
 0x652   :  { %1775 = vperm.xlu0 %3675, %v1669_v62  }
 0x655   :  { %v1659_v4 = vpop.f32.mrf.mxu2 }
 0x656   :  { %v1660_v9 = vadd.f32 %v5849_v58, %v1659_v4 }
 0x658   :  { %v1670_v11 = vpack.c.bf16 %v1660_v9, %v1660_v9 }
 0x659   :  { %v1743_v2 = vpop.f32.mrf.mxu1 }
 0x65a   :  { %1766 = vperm.xlu0 %3675, %v1668_v0   ;;  %v1744_v3 = vadd.f32 %v5849_v58, %v1743_v2 }
 0x65c   :  { %v1752_v5 = vpack.c.bf16 %v1744_v3, %v1744_v3 }
 0x661   :  { %v1745_v16 = vpop.f32.mrf.mxu1 }
 0x662   :  { %1856 = vperm.xlu0 %3675, %v1752_v5   ;;  %v1746_v17 = vadd.f32 %v5849_v58, %v1745_v16  ;;  %v3503_v5 = vld [vmem:[#allocation14] sm:$0xff]  ;;  %v1042_v16 = vld [vmem:[%s6225_s6] sm:$0xff] }
 0x664   :  { %v1753_v18 = vpack.c.bf16 %v1746_v17, %v1746_v17  ;;  %v1043_v17 = vld [vmem:[%s6225_s6 + $0x8] sm:$0xff] }
 0x665   :  { %v1662_v6 = vpop.f32.mrf.mxu2 }
 0x666   :  { %v1663_v7 = vadd.f32 %v5849_v58, %v1662_v6 }
 0x668   :  { %v1671_v8 = vpack.c.bf16 %v1663_v7, %v1663_v7 }
 0x66a   :  { %1793 = vperm.xlu1 %3672, %v1671_v8  }
 0x66d   :  { %v1664_v53 = vpop.f32.mrf.mxu2 }
 0x66e   :  { %v1665_v10 = vadd.f32 %v5849_v58, %v1664_v53 }
 0x670   :  { %v1672_v12 = vpack.c.bf16 %v1665_v10, %v1665_v10 }
 0x672   :  { %1802 = vperm.xlu2 %3674, %v1672_v12   ;;  %1784 = vperm.xlu1 %3672, %v1670_v11  }
 0x67a   :  { %1685 = vperm.xlu1 %3672, %v1172_v14   ;;  %1757 = vperm.xlu2 %3674, %v1667_v15   ;;  %v1045_v14 = vld [vmem:[%s6225_s6 + $0x18] sm:$0xff]  ;;  %s4858_s6 = scalar_lea.hbm %s5465_s28, 8 }
 0x67b   :  { %v1951_v15 = vpack.c.bf16 %v1045_v14, %v1044_v13  ;;  %v3687_v13 = vld [vmem:[#allocation23] ss:$0 sm:$0xff]  ;;  %p4860_p13 = scmp.lt.s32.totalorder %s4858_s6, %s4856_s4 }
 0x67d   :  { %p4861_p0 = por %p4860_p13, %p4859_p12 }
 0x67f   :  { %p4862_p1 = pnand %p4861_p0, %p4857_p11 }
 0x682   :  { %1865 = vperm.xlu1 %3672, %v1753_v18   ;;  %v1950_v18 = vpack.c.bf16 %v1043_v17, %v1042_v16 }
 0x6c4   :  { %v1776_v59 = vpop.permute.xlu0 %1775 }
 0x6c5   :  { %v1781_v35 = vperm.slane %v1776_v59, %v5859_v22  ;;  %v1522_v59 = vadd.f32 %v5803_v38, %v5841_v39 }
 0x6c7   :  { %v1811_v46 = vunpack.c.l.bf16 %v1781_v35  ;;  %v2012_v1 = vpack.c.bf16 %v1522_v59, %v1522_v59  ;;  %v3520_v35 = vld [vmem:[%s6226_s1] sm:$0xff]  }
 0x6c9   :  { %v1823_v55 = vmul.f32 %v1817_v43, %v1811_v46 }
 0x6cc   :  { %v1803_v21 = vpop.permute.xlu2 %1802  ;;  %v1767_v40 = vpop.permute.xlu0 %1766 }
 0x6cd   :  { %v1808_v24 = vperm.slane %v1803_v21, %v5859_v22  ;;  %v1772_v47 = vperm.slane %v1767_v40, %v5859_v22 }
 0x6cf   :  { %v1814_v27 = vunpack.c.l.bf16 %v1808_v24  ;;  %v1810_v57 = vunpack.c.l.bf16 %v1772_v47  ;;  %v1040_v47 = vld [vmem:[%s6227_s9 + $0x10] sm:$0xff] }
 0x6d1   :  { %v1826_v36 = vmul.f32 %v1820_v26, %v1814_v27  ;;  %v1822_v0 = vmul.f32 %v1816_v56, %v1810_v57  ;;  %v2023_v27 = vsel %vm1896_vm3, %v2012_v1, 0  ;;  %v1199_v56 = vld [vmem:[%s6228_s30] sm:$0xf] }
 0x6d4   :  { %v1758_v32 = vpop.permute.xlu2 %1757 }
 0x6d5   :  { %v1763_v41 = vperm.slane %v1758_v32, %v5859_v22 }
 0x6d7   :  { %v1809_v52 = vunpack.c.l.bf16 %v1763_v41 }
 0x6d9   :  { %v1821_v61 = vmul.f32 %v1815_v51, %v1809_v52 }
 0x6db   :  { %v1827_v4 = vpack.c.bf16 %v1822_v0, %v1821_v61  ;;  %v1049_v61 = vld [vmem:[%s6229_s2 + $0x18] sm:$0xff]  ;;  %v1047_v0 = vld [vmem:[%s6229_s2 + $0x8] sm:$0xff] }
 0x6dc   :  { %v1794_v25 = vpop.permute.xlu1 %1793 }
 0x6dd   :  { %v1799_v29 = vperm.slane %v1794_v25, %v5859_v22 }
 0x6df   :  { %v1813_v31 = vunpack.c.l.bf16 %v1799_v29  ;;  %v1857_v29 = vpop.permute.xlu0 %1856 }
 0x6e0   :  { %v1862_v34 = vperm.slane %v1857_v29, %v5859_v22 }
 0x6e1   :  { %v1825_v37 = vmul.f32 %v1819_v28, %v1813_v31  ;;  %v1198_v28 = vld [vmem:[%s6226_s1 + $0x8] sm:$0xf] }
 0x6e2   :  { %v1886_v31 = vunpack.c.l.bf16 %v1198_v28  ;;  %v1881_v43 = vunpack.c.l.bf16 %v1862_v34 }
 0x6e3   :  { %v1829_v42 = vpack.c.bf16 %v1826_v36, %v1825_v37  ;;  %v3522_v37 = vunpack.c.h.bf16 %v3520_v35 }
 0x6e4   :  { %v1785_v44 = vpop.permute.xlu1 %1784 }
 0x6e5   :  { %v1790_v49 = vperm.slane %v1785_v44, %v5859_v22  ;;  %1844 = vmatpush.bf16.msra.mxu0 %v1829_v42  ;;  %v3521_v42 = vunpack.c.l.bf16 %v3520_v35 }
 0x6e7   :  { %v1812_v54 = vunpack.c.l.bf16 %v1790_v49  ;;  %v1887_v50 = vmul.f32 %v3521_v42, %v1881_v43 }
 0x6e9   :  { %v1824_v60 = vmul.f32 %v1818_v48, %v1812_v54  ;;  %v1041_v48 = vld [vmem:[%s6227_s9 + $0x18] sm:$0xff]  ;;  %v1038_v54 = vld [vmem:[%s6227_s9] sm:$0xff] }
 0x6ea   :  { %v1949_v51 = vpack.c.bf16 %v1041_v48, %v1040_v47 }
 0x6eb   :  { %v1828_v62 = vpack.c.bf16 %v1824_v60, %v1823_v55  ;;  %v1039_v55 = vld [vmem:[%s6227_s9 + $0x8] sm:$0xff]  ;;  %v1048_v60 = vld [vmem:[%s6229_s2 + $0x10] sm:$0xff] }
 0x6ec   :  { %v1686_v63 = vpop.permute.xlu1 %1685  ;;  %v1948_v57 = vpack.c.bf16 %v1039_v55, %v1038_v54  ;;  %v1104_v55 = vld [vmem:[%s6231_s20 + $0x10] sm:$0xff] }
 0x6ed   :  { %v1690_v2 = vmul.f32 %v5796_v30, %v1686_v63  ;;  %1845 = vmatpush.bf16.msra.mxu0 %v1828_v62  ;;  %v1987_v62 = vpack.c.bf16 %v1049_v61, %v1048_v60  ;;  %v1046_v63 = vld [vmem:[%s6229_s2] sm:$0xff] }
 0x6ef   :  { %v1693_v3 = vadd.f32 %v5799_v33, %v1690_v2  ;;  %v1986_v2 = vpack.c.bf16 %v1047_v0, %v1046_v63 }
 0x6f1   :  { %v1696_v6 = vmax.f32 %v1693_v3, 0.0  ;;  %1846 = vmatpush.bf16.msra.mxu0 %v1827_v4 }
 0x6f3   :  { %v1698_v7 = vpack.c.bf16 %v1696_v6, %v1696_v6 }
 0x6f4   :  { %3395 = vmatmul.msk.bf16.vlgmr.msra.gmra.mxu0 %vm1835_vm2, %v3503_v5 }
 0x6f5   :  { %3388 = vmatmul.msk.bf16.vlgmr.msrb.gmra.mxu3 %vm1306_vm0, %v1698_v7  ;;  %1961 = vmatpush.bf16.msrb.mxu0 %v1951_v15 }
 0x6f6   :  { %1997 = vmatpush.bf16.msrb.mxu3 %v1987_v62 }
 0x6f9   :  { %1962 = vmatpush.bf16.msrb.mxu0 %v1950_v18 }
 0x6fa   :  { %1998 = vmatpush.bf16.msrb.mxu3 %v1986_v2  ;;  %v1102_v2 = vld [vmem:[%s6231_s20] sm:$0xff] }
 0x771   :  { %v1848_v8 = vpop.f32.mrf.mxu0 }
 0x778   :  { %v1719_v9 = vpop.f32.mrf.mxu3 }
 0x779   :  { %v1720_v30 = vadd.f32 %v5833_v23, %v1719_v9  ;;  %v1850_v53 = vpop.f32.mrf.mxu0 }
 0x77a   :  { %v5872_v33 = vpack.c.bf16 %v1850_v53, %v1848_v8  ;;  %v5908_v8 = vld [vmem:[#allocation17] sm:$0xff] }
 0x77b   :  { %v1725_v10 = vmax.f32 %v1720_v30, 0.0 }
 0x77c   :  { %3397 = vmatmul.msk.bf16.vlgmr.msra.gmra.mxu3 %vm1388_vm1, %v5872_v33 }
 0x77d   :  { %v1727_v11 = vpack.c.bf16 %v1725_v10, %v1725_v10  ;;  %v5075_v10 = vmov 16.0  }
 0x77e   :  { %3704 = vrcp.f32 %v5075_v10 }
 0x77f   :  { %3390 = vmatmul.msk.bf16.gmra.mxu1 %vm1306_vm0, %v1727_v11 }
 0x780   :  { %v1721_v12 = vpop.f32.mrf.mxu3 }
 0x784   :  { %v3705_v14 = vpop.eup %3704 }
 0x785   :  { %vm2258_vm6 = vweird.f32 %v3705_v14 }
 0x7fc   :  { %v1748_v23 = vpop.f32.mrf.mxu1 }
 0x7fd   :  { %v1749_v19 = vadd.f32 %v5849_v58, %v1748_v23  ;;  %v1866_v58 = vpop.permute.xlu1 %1865 }
 0x7fe   :  { %v1871_v38 = vperm.slane %v1866_v58, %v5859_v22 }
 0x7ff   :  { %v1754_v20 = vpack.c.bf16 %v1749_v19, %v1749_v19  ;;  %v1927_v21 = vpop.f32.mrf.mxu3  ;;  %v2254_v19 = vmul.f32 16.0, %v3705_v14 }
 0x800   :  { %v1882_v40 = vunpack.c.l.bf16 %v1871_v38 }
 0x801   :  { %1874 = vperm.xlu2 %3674, %v1754_v20  }
 0x802   :  { %v1888_v46 = vmul.f32 %v3522_v37, %v1882_v40 }
 0x804   :  { %v1750_v24 = vpop.f32.mrf.mxu1  ;;  %v1890_v52 = vpack.c.bf16 %v1888_v46, %v1887_v50 }
 0x805   :  { %v2255_v24 = vsub.f32 1.0, %v2254_v19 }
 0x807   :  { %v1929_v25 = vpop.f32.mrf.mxu3  ;;  %v2256_v58 = vmul.f32 %v3705_v14, %v2255_v24  ;;  %v1111_v24 = vld [vmem:[#allocation48] sm:$0xff] }
 0x808   :  { %v1932_v26 = vpack.c.bf16 %v1929_v25, %v1927_v21 }
 0x809   :  { %v2257_v38 = vadd.f32 %v3705_v14, %v2256_v58 }
 0x80a   :  { %1940 = vmatpush.bf16.msra.mxu2 %v1932_v26  ;;  %3399 = vmatmul.msk.bf16.vlgmr.msrb.gmra.mxu0 %vm1306_vm0, %v1932_v26  ;;  %v5915_v26 = vld [vmem:[%s6230_s7] sm:$0xff] }
 0x80d   :  { %3398 = vmatmul.msk.bf16.vlgmr.msra.gmra.mxu2 %vm1388_vm1, %v5872_v33 }
 0x80e   :  { %2032 = vmatpush.bf16.msrb.mxu2 %v2023_v27 }
 0x81d   :  { %3406 = vmatmul.msk.bf16.vlgmr.msrb.gmra.mxu2 %vm2018_vm5, %v5908_v8 }
 0x85b   :  { %v1875_v39 = vpop.permute.xlu2 %1874 }
 0x85c   :  { %v1880_v32 = vperm.slane %v1875_v39, %v5859_v22 }
 0x85e   :  { %v1883_v36 = vunpack.c.l.bf16 %v1880_v32  ;;  %v2259_v32 = vsel %vm2258_vm6, %v3705_v14, %v2257_v38 }
 0x860   :  { %v1889_v41 = vmul.f32 %v1886_v31, %v1883_v36 }
 0x862   :  { %v1891_v44 = vpack.c.bf16 %v1889_v41, %v1889_v41 }
 0x864   :  { %v1898_v49 = vsel %vm1896_vm3, %v1891_v44, 0 }
 0x865   :  { %1906 = vmatpush.bf16.msra.mxu1 %v1898_v49 }
 0x869   :  { %1907 = vmatpush.bf16.msra.mxu1 %v1890_v52 }
 0x86c   :  { %3396 = vmatmul.msk.bf16.vlgmr.msra.gmra.mxu1 %vm1892_vm4, %v1199_v56  ;;  %v1105_v56 = vld [vmem:[%s6231_s20 + $0x18] sm:$0xff] }
 0x86d   :  { %1978 = vmatpush.bf16.msrb.mxu1 %v1949_v51  ;;  %v2064_v60 = vpack.c.bf16 %v1105_v56, %v1104_v55  ;;  %v1031_v55 = vld [vmem:[%s6234_s11 + $0x10] sm:$0xff]  ;;  %v1032_v56 = vld [vmem:[%s6234_s11 + $0x18] sm:$0xff] }
 0x86f   :  { %2094 = vmatpush.bf16.msra.mxu3 %v2064_v60 }
 0x871   :  { %1979 = vmatpush.bf16.msrb.mxu1 %v1948_v57 }
 0x87c   :  { %3400 = vmatmul.msk.bf16.vlgmr.msrb.gmra.mxu1 %vm1306_vm0, %v5808_v45 }
 0x887   :  { %v1964_v30 = vpop.f32.mrf.mxu0 }
 0x88f   :  { %v1966_v15 = vpop.f32.mrf.mxu0 }
 0x890   :  { %v1942_v3 = vpop.f32.mrf.mxu2 }
 0x898   :  { %v1944_v4 = vpop.f32.mrf.mxu2 }
 0x899   :  { %v1947_v5 = vpack.c.bf16 %v1944_v4, %v1942_v3  ;;  %v1103_v3 = vld [vmem:[%s6231_s20 + $0x8] sm:$0xff] }
 0x89a   :  { %v2063_v4 = vpack.c.bf16 %v1103_v3, %v1102_v2  ;;  %v1029_v2 = vld [vmem:[%s6234_s11] sm:$0xff]  ;;  %v1030_v3 = vld [vmem:[%s6234_s11 + $0x8] sm:$0xff] }
 0x89b   :  { %3401 = vmatmul.msk.bf16.vlgmr.msrb.gmra.mxu3 %vm1306_vm0, %v1947_v5 }
 0x89c   :  { %2095 = vmatpush.bf16.msra.mxu3 %v2063_v4  ;;  %v2189_v4 = vpack.c.bf16 %v1030_v3, %v1029_v2 }
 0x8a0   :  { %v2034_v10 = vpop.f32.mrf.mxu2 }
 0x8e9   :  { %v5906_v6 = vpop.f32.mrf.mxu1 }
 0x8f1   :  { %v1911_v7 = vpop.f32.mrf.mxu1 }
 0x8f9   :  { %v1981_v9 = vpop.f32.mrf.mxu1 }
 0x8fa   :  { %v1982_v45 = vadd.f32 %v1981_v9, %v1964_v30 }
 0x901   :  { %v1983_v11 = vpop.f32.mrf.mxu1 }
 0x902   :  { %v1984_v16 = vadd.f32 %v1983_v11, %v1966_v15  ;;  %v1106_v15 = vld [vmem:[#allocation45] sm:$0xff] }
 0x91e   :  { %v2000_v53 = vpop.f32.mrf.mxu3 }
 0x91f   :  { %v2005_v12 = vadd.f32 %v2000_v53, %v1982_v45  ;;  %v2036_v45 = vpop.f32.mrf.mxu2 }
 0x920   :  { %v2062_v11 = vpack.c.bf16 %v2036_v45, %v2034_v10 }
 0x921   :  { %v2010_v18 = vadd.f32 %v3687_v13, %v2005_v12  ;;  %v1108_v12 = vld [vmem:[#allocation45 + $0x10] sm:$0xff] }
 0x922   :  { %3413 = vmatmul.msk.bf16.vlgmr.msra.gmra.mxu3 %vm1306_vm0, %v2062_v11 }
 0x923   :  { %v2244_v21 = vsel %vm1306_vm0, %v2010_v18, 0.0 }
 0x926   :  { %v2002_v17 = vpop.f32.mrf.mxu3 }
 0x927   :  { %v2006_v23 = vadd.f32 %v2002_v17, %v1984_v16  ;;  %v1107_v16 = vld [vmem:[#allocation45 + $0x8] sm:$0xff] }
 0x928   :  { %v2066_v17 = vpack.c.bf16 %v1107_v16, %v1106_v15  ;;  %v1033_v15 = vld [vmem:[%s6235_s12] sm:$0xff]  ;;  %v1034_v16 = vld [vmem:[%s6235_s12 + $0x8] sm:$0xff] }
 0x929   :  { %v2011_v20 = vadd.f32 %v3687_v13, %v2006_v23  ;;  %v1109_v13 = vld [vmem:[#allocation45 + $0x18] sm:$0xff] }
 0x92a   :  { %v2067_v14 = vpack.c.bf16 %v1109_v13, %v1108_v12  ;;  %v1035_v12 = vld [vmem:[%s6235_s12 + $0x10] sm:$0xff]  ;;  %v1036_v13 = vld [vmem:[%s6235_s12 + $0x18] sm:$0xff] }
 0x92b   :  { %v2245_v59 = vsel %vm1306_vm0, %v2011_v20, 0.0  ;;  %v2039_v1 = vpack.c.bf16 %v2011_v20, %v2010_v18 }
 0x92c   :  { %v2246_v25 = vadd.f32 %v2245_v59, %v2244_v21  ;;  %2077 = vmatpush.bf16.msra.mxu1 %v2067_v14  ;;  %v1114_v21 = vld [vmem:[#allocation48 + $0x18] sm:$0xff]  ;;  %v2222_v14 = vpack.c.bf16 %v1036_v13, %v1035_v12 }
 0x92d   :  { %2055 = vmatpush.bf16.msra.mxu0 %v2039_v1  ;;  %v1112_v1 = vld [vmem:[#allocation48 + $0x8] sm:$0xff] }
 0x92e   :  { %v2247_v27 = vrot.slane %v2246_v25, 4 }
 0x930   :  { %v2248_v28 = vadd.f32 %v2247_v27, %v2246_v25  ;;  %3411 = vmatmul.msk.bf16.vlgmr.msra.gmra.mxu0 %vm1388_vm1, %v5915_v26  ;;  %2078 = vmatpush.bf16.msra.mxu1 %v2066_v17  ;;  %v2110_v25 = vpack.c.bf16 %v1112_v1, %v1111_v24  ;;  %v2221_v17 = vpack.c.bf16 %v1034_v16, %v1033_v15  ;;  %v1017_v15 = vld [vmem:[%s6237_s27 + $0x10] sm:$0xff]  ;;  %v1018_v16 = vld [vmem:[%s6237_s27 + $0x18] sm:$0xff] }
 0x932   :  { %v2249_v29 = vrot.slane %v2248_v28, 2 }
 0x934   :  { %v2250_v39 = vadd.f32 %v2249_v29, %v2248_v28  ;;  %v3688_v29 = vld [vmem:[#allocation47] ss:$0 sm:$0xff] }
 0x936   :  { %v2251_v31 = vrot.slane %v2250_v39, 1 }
 0x938   :  { %v2252_v34 = vadd.f32 %v2251_v31, %v2250_v39 }
 0x93a   :  { %v2260_v35 = vmul.f32 %v2259_v32, %v2252_v34 }
 0x93c   :  { %v2262_v36 = vsub.f32 %v2011_v20, %v2260_v35  ;;  %v2261_v37 = vsub.f32 %v2010_v18, %v2260_v35  ;;  %v1113_v20 = vld [vmem:[#allocation48 + $0x10] sm:$0xff] }
 0x93d   :  { %v2111_v59 = vpack.c.bf16 %v1114_v21, %v1113_v20 }
 0x93e   :  { %v2264_v40 = vmul.f32 %v2262_v36, %v2262_v36  ;;  %v2263_v41 = vmul.f32 %v2261_v37, %v2261_v37 }
 0x93f   :  { %2124 = vmatpush.bf16.msra.mxu2 %v2111_v59  ;;  %v3690_v59 = vld [vmem:[#allocation21] ss:$0 sm:$0xff] }
 0x940   :  { %v2266_v42 = vsel %vm1306_vm0, %v2264_v40, 0.0  ;;  %v2265_v43 = vsel %vm1306_vm0, %v2263_v41, 0.0  ;;  %v3689_v41 = vld [vmem:[#allocation50] ss:$0 sm:$0xff] }
 0x941   :  { %v2267_v44 = vadd.f32 %v2266_v42, %v2265_v43 }
 0x943   :  { %v2268_v46 = vrot.slane %v2267_v44, 4  ;;  %2125 = vmatpush.bf16.msra.mxu2 %v2110_v25 }
 0x945   :  { %v2269_v47 = vadd.f32 %v2268_v46, %v2267_v44 }
 0x947   :  { %v2270_v48 = vrot.slane %v2269_v47, 2 }
 0x949   :  { %v2271_v49 = vadd.f32 %v2270_v48, %v2269_v47  ;;  %v5935_v47 = vld [vmem:[%s6232_s21] sm:$0xf]  ;;  %v1027_v48 = vld [vmem:[%s6233_s19 + $0x10] sm:$0xff] }
 0x94b   :  { %v2272_v50 = vrot.slane %v2271_v49, 1 }
 0x94d   :  { %v2273_v51 = vadd.f32 %v2272_v50, %v2271_v49  ;;  %v1028_v49 = vld [vmem:[%s6233_s19 + $0x18] sm:$0xff] }
 0x94e   :  { %v2188_v50 = vpack.c.bf16 %v1028_v49, %v1027_v48 }
 0x94f   :  { %v2274_v52 = vmul.f32 %v2273_v51, %v2259_v32  ;;  %v1025_v51 = vld [vmem:[%s6233_s19] sm:$0xff] }
 0x951   :  { %v2275_v54 = vadd.f32 1e-05, %v2274_v52  ;;  %v1026_v52 = vld [vmem:[%s6233_s19 + $0x8] sm:$0xff] }
 0x953   :  { %3706 = vrsqrt.f32 %v2275_v54  ;;  %vm2282_vm8 = vweird.f32 %v2275_v54 }
 0x959   :  { %v3707_v57 = vpop.eup %3706 }
 0x95a   :  { %v2277_v61 = vmul.f32 %v3707_v57, %v2275_v54  ;;  %vm2283_vm7 = vweird.f32 %v3707_v57  ;;  %v2187_v54 = vpack.c.bf16 %v1026_v52, %v1025_v51 }
 0x95b   :  { %vm2284_vm9 = vmor %vm2282_vm8, %vm2283_vm7 }
 0x95c   :  { %v2278_v62 = vmul.f32 %v3707_v57, %v2277_v61 }
 0x95e   :  { %v2279_v63 = vmul.f32 0.5, %v2278_v62 }
 0x960   :  { %v2280_v0 = vsub.f32 1.5, %v2279_v63  ;;  %v1913_v63 = vpack.c.bf16 %v5906_v6, %v5906_v6 }
 0x962   :  { %v2281_v5 = vmul.f32 %v3707_v57, %v2280_v0 }
 0x964   :  { %v2285_v7 = vsel %vm2284_vm9, %v3707_v57, %v2281_v5  ;;  %v2190_v57 = vpack.c.bf16 %v1032_v56, %v1031_v55 }
 0x965   :  { %v5925_v9 = vmul.f32 %v2285_v7, %v2261_v37  ;;  %v5927_v30 = vmul.f32 %v2285_v7, %v2262_v36 }
 0x966   :  { %2199 = vmatpush.bf16.msrb.mxu2 %v2190_v57 }
 0x967   :  { %v2288_v53 = vpack.c.bf16 %v5927_v30, %v5925_v9 }
 0x96a   :  { %2200 = vmatpush.bf16.msrb.mxu2 %v2189_v4 }
 0x9a5   :  { %v2097_v27 = vpop.f32.mrf.mxu3 }
 0x9ad   :  { %v2057_v18 = vpop.f32.mrf.mxu0  ;;  %v2099_v38 = vpop.f32.mrf.mxu3 }
 0x9b5   :  { %v2059_v23 = vpop.f32.mrf.mxu0 }
 0x9b6   :  { %v2065_v19 = vpack.c.bf16 %v2059_v23, %v2057_v18 }
 0x9b8   :  { %3412 = vmatmul.msk.bf16.vlgmr.msra.gmra.mxu1 %vm1306_vm0, %v2065_v19 }
 0xa35   :  { %v2080_v58 = vpop.f32.mrf.mxu1 }
 0xa36   :  { %v2098_v28 = vadd.f32 %v2097_v27, %v2080_v58 }
 0xa38   :  { %v2105_v31 = vadd.f32 %v3688_v29, %v2098_v28 }
 0xa3a   :  { %v2107_v35 = vmax.f32 %v2105_v31, 0.0 }
 0xa3d   :  { %v2082_v39 = vpop.f32.mrf.mxu1 }
 0xa3e   :  { %v2100_v32 = vadd.f32 %v2099_v38, %v2082_v39 }
 0xa40   :  { %v2106_v34 = vadd.f32 %v3688_v29, %v2100_v32 }
 0xa42   :  { %v2108_v36 = vmax.f32 %v2106_v34, 0.0 }
 0xa44   :  { %v2109_v37 = vpack.c.bf16 %v2108_v36, %v2107_v35 }
 0xa46   :  { %3414 = vmatmul.msk.bf16.vlgmr.msra.gmra.mxu2 %vm1306_vm0, %v2109_v37 }
 0xac9   :  { %v2127_v40 = vpop.f32.mrf.mxu2 }
 0xaca   :  { %v2128_v43 = vadd.f32 %v3689_v41, %v2127_v40 }
 0xad1   :  { %v2129_v42 = vpop.f32.mrf.mxu2 }
 0xad2   :  { %v2130_v44 = vadd.f32 %v3689_v41, %v2129_v42 }
 0xad4   :  { %v2132_v46 = vpack.c.bf16 %v2130_v44, %v2128_v43 }
 0xad6   :  { %2143 = vmatpush.bf16.msrb.mxu0 %v2132_v46 }
 0xad9   :  { %3415 = vmatmul.msk.bf16.vlgmr.msrb.gmra.mxu0 %vm1388_vm1, %v5935_v47 }
 0xada   :  { %2214 = vmatpush.bf16.msra.mxu0 %v2188_v50 }
 0xade   :  { %2215 = vmatpush.bf16.msra.mxu0 %v2187_v54 }
 0xb56   :  { %v2145_v60 = vpop.f32.mrf.mxu0 }
 0xb57   :  { %v2149_v61 = vpack.c.bf16 %v2145_v60, %v2145_v60 }
 0xb59   :  { %v2154_v62 = vsel %vm1896_vm3, %v2149_v61, 0  ;;  %3419 = vmatmul.msk.bf16.vlgmr.msra.gmra.mxu0 %vm1306_vm0, %v2149_v61 }
 0xb5a   :  { %2163 = vmatpush.bf16.msrb.mxu1 %v2154_v62 }
 0xb5d   :  { %3416 = vmatmul.msk.bf16.vlgmr.msrb.gmra.mxu1 %vm2018_vm5, %v1913_v63 }
 0xb5e   :  { %v2147_v0 = vpop.f32.mrf.mxu0  ;;  %2232 = vmatpush.bf16.msra.mxu1 %v2222_v14 }
 0xb62   :  { %2233 = vmatpush.bf16.msra.mxu1 %v2221_v17  ;;  %v2363_v17 = vpack.c.bf16 %v1018_v16, %v1017_v15  ;;  %v1061_v15 = vld [vmem:[#allocation27 + $0x10] sm:$0xff]  ;;  %v1062_v16 = vld [vmem:[#allocation27 + $0x18] sm:$0xff] }
 0xb64   :  { %2373 = vmatpush.bf16.msrb.mxu0 %v2363_v17  ;;  %v2521_v17 = vpack.c.bf16 %v1062_v16, %v1061_v15  ;;  %v1087_v16 = vld [vmem:[#allocation39] sm:$0xff] }
 0xbd6   :  { %v2217_v5 = vpop.f32.mrf.mxu0 }
 0xbda   :  { %v2165_v7 = vpop.f32.mrf.mxu1 }
 0xbdb   :  { %v2169_v10 = vpack.c.bf16 %v2165_v7, %v2165_v7  ;;  %v1013_v7 = vld [vmem:[%s6236_s15 + $0x10] sm:$0xff] }
 0xbdd   :  { %v2171_v45 = vsel %vm1896_vm3, %v2169_v10, 0  ;;  %3418 = vmatmul.msk.bf16.vlgmr.msrb.gmra.mxu2 %vm1306_vm0, %v2169_v10  ;;  %v1014_v10 = vld [vmem:[%s6236_s15 + $0x18] sm:$0xff] }
 0xbde   :  { %2180 = vmatpush.bf16.msrb.mxu3 %v2171_v45  ;;  %v2219_v6 = vpop.f32.mrf.mxu0  ;;  %v2360_v45 = vpack.c.bf16 %v1014_v10, %v1013_v7  ;;  %v1123_v7 = vld [vmem:[#allocation54 + $0x10] sm:$0xff]  ;;  %v1124_v10 = vld [vmem:[#allocation54 + $0x18] sm:$0xff] }
 0xbdf   :  { %v1011_v6 = vld [vmem:[%s6236_s15] sm:$0xff] }
 0xbe0   :  { %2390 = vmatpush.bf16.msrb.mxu1 %v2360_v45 }
 0xbe1   :  { %3417 = vmatmul.msk.bf16.vlgmr.msrb.gmra.mxu3 %vm2018_vm5, %v1913_v63 }
 0xbe2   :  { %2334 = vmatpush.bf16.msra.mxu3 %v2288_v53  ;;  %v2167_v11 = vpop.f32.mrf.mxu1  ;;  %v5076_v53 = vmov 8.0  }
 0xbe3   :  { %3708 = vrcp.f32 %v5076_v53  ;;  %v1012_v11 = vld [vmem:[%s6236_s15 + $0x8] sm:$0xff] }
 0xbe4   :  { %v2359_v12 = vpack.c.bf16 %v1012_v11, %v1011_v6  ;;  %v2547_v6 = vpack.c.bf16 %v1124_v10, %v1123_v7  ;;  %v1098_v7 = vld [vmem:[%s6241_s0 + $0x8] sm:$0xff] }
 0xbe6   :  { %2391 = vmatpush.bf16.msrb.mxu1 %v2359_v12  ;;  %v1121_v12 = vld [vmem:[#allocation54] sm:$0xff] }
 0xbe9   :  { %v3709_v20 = vpop.eup %3708 }
 0xbea   :  { %v2297_v24 = vmul.f32 8.0, %v3709_v20  ;;  %vm2301_vm10 = vweird.f32 %v3709_v20 }
 0xbec   :  { %v2298_v58 = vsub.f32 1.0, %v2297_v24  ;;  %v1020_v24 = vld [vmem:[%s6238_s18] sm:$0xff] }
 0xbee   :  { %v2299_v38 = vmul.f32 %v3709_v20, %v2298_v58 }
 0xbf0   :  { %v2300_v34 = vadd.f32 %v3709_v20, %v2299_v38 }
 0xbf1   :  { %3421 = vmatmul.msk.bf16.vlgmr.msra.gmra.mxu3 %vm1388_vm1, %v5915_v26 }
 0xbf2   :  { %v2302_v37 = vsel %vm2301_vm10, %v3709_v20, %v2300_v34  ;;  %v1022_v20 = vld [vmem:[%s6238_s18 + $0x10] sm:$0xff] }
 0xc60   :  { %v2202_v18 = vpop.f32.mrf.mxu2 }
 0xc61   :  { %v2218_v21 = vadd.f32 %v2217_v5, %v2202_v18  ;;  %v1015_v18 = vld [vmem:[%s6237_s27] sm:$0xff] }
 0xc64   :  { %v2182_v23 = vpop.f32.mrf.mxu3 }
 0xc65   :  { %v2186_v19 = vpack.c.bf16 %v2182_v23, %v2182_v23  ;;  %v1016_v23 = vld [vmem:[%s6237_s27 + $0x8] sm:$0xff] }
 0xc67   :  { %3420 = vmatmul.msk.bf16.vlgmr.msra.gmra.mxu1 %vm1306_vm0, %v2186_v19  ;;  %v2362_v19 = vpack.c.bf16 %v1016_v23, %v1015_v18  ;;  %v1059_v18 = vld [vmem:[#allocation27] sm:$0xff]  ;;  %v1060_v23 = vld [vmem:[#allocation27 + $0x8] sm:$0xff] }
 0xc68   :  { %v2204_v9 = vpop.f32.mrf.mxu2 }
 0xc69   :  { %2374 = vmatpush.bf16.msrb.mxu0 %v2362_v19  ;;  %v2520_v19 = vpack.c.bf16 %v1060_v23, %v1059_v18 }
 0xc6c   :  { %v2184_v30 = vpop.f32.mrf.mxu3 }
 0xc74   :  { %v2336_v5 = vpop.f32.mrf.mxu3 }
 0xc7c   :  { %v2338_v13 = vpop.f32.mrf.mxu3 }
 0xc7d   :  { %v2358_v14 = vpack.c.bf16 %v2338_v13, %v2336_v5  ;;  %v1122_v13 = vld [vmem:[#allocation54 + $0x8] sm:$0xff] }
 0xc7f   :  { %3424 = vmatmul.msk.bf16.vlgmr.msrb.gmra.mxu1 %vm1306_vm0, %v2358_v14  ;;  %v2546_v14 = vpack.c.bf16 %v1122_v13, %v1121_v12  ;;  %v1089_v13 = vld [vmem:[#allocation39 + $0x10] sm:$0xff] }
 0xce4   :  { %v2235_v1 = vpop.f32.mrf.mxu1 }
 0xce5   :  { %v2239_v25 = vadd.f32 %v2235_v1, %v2218_v21  ;;  %v1023_v21 = vld [vmem:[%s6238_s18 + $0x18] sm:$0xff]  ;;  %v1021_v1 = vld [vmem:[%s6238_s18 + $0x8] sm:$0xff] }
 0xce7   :  { %v2243_v27 = vadd.f32 %v3690_v59, %v2239_v25  ;;  %v2407_v59 = vpack.c.bf16 %v1023_v21, %v1022_v20  ;;  %v2406_v25 = vpack.c.bf16 %v1021_v1, %v1020_v24  ;;  %v3693_v20 = vld [vmem:[#allocation56] ss:$0 sm:$0xff]  ;;  %v1118_v1 = vld [vmem:[#allocation51 + $0x10] sm:$0xff] }
 0xce9   :  { %v2289_v28 = vsel %vm1306_vm0, %v2243_v27, 0.0  ;;  %2420 = vmatpush.bf16.msrb.mxu3 %v2407_v59 }
 0xcea   :  { %v2290_v29 = vrot.slane %v2289_v28, 4 }
 0xcec   :  { %v2291_v39 = vadd.f32 %v2290_v29, %v2289_v28  ;;  %v2237_v31 = vpop.f32.mrf.mxu1  ;;  %v3691_v29 = vld [vmem:[#allocation18] ss:$0 sm:$0xff] }
 0xced   :  { %2421 = vmatpush.bf16.msrb.mxu3 %v2406_v25  ;;  %v1119_v25 = vld [vmem:[#allocation51 + $0x18] sm:$0xff] }
 0xcee   :  { %v2292_v32 = vrot.slane %v2291_v39, 2 }
 0xcf0   :  { %v2293_v35 = vadd.f32 %v2292_v32, %v2291_v39 }
 0xcf2   :  { %v2294_v36 = vrot.slane %v2293_v35, 1 }
 0xcf4   :  { %v2295_v40 = vadd.f32 %v2294_v36, %v2293_v35 }
 0xcf6   :  { %v2303_v41 = vmul.f32 %v2302_v37, %v2295_v40 }
 0xcf8   :  { %v2304_v42 = vsub.f32 %v2243_v27, %v2303_v41  ;;  %v3692_v41 = vld [vmem:[#allocation20] ss:$0 sm:$0xff] }
 0xcfa   :  { %v2305_v43 = vmul.f32 %v2304_v42, %v2304_v42 }
 0xcfc   :  { %v2306_v44 = vsel %vm1306_vm0, %v2305_v43, 0.0  ;;  %v2393_v27 = vpop.f32.mrf.mxu1 }
 0xcfd   :  { %v2307_v46 = vrot.slane %v2306_v44, 4 }
 0xcff   :  { %v2308_v48 = vadd.f32 %v2307_v46, %v2306_v44 }
 0xd01   :  { %v2309_v49 = vrot.slane %v2308_v48, 2 }
 0xd03   :  { %v2310_v50 = vadd.f32 %v2309_v49, %v2308_v48  ;;  %v3506_v48 = vld [vmem:[%s6239_s29] sm:$0xff] }
 0xd04   :  { %v2395_v38 = vpop.f32.mrf.mxu1  ;;  %v1053_v49 = vld [vmem:[#allocation24 + $0x10] sm:$0xff] }
 0xd05   :  { %v2311_v51 = vrot.slane %v2310_v50, 1 }
 0xd07   :  { %v2312_v52 = vadd.f32 %v2311_v51, %v2310_v50  ;;  %v1054_v50 = vld [vmem:[#allocation24 + $0x18] sm:$0xff] }
 0xd08   :  { %v2483_v51 = vpack.c.bf16 %v1054_v50, %v1053_v49  ;;  %v1092_v50 = vld [vmem:[%s6240_s14] sm:$0xff] }
 0xd09   :  { %v2313_v54 = vmul.f32 %v2312_v52, %v2302_v37  ;;  %v1051_v52 = vld [vmem:[#allocation24] sm:$0xff] }
 0xd0b   :  { %v2314_v55 = vadd.f32 1e-05, %v2313_v54  ;;  %v1052_v54 = vld [vmem:[#allocation24 + $0x8] sm:$0xff] }
 0xd0d   :  { %3710 = vrsqrt.f32 %v2314_v55  ;;  %vm2321_vm12 = vweird.f32 %v2314_v55 }
 0xd13   :  { %v3711_v56 = vpop.eup %3710 }
 0xd14   :  { %v2316_v57 = vmul.f32 %v3711_v56, %v2314_v55  ;;  %vm2322_vm11 = vweird.f32 %v3711_v56  ;;  %v2482_v55 = vpack.c.bf16 %v1052_v54, %v1051_v52 }
 0xd15   :  { %vm2323_vm13 = vmor %vm2321_vm12, %vm2322_vm11 }
 0xd16   :  { %v2317_v60 = vmul.f32 %v3711_v56, %v2316_v57 }
 0xd18   :  { %v2318_v61 = vmul.f32 0.5, %v2317_v60 }
 0xd1a   :  { %v2319_v62 = vsub.f32 1.5, %v2318_v61  ;;  %v1057_v61 = vld [vmem:[#allocation26 + $0x10] sm:$0xff] }
 0xd1c   :  { %v2320_v63 = vmul.f32 %v3711_v56, %v2319_v62  ;;  %v1058_v62 = vld [vmem:[#allocation26 + $0x18] sm:$0xff] }
 0xd1e   :  { %v2324_v0 = vsel %vm2323_vm13, %v3711_v56, %v2320_v63  ;;  %v2485_v63 = vpack.c.bf16 %v1058_v62, %v1057_v61  ;;  %v1084_v61 = vld [vmem:[#allocation38 + $0x8] sm:$0xff] }
 0xd1f   :  { %v2325_v2 = vmul.f32 %v2324_v0, %v2304_v42  ;;  %v1055_v0 = vld [vmem:[#allocation26] sm:$0xff] }
 0xd20   :  { %2495 = vmatpush.bf16.msra.mxu3 %v2485_v63 }
 0xd21   :  { %v5967_v3 = vpack.c.bf16 %v2325_v2, %v2325_v2  ;;  %v1056_v2 = vld [vmem:[#allocation26 + $0x8] sm:$0xff] }
 0xd23   :  { %v2342_v4 = vsel %vm1896_vm3, %v5967_v3, 0 }
 0xd24   :  { %2351 = vmatpush.bf16.msra.mxu2 %v2342_v4  ;;  %v2484_v4 = vpack.c.bf16 %v1056_v2, %v1055_v0 }
 0xd26   :  { %2496 = vmatpush.bf16.msra.mxu3 %v2484_v4  ;;  %v3695_v4 = vld [vmem:[#allocation53] ss:$0 sm:$0xff] }
 0xd27   :  { %3422 = vmatmul.msk.bf16.vlgmr.msra.gmra.mxu2 %vm2018_vm5, %v5908_v8 }
 0xdaa   :  { %v2353_v9 = vpop.f32.mrf.mxu2 }
 0xdb2   :  { %v2355_v30 = vpop.f32.mrf.mxu2 }
 0xdb3   :  { %v2361_v53 = vpack.c.bf16 %v2355_v30, %v2353_v9 }
 0xdb5   :  { %3423 = vmatmul.msk.bf16.vlgmr.msrb.gmra.mxu0 %vm1306_vm0, %v2361_v53 }
 0xe32   :  { %v2376_v58 = vpop.f32.mrf.mxu0 }
 0xe33   :  { %v2394_v28 = vadd.f32 %v2393_v27, %v2376_v58  ;;  %v2568_v27 = vpack.c.bf16 %v1119_v25, %v1118_v1  ;;  %v1116_v58 = vld [vmem:[#allocation51] sm:$0xff] }
 0xe35   :  { %v2401_v31 = vadd.f32 %v3691_v29, %v2394_v28  ;;  %v1117_v28 = vld [vmem:[#allocation51 + $0x8] sm:$0xff] }
 0xe37   :  { %v2403_v35 = vmax.f32 %v2401_v31, 0.0 }
 0xe3a   :  { %v2378_v39 = vpop.f32.mrf.mxu0 }
 0xe3b   :  { %v2396_v32 = vadd.f32 %v2395_v38, %v2378_v39 }
 0xe3d   :  { %v2402_v34 = vadd.f32 %v3691_v29, %v2396_v32  ;;  %v2567_v29 = vpack.c.bf16 %v1117_v28, %v1116_v58  ;;  %v3697_v28 = vld [vmem:[#allocation42] ss:$0 sm:$0xff] }
 0xe3f   :  { %v2404_v36 = vmax.f32 %v2402_v34, 0.0 }
 0xe41   :  { %v2405_v37 = vpack.c.bf16 %v2404_v36, %v2403_v35 }
 0xe43   :  { %3425 = vmatmul.msk.bf16.vlgmr.msrb.gmra.mxu3 %vm1306_vm0, %v2405_v37  ;;  %v3694_v37 = vld [vmem:[#allocation29] ss:$0 sm:$0xff] }
 0xe44   :  { %2581 = vmatpush.bf16.msrb.mxu3 %v2568_v27 }
 0xe48   :  { %2582 = vmatpush.bf16.msrb.mxu3 %v2567_v29 }
 0xec6   :  { %v2423_v40 = vpop.f32.mrf.mxu3 }
 0xec7   :  { %v2424_v43 = vadd.f32 %v3692_v41, %v2423_v40 }
 0xece   :  { %v2425_v42 = vpop.f32.mrf.mxu3 }
 0xecf   :  { %v2426_v44 = vadd.f32 %v3692_v41, %v2425_v42 }
 0xed1   :  { %v2428_v46 = vpack.c.bf16 %v2426_v44, %v2424_v43 }
 0xed3   :  { %2444 = vmatpush.bf16.msrb.mxu2 %v2428_v46  ;;  %v1094_v46 = vld [vmem:[%s6240_s14 + $0x10] sm:$0xff] }
 0xed6   :  { %3430 = vmatmul.msk.bf16.vlgmr.msrb.gmra.mxu2 %vm1388_vm1, %v3506_v48  ;;  %v1095_v48 = vld [vmem:[%s6240_s14 + $0x18] sm:$0xff] }
 0xed7   :  { %2512 = vmatpush.bf16.msra.mxu2 %v2483_v51  ;;  %v2671_v49 = vpack.c.bf16 %v1095_v48, %v1094_v46  ;;  %v1093_v51 = vld [vmem:[%s6240_s14 + $0x8] sm:$0xff] }
 0xed8   :  { %v2670_v52 = vpack.c.bf16 %v1093_v51, %v1092_v50  ;;  %v3499_v50 = vld [vmem:[#allocation11] sm:$0xff]  ;;  %v3497_v51 = vld [vmem:[#allocation9 + $0x8] sm:$0xff] }
 0xedb   :  { %2513 = vmatpush.bf16.msra.mxu2 %v2482_v55  ;;  %v1085_v55 = vld [vmem:[#allocation38 + $0x10] sm:$0xff] }
 0xf59   :  { %v2446_v56 = vpop.f32.mrf.mxu2 }
 0xf61   :  { %v2448_v57 = vpop.f32.mrf.mxu2 }
 0xf62   :  { %v2451_v60 = vpack.c.bf16 %v2448_v57, %v2446_v56  ;;  %v1086_v56 = vld [vmem:[#allocation38 + $0x18] sm:$0xff]  ;;  %v1083_v57 = vld [vmem:[#allocation38] sm:$0xff] }
 0xf63   :  { %v2623_v62 = vpack.c.bf16 %v1084_v61, %v1083_v57  ;;  %v3498_v57 = vld [vmem:[#allocation9 + $0x10] sm:$0xff]  ;;  %v3501_v61 = vld [vmem:[#allocation11 + $0x10] sm:$0xff] }
 0xf64   :  { %2459 = vmatpush.bf16.msra.mxu0 %v2451_v60  ;;  %3434 = vmatmul.msk.bf16.vlgmr.msra.gmra.mxu2 %vm1306_vm0, %v2451_v60  ;;  %v2624_v60 = vpack.c.bf16 %v1086_v56, %v1085_v55 }
 0xf67   :  { %3431 = vmatmul.msk.bf16.vlgmr.msra.gmra.mxu0 %vm1388_vm1, %v5872_v33 }
 0xf68   :  { %2531 = vmatpush.bf16.msrb.mxu0 %v2521_v17  ;;  %v1088_v17 = vld [vmem:[#allocation39 + $0x8] sm:$0xff] }
 0xf69   :  { %v2626_v18 = vpack.c.bf16 %v1088_v17, %v1087_v16 }
 0xf6c   :  { %2532 = vmatpush.bf16.msrb.mxu0 %v2520_v19 }
 0xfe4   :  { %v2461_v5 = vpop.f32.mrf.mxu0 }
 0xfe7   :  { %v2515_v39 = vpop.f32.mrf.mxu2 }
 0xfec   :  { %v2463_v45 = vpop.f32.mrf.mxu0 }
 0xfed   :  { %v2466_v11 = vpack.c.bf16 %v2463_v45, %v2461_v5  ;;  %v1097_v5 = vld [vmem:[%s6241_s0] sm:$0xff] }
 0xfef   :  { %2474 = vmatpush.bf16.msra.mxu1 %v2466_v11  ;;  %3433 = vmatmul.msk.bf16.vlgmr.msra.gmra.mxu3 %vm1306_vm0, %v2466_v11  ;;  %v2517_v35 = vpop.f32.mrf.mxu2  ;;  %v2695_v11 = vpack.c.bf16 %v1098_v7, %v1097_v5  ;;  %v1071_v5 = vld [vmem:[#allocation32 + $0x18] sm:$0xff] }
 0xff0   :  { %2654 = vmatpush.bf16.msra.mxu3 %v2624_v60 }
 0xff2   :  { %3432 = vmatmul.msk.bf16.vlgmr.msra.gmra.mxu1 %vm1388_vm1, %v5872_v33 }
 0xff3   :  { %2559 = vmatpush.bf16.msrb.mxu1 %v2547_v6 }
 0xff4   :  { %2655 = vmatpush.bf16.msra.mxu3 %v2623_v62 }
 0xff7   :  { %2560 = vmatpush.bf16.msrb.mxu1 %v2546_v14  ;;  %v1090_v14 = vld [vmem:[#allocation39 + $0x18] sm:$0xff] }
 0xff8   :  { %v2627_v15 = vpack.c.bf16 %v1090_v14, %v1089_v13 }
 0xffb   :  { %2637 = vmatpush.bf16.msra.mxu1 %v2627_v15  ;;  %v3524_v15 = vld [vmem:[#allocation15] sm:$0xff]  }
 0xffc   :  { %v3525_v17 = vunpack.c.l.bf16 %v3524_v15 }
 0xfff   :  { %2638 = vmatpush.bf16.msra.mxu1 %v2626_v18 }
0x1002   :  { %3436 = vmatmul.msk.bf16.vlgmr.msrb.gmra.mxu1 %vm1306_vm0, %v5967_v3 }
0x106f   :  { %v2476_v9 = vpop.f32.mrf.mxu1 }
0x1072   :  { %v2498_v38 = vpop.f32.mrf.mxu3 }
0x1073   :  { %v2516_v34 = vadd.f32 %v2515_v39, %v2498_v38 }
0x1077   :  { %v2478_v30 = vpop.f32.mrf.mxu1 }
0x1078   :  { %v2481_v53 = vpack.c.bf16 %v2478_v30, %v2476_v9 }
0x107a   :  { %3435 = vmatmul.msk.bf16.vlgmr.msrb.gmra.mxu0 %vm1306_vm0, %v2481_v53  ;;  %v2500_v32 = vpop.f32.mrf.mxu3 }
0x107b   :  { %v2518_v36 = vadd.f32 %v2517_v35, %v2500_v32  ;;  %v1100_v35 = vld [vmem:[%s6242_s17] sm:$0xff] }
0x107f   :  { %v2562_v21 = vpop.f32.mrf.mxu1 }
0x1080   :  { %v2563_v33 = vadd.f32 %v3693_v20, %v2562_v21  ;;  %v3696_v21 = vld [vmem:[#allocation41] ss:$0 sm:$0xff] }
0x1082   :  { %v2590_v59 = vpack.c.bf16 %v2563_v33, %v2563_v33 }
0x1084   :  { %v2592_v24 = vsel %vm1896_vm3, %v2590_v59, 0 }
0x1085   :  { %2601 = vmatpush.bf16.msrb.mxu2 %v2592_v24 }
0x1087   :  { %v2564_v3 = vpop.f32.mrf.mxu1 }
0x1088   :  { %3438 = vmatmul.msk.bf16.vlgmr.msrb.gmra.mxu2 %vm2018_vm5, %v5908_v8 }
0x1089   :  { %2684 = vmatpush.bf16.msra.mxu2 %v2671_v49  ;;  %v3496_v49 = vld [vmem:[#allocation9] sm:$0xff] }
0x108d   :  { %2685 = vmatpush.bf16.msra.mxu2 %v2670_v52  ;;  %v3500_v52 = vld [vmem:[#allocation11 + $0x8] sm:$0xff] }
0x10f7   :  { %v2534_v31 = vpop.f32.mrf.mxu0 }
0x10f8   :  { %v2539_v8 = vadd.f32 %v2534_v31, %v2516_v34 }
0x10fa   :  { %v2544_v42 = vadd.f32 %v3694_v37, %v2539_v8 }
0x10ff   :  { %v2536_v40 = vpop.f32.mrf.mxu0 }
0x1100   :  { %v2540_v41 = vadd.f32 %v2536_v40, %v2518_v36  ;;  %v2719_v36 = vpack.c.bf16 %v1100_v35, %v1100_v35  ;;  %v3698_v40 = vld [vmem:[#allocation44] ss:$0 sm:$0xff] }
0x1102   :  { %v2545_v43 = vadd.f32 %v3694_v37, %v2540_v41  ;;  %v2727_v8 = vsel %vm1896_vm3, %v2719_v36, 0 }
0x1103   :  { %2736 = vmatpush.bf16.msrb.mxu1 %v2727_v8 }
0x1104   :  { %v2566_v44 = vpack.c.bf16 %v2545_v43, %v2544_v42 }
0x1106   :  { %3437 = vmatmul.msk.bf16.vlgmr.msrb.gmra.mxu3 %vm1306_vm0, %v2566_v44 }
0x110b   :  { %v2603_v54 = vpop.f32.mrf.mxu2 }
0x1113   :  { %v2605_v63 = vpop.f32.mrf.mxu2 }
0x1114   :  { %v2622_v0 = vpack.c.bf16 %v2605_v63, %v2603_v54  ;;  %v3699_v54 = vld [vmem:[#allocation3] ss:$0 sm:$0xff] }
0x1116   :  { %3441 = vmatmul.msk.bf16.vlgmr.msra.gmra.mxu3 %vm1306_vm0, %v2622_v0 }
0x1189   :  { %v2584_v2 = vpop.f32.mrf.mxu3 }
0x118a   :  { %v2585_v45 = vadd.f32 %v3695_v4, %v2584_v2 }
0x1191   :  { %v2586_v10 = vpop.f32.mrf.mxu3 }
0x1192   :  { %v2587_v6 = vadd.f32 %v3695_v4, %v2586_v10  ;;  %v1070_v4 = vld [vmem:[#allocation32 + $0x10] sm:$0xff]  ;;  %v1068_v10 = vld [vmem:[#allocation32] sm:$0xff] }
0x1193   :  { %v2909_v7 = vpack.c.bf16 %v1071_v5, %v1070_v4 }
0x1194   :  { %v2589_v12 = vpack.c.bf16 %v2587_v6, %v2585_v45  ;;  %v1069_v45 = vld [vmem:[#allocation32 + $0x8] sm:$0xff] }
0x1195   :  { %v2908_v6 = vpack.c.bf16 %v1069_v45, %v1068_v10 }
0x1196   :  { %2615 = vmatpush.bf16.msra.mxu0 %v2589_v12  ;;  %2835 = vmatpush.bf16.msrb.mxu2 %v2589_v12 }
0x1199   :  { %3439 = vmatmul.msk.bf16.vlgmr.msra.gmra.mxu0 %vm1388_vm1, %v5915_v26  ;;  %v2657_v30 = vpop.f32.mrf.mxu3 }
0x119a   :  { %2709 = vmatpush.bf16.msrb.mxu0 %v2695_v11 }
0x119e   :  { %2883 = vmatpush.bf16.msra.mxu0 %v2589_v12 }
0x11a1   :  { %v2659_v33 = vpop.f32.mrf.mxu3 }
0x1216   :  { %v2617_v23 = vpop.f32.mrf.mxu0 }
0x121e   :  { %v2619_v19 = vpop.f32.mrf.mxu0 }
0x121f   :  { %v2625_v9 = vpack.c.bf16 %v2619_v19, %v2617_v23 }
0x1221   :  { %3440 = vmatmul.msk.bf16.vlgmr.msra.gmra.mxu1 %vm1306_vm0, %v2625_v9  ;;  %v3526_v9 = vunpack.c.h.bf16 %v3524_v15 }
0x1222   :  { %2925 = vmatpush.bf16.msra.mxu1 %v2909_v7 }
0x1226   :  { %2926 = vmatpush.bf16.msra.mxu1 %v2908_v6 }
0x129e   :  { %v2640_v53 = vpop.f32.mrf.mxu1 }
0x129f   :  { %v2658_v20 = vadd.f32 %v2657_v30, %v2640_v53 }
0x12a1   :  { %v2665_v59 = vadd.f32 %v3696_v21, %v2658_v20 }
0x12a3   :  { %v2667_v1 = vmax.f32 %v2665_v59, 0.0 }
0x12a6   :  { %v2642_v26 = vpop.f32.mrf.mxu1 }
0x12a7   :  { %v2660_v24 = vadd.f32 %v2659_v33, %v2642_v26  ;;  %v1067_v33 = vld [vmem:[#allocation30 + $0x18] sm:$0xff] }
0x12a9   :  { %v2666_v3 = vadd.f32 %v3696_v21, %v2660_v24  ;;  %v1066_v21 = vld [vmem:[#allocation30 + $0x10] sm:$0xff] }
0x12ab   :  { %v2668_v25 = vmax.f32 %v2666_v3, 0.0  ;;  %v2904_v3 = vpack.c.bf16 %v1067_v33, %v1066_v21 }
0x12ad   :  { %v2669_v27 = vpack.c.bf16 %v2668_v25, %v2667_v1  ;;  %v1064_v25 = vld [vmem:[#allocation30] sm:$0xff] }
0x12af   :  { %3442 = vmatmul.msk.bf16.vlgmr.msra.gmra.mxu2 %vm1306_vm0, %v2669_v27  ;;  %v1065_v27 = vld [vmem:[#allocation30 + $0x8] sm:$0xff] }
0x12bf   :  { %3458 = vmatmul.msk.bf16.vlgmr.msrb.gmra.mxu2 %vm1388_vm1, %v3496_v49 }
0x12cf   :  { %3459 = vmatmul.msk.bf16.gmra.mxu2 %vm1388_vm1, %v3497_v51 }
0x12df   :  { %3460 = vmatmul.msk.bf16.gmra.mxu2 %vm1388_vm1, %v3498_v57 }
0x1332   :  { %v2687_v58 = vpop.f32.mrf.mxu2 }
0x1333   :  { %v2688_v29 = vadd.f32 %v3697_v28, %v2687_v58 }
0x1335   :  { %v2692_v31 = vmax.f32 %v2688_v29, 0.0 }
0x133a   :  { %v2689_v38 = vpop.f32.mrf.mxu2 }
0x133b   :  { %v2690_v39 = vadd.f32 %v3697_v28, %v2689_v38  ;;  %v2903_v28 = vpack.c.bf16 %v1065_v27, %v1064_v25 }
0x133d   :  { %v2693_v32 = vmax.f32 %v2690_v39, 0.0 }
0x133f   :  { %v2694_v34 = vpack.c.bf16 %v2693_v32, %v2692_v31 }
0x1341   :  { %3443 = vmatmul.msk.bf16.vlgmr.msrb.gmra.mxu0 %vm1388_vm1, %v2694_v34 }
0x1342   :  { %v2837_v24 = vpop.f32.mrf.mxu2 }
0x134a   :  { %v2839_v29 = vpop.f32.mrf.mxu2 }
0x134b   :  { %v2900_v32 = vpack.c.bf16 %v2839_v29, %v2837_v24 }
0x1351   :  { %3473 = vmatmul.msk.bf16.vlgmr.msra.gmra.mxu0 %vm1388_vm1, %v3499_v50 }
0x1352   :  { %v2842_v31 = vpop.f32.mrf.mxu2 }
0x135a   :  { %v2844_v34 = vpop.f32.mrf.mxu2 }
0x135b   :  { %v2901_v35 = vpack.c.bf16 %v2844_v34, %v2842_v31 }
0x1361   :  { %3474 = vmatmul.msk.bf16.gmra.mxu0 %vm1388_vm1, %v3500_v52 }
0x1362   :  { %v2847_v36 = vpop.f32.mrf.mxu2 }
0x1371   :  { %3475 = vmatmul.msk.bf16.gmra.mxu0 %vm1388_vm1, %v3501_v61 }
0x13be   :  { %v2711_v37 = vpop.f32.mrf.mxu0 }
0x13bf   :  { %v2712_v41 = vadd.f32 %v3698_v40, %v2711_v37  ;;  %v1075_v37 = vld [vmem:[%s6243_s13 + $0x10] sm:$0xff] }
0x13c1   :  { %v2716_v44 = vmax.f32 %v2712_v41, 0.0 }
0x13c6   :  { %v2713_v42 = vpop.f32.mrf.mxu0 }
0x13c7   :  { %v2714_v43 = vadd.f32 %v3698_v40, %v2713_v42  ;;  %v1076_v40 = vld [vmem:[%s6243_s13 + $0x18] sm:$0xff]  ;;  %v1073_v42 = vld [vmem:[%s6243_s13] sm:$0xff] }
0x13c8   :  { %v2995_v41 = vpack.c.bf16 %v1076_v40, %v1075_v37  ;;  %v3701_v37 = vld [vmem:[#allocation35] ss:$0 sm:$0xff] }
0x13c9   :  { %v2717_v46 = vmax.f32 %v2714_v43, 0.0  ;;  %v1074_v43 = vld [vmem:[%s6243_s13 + $0x8] sm:$0xff] }
0x13ca   :  { %3014 = vmatpush.bf16.msra.mxu2 %v2995_v41 }
0x13cb   :  { %v2718_v48 = vpack.c.bf16 %v2717_v46, %v2716_v44  ;;  %v2994_v44 = vpack.c.bf16 %v1074_v43, %v1073_v42 }
0x13cd   :  { %3444 = vmatmul.msk.bf16.vlgmr.msrb.gmra.mxu1 %vm2018_vm5, %v2718_v48 }
0x13ce   :  { %v2885_v2 = vpop.f32.mrf.mxu0  ;;  %3015 = vmatpush.bf16.msra.mxu2 %v2994_v44 }
0x13d6   :  { %v2887_v11 = vpop.f32.mrf.mxu0 }
0x13d7   :  { %v2905_v12 = vpack.c.bf16 %v2887_v11, %v2885_v2 }
0x13dd   :  { %3476 = vmatmul.msk.bf16.vlgmr.msra.gmra.mxu1 %vm1306_vm0, %v2905_v12 }
0x13de   :  { %v2890_v13 = vpop.f32.mrf.mxu0 }
0x13e6   :  { %v2892_v23 = vpop.f32.mrf.mxu0 }
0x13e7   :  { %v2906_v53 = vpack.c.bf16 %v2892_v23, %v2890_v13 }
0x13ed   :  { %3477 = vmatmul.msk.bf16.gmra.mxu1 %vm1306_vm0, %v2906_v53 }
0x13ee   :  { %v2895_v58 = vpop.f32.mrf.mxu0 }
0x13f6   :  { %v2897_v38 = vpop.f32.mrf.mxu0 }
0x13f7   :  { %v2907_v39 = vpack.c.bf16 %v2897_v38, %v2895_v58 }
0x13fd   :  { %3478 = vmatmul.msk.bf16.gmra.mxu1 %vm1306_vm0, %v2907_v39 }
0x144a   :  { %v2738_v55 = vpop.f32.mrf.mxu1 }
0x144b   :  { %v2739_v56 = vadd.f32 %v3699_v54, %v2738_v55 }
0x144d   :  { %v2743_v60 = vpack.c.bf16 %v2739_v56, %v2739_v56 }
0x144f   :  { %2747 = vperm.xlu2 %3674, %v2743_v60  }
0x1452   :  { %v2740_v62 = vpop.f32.mrf.mxu1 }
0x1453   :  { %v2741_v63 = vadd.f32 %v3699_v54, %v2740_v62 }
0x1455   :  { %v2744_v0 = vpack.c.bf16 %v2741_v63, %v2741_v63 }
0x1457   :  { %2756 = vperm.xlu0 %3675, %v2744_v0   ;;  %v3700_v0 = vld [vmem:[#allocation33] ss:$0 sm:$0xff] }
0x145a   :  { %v2928_v51 = vpop.f32.mrf.mxu1 }
0x1462   :  { %v2930_v60 = vpop.f32.mrf.mxu1 }
0x146a   :  { %v2933_v12 = vpop.f32.mrf.mxu1 }
0x14a9   :  { %v2748_v14 = vpop.permute.xlu2 %2747 }
0x14aa   :  { %v2753_v16 = vperm.slane %v2748_v14, %v5859_v22 }
0x14ac   :  { %v2763_v19 = vunpack.c.l.bf16 %v2753_v16 }
0x14ae   :  { %v2767_v26 = vmul.f32 %v3525_v17, %v2763_v19 }
0x14c9   :  { %v2757_v18 = vpop.permute.xlu0 %2756 }
0x14ca   :  { %v2762_v30 = vperm.slane %v2757_v18, %v5859_v22 }
0x14cc   :  { %v2764_v20 = vunpack.c.l.bf16 %v2762_v30  ;;  %v2935_v30 = vpop.f32.mrf.mxu1 }
0x14ce   :  { %v2768_v59 = vmul.f32 %v3526_v9, %v2764_v20 }
0x14d0   :  { %v2769_v1 = vpack.c.bf16 %v2768_v59, %v2767_v26 }
0x14d2   :  { %2777 = vmatpush.bf16.msrb.mxu3 %v2769_v1 }
0x14d5   :  { %3445 = vmatmul.msk.bf16.vlgmr.msrb.gmra.mxu3 %vm1388_vm1, %v5935_v47  ;;  %v2849_v47 = vpop.f32.mrf.mxu2 }
0x14d6   :  { %2958 = vmatpush.bf16.msra.mxu3 %v2904_v3  ;;  %v2902_v8 = vpack.c.bf16 %v2849_v47, %v2847_v36  ;;  %v2938_v3 = vpop.f32.mrf.mxu1  ;;  %v1079_v36 = vld [vmem:[%s6244_s3 + $0x8] sm:$0xff] }
0x14da   :  { %2959 = vmatpush.bf16.msra.mxu3 %v2903_v28 }
0x14de   :  { %v2940_v58 = vpop.f32.mrf.mxu1 }
0x14e5   :  { %3479 = vmatmul.msk.bf16.vlgmr.msra.gmra.mxu3 %vm1306_vm0, %v2900_v32 }
0x14f5   :  { %3480 = vmatmul.msk.bf16.gmra.mxu3 %vm1306_vm0, %v2901_v35  ;;  %v1078_v35 = vld [vmem:[%s6244_s3] sm:$0xff] }
0x14f6   :  { %v3041_v47 = vpack.c.bf16 %v1079_v36, %v1078_v35 }
0x14f8   :  { %3061 = vmatpush.bf16.msrb.mxu0 %v3041_v47 }
0x1505   :  { %3481 = vmatmul.msk.bf16.gmra.mxu3 %vm1306_vm0, %v2902_v8 }
0x1558   :  { %v2779_v46 = vpop.f32.mrf.mxu3 }
0x1559   :  { %v2783_v48 = vrot.slane %v2779_v46, 4 }
0x155b   :  { %v2784_v49 = vadd.f32 %v2783_v48, %v2779_v46 }
0x155d   :  { %v2785_v50 = vrot.slane %v2784_v49, 2 }
0x155f   :  { %v2786_v52 = vadd.f32 %v2785_v50, %v2784_v49 }
0x1560   :  { %v2781_v54 = vpop.f32.mrf.mxu3 }
0x1561   :  { %v2787_v55 = vrot.slane %v2786_v52, 1 }
0x1563   :  { %v2788_v56 = vadd.f32 %v2787_v55, %v2786_v52 }
0x1565   :  { %3712 = vrcp.f32 %v2788_v56  ;;  %v2800_v4 = vand.u32 2147483648, %v2788_v56  ;;  %v2798_v7 = vand.u32 2147483647, %v2788_v56  ;;  %vm2794_vm15 = vweird.f32 %v2788_v56 }
0x1567   :  { %v2801_v13 = vor.u32 1.1754944e-38, %v2800_v4  ;;  %vm2799_vm6 = vcmp.eq.f32.partialorder %v2798_v7, 8.507059e+37 }
0x1568   :  { %v2961_v57 = vpop.f32.mrf.mxu3 }
0x1569   :  { %v2962_v63 = vadd.f32 %v2961_v57, %v2928_v51 }
0x156b   :  { %v3713_v61 = vpop.eup %3712  ;;  %v2979_v45 = vadd.f32 %v3700_v0, %v2962_v63 }
0x156c   :  { %v2790_v62 = vmul.f32 %v3713_v61, %v2788_v56  ;;  %vm2795_vm14 = vweird.f32 %v3713_v61 }
0x156d   :  { %vm2796_vm4 = vmor %vm2794_vm15, %vm2795_vm14  ;;  %v2985_v17 = vmax.f32 %v2979_v45, 0.0 }
0x156e   :  { %v2791_v2 = vsub.f32 1.0, %v2790_v62 }
0x1570   :  { %v2792_v5 = vmul.f32 %v3713_v61, %v2791_v2  ;;  %v2963_v10 = vpop.f32.mrf.mxu3  ;;  %v1081_v2 = vld [vmem:[%s6245_s5] sm:$0xff] }
0x1571   :  { %v2964_v6 = vadd.f32 %v2963_v10, %v2930_v60  ;;  %v3087_v4 = vpack.c.bf16 %v1081_v2, %v1081_v2  ;;  %v3702_v10 = vld [vmem:[#allocation36] ss:$0 sm:$0xff] }
0x1572   :  { %v2793_v11 = vadd.f32 %v3713_v61, %v2792_v5 }
0x1573   :  { %v2980_v14 = vadd.f32 %v3700_v0, %v2964_v6  ;;  %v3101_v5 = vsel %vm1896_vm3, %v3087_v4, 0 }
0x1574   :  { %v2797_v15 = vsel %vm2796_vm4, %v3713_v61, %v2793_v11  ;;  %3110 = vmatpush.bf16.msrb.mxu1 %v3101_v5 }
0x1575   :  { %v2802_v16 = vsel %vm2799_vm6, %v2801_v13, %v2797_v15  ;;  %v2986_v18 = vmax.f32 %v2980_v14, 0.0 }
0x1576   :  { %v2803_v23 = vmul.f32 %v2802_v16, %v2779_v46 }
0x1577   :  { %v2991_v19 = vpack.c.bf16 %v2986_v18, %v2985_v17 }
0x1578   :  { %3232 = vst [vmem:[#allocation79] sm:$0xff] %v2803_v23  ;;  %v2966_v9 = vpop.f32.mrf.mxu3 }
0x1579   :  { %3482 = vmatmul.msk.bf16.vlgmr.msra.gmra.mxu2 %vm1306_vm0, %v2991_v19  ;;  %v2967_v53 = vadd.f32 %v2966_v9, %v2933_v12 }
0x157b   :  { %v2981_v21 = vadd.f32 %v3700_v0, %v2967_v53 }
0x157d   :  { %v2987_v59 = vmax.f32 %v2981_v21, 0.0 }
0x1580   :  { %v2968_v20 = vpop.f32.mrf.mxu3 }
0x1581   :  { %v2969_v33 = vadd.f32 %v2968_v20, %v2935_v30 }
0x1583   :  { %v2982_v26 = vadd.f32 %v3700_v0, %v2969_v33 }
0x1585   :  { %v2988_v24 = vmax.f32 %v2982_v26, 0.0 }
0x1587   :  { %v2992_v1 = vpack.c.bf16 %v2988_v24, %v2987_v59 }
0x1588   :  { %v2971_v25 = vpop.f32.mrf.mxu3 }
0x1589   :  { %3483 = vmatmul.msk.bf16.gmra.mxu2 %vm1306_vm0, %v2992_v1  ;;  %v2972_v27 = vadd.f32 %v2971_v25, %v2938_v3  ;;  %v3703_v1 = vld [vmem:[#allocation2] ss:$0 sm:$0xff] }
0x158b   :  { %v2983_v29 = vadd.f32 %v3700_v0, %v2972_v27 }
0x158d   :  { %v2989_v31 = vmax.f32 %v2983_v29, 0.0 }
0x1590   :  { %v2973_v28 = vpop.f32.mrf.mxu3 }
0x1591   :  { %v2974_v38 = vadd.f32 %v2973_v28, %v2940_v58 }
0x1593   :  { %v2984_v39 = vadd.f32 %v3700_v0, %v2974_v38 }
0x1595   :  { %v2990_v32 = vmax.f32 %v2984_v39, 0.0 }
0x1597   :  { %v2993_v34 = vpack.c.bf16 %v2990_v32, %v2989_v31 }
0x1599   :  { %3484 = vmatmul.msk.bf16.gmra.mxu2 %vm1306_vm0, %v2993_v34 }
0x15fc   :  { %v3017_v8 = vpop.f32.mrf.mxu2 }
0x15fd   :  { %v3018_v40 = vadd.f32 %v3701_v37, %v3017_v8 }
0x15ff   :  { %v3032_v43 = vmax.f32 %v3018_v40, 0.0 }
0x1604   :  { %v3019_v41 = vpop.f32.mrf.mxu2 }
0x1605   :  { %v3020_v42 = vadd.f32 %v3701_v37, %v3019_v41 }
0x1607   :  { %v3033_v44 = vmax.f32 %v3020_v42, 0.0 }
0x1609   :  { %v3038_v46 = vpack.c.bf16 %v3033_v44, %v3032_v43  ;;  %v3528_v44 = vld [vmem:[%s6246_s24 + $0x10] sm:$0xff]  }
0x160b   :  { %3485 = vmatmul.msk.bf16.vlgmr.msrb.gmra.mxu0 %vm1388_vm1, %v3038_v46 }
0x160c   :  { %v3022_v48 = vpop.f32.mrf.mxu2 }
0x160d   :  { %v3023_v49 = vadd.f32 %v3701_v37, %v3022_v48  ;;  %v3518_v48 = vunpack.c.h.bf16 %v3528_v44 }
0x160f   :  { %v3034_v52 = vmax.f32 %v3023_v49, 0.0 }
0x1614   :  { %v3024_v50 = vpop.f32.mrf.mxu2 }
0x1615   :  { %v3025_v51 = vadd.f32 %v3701_v37, %v3024_v50  ;;  %v3517_v50 = vunpack.c.l.bf16 %v3528_v44 }
0x1617   :  { %v3035_v54 = vmax.f32 %v3025_v51, 0.0 }
0x1619   :  { %v3039_v55 = vpack.c.bf16 %v3035_v54, %v3034_v52 }
0x161b   :  { %3486 = vmatmul.msk.bf16.gmra.mxu0 %vm1388_vm1, %v3039_v55 }
0x161c   :  { %v3027_v56 = vpop.f32.mrf.mxu2 }
0x161d   :  { %v3028_v57 = vadd.f32 %v3701_v37, %v3027_v56 }
0x161f   :  { %v3036_v62 = vmax.f32 %v3028_v57, 0.0 }
0x1624   :  { %v3029_v60 = vpop.f32.mrf.mxu2 }
0x1625   :  { %v3030_v61 = vadd.f32 %v3701_v37, %v3029_v60 }
0x1627   :  { %v3037_v63 = vmax.f32 %v3030_v61, 0.0  ;;  %v3527_v61 = vld [vmem:[%s6246_s24 + $0x8] sm:$0xff]  }
0x1628   :  { %v3513_v5 = vunpack.c.l.bf16 %v3527_v61 }
0x1629   :  { %v3040_v0 = vpack.c.bf16 %v3037_v63, %v3036_v62  ;;  %v3508_v62 = vld [vmem:[%s6246_s24] sm:$0xff]  }
0x162b   :  { %3487 = vmatmul.msk.bf16.gmra.mxu0 %vm1388_vm1, %v3040_v0 }
0x1688   :  { %v3063_v7 = vpop.f32.mrf.mxu0 }
0x1689   :  { %v3064_v45 = vadd.f32 %v3702_v10, %v3063_v7 }
0x168b   :  { %v3078_v12 = vmax.f32 %v3064_v45, 0.0 }
0x1690   :  { %v3065_v6 = vpop.f32.mrf.mxu0 }
0x1691   :  { %v3066_v11 = vadd.f32 %v3702_v10, %v3065_v6  ;;  %v3510_v6 = vunpack.c.h.bf16 %v3508_v62 }
0x1693   :  { %v3079_v13 = vmax.f32 %v3066_v11, 0.0 }
0x1695   :  { %v3084_v14 = vpack.c.bf16 %v3079_v13, %v3078_v12  ;;  %v3509_v12 = vunpack.c.l.bf16 %v3508_v62 }
0x1697   :  { %3488 = vmatmul.msk.bf16.vlgmr.msrb.gmra.mxu1 %vm2018_vm5, %v3084_v14 }
0x1698   :  { %v3068_v15 = vpop.f32.mrf.mxu0 }
0x1699   :  { %v3069_v16 = vadd.f32 %v3702_v10, %v3068_v15 }
0x169b   :  { %v3080_v23 = vmax.f32 %v3069_v16, 0.0 }
0x16a0   :  { %v3070_v17 = vpop.f32.mrf.mxu0 }
0x16a1   :  { %v3071_v18 = vadd.f32 %v3702_v10, %v3070_v17 }
0x16a3   :  { %v3081_v19 = vmax.f32 %v3071_v18, 0.0 }
0x16a5   :  { %v3085_v9 = vpack.c.bf16 %v3081_v19, %v3080_v23 }
0x16a7   :  { %3489 = vmatmul.msk.bf16.gmra.mxu1 %vm2018_vm5, %v3085_v9  ;;  %v3502_v9 = vld [vmem:[#allocation12] sm:$0xff] }
0x16a8   :  { %v3073_v30 = vpop.f32.mrf.mxu0 }
0x16a9   :  { %v3074_v53 = vadd.f32 %v3702_v10, %v3073_v30 }
0x16ab   :  { %v3082_v33 = vmax.f32 %v3074_v53, 0.0 }
0x16b0   :  { %v3075_v20 = vpop.f32.mrf.mxu0 }
0x16b1   :  { %v3076_v21 = vadd.f32 %v3702_v10, %v3075_v20  ;;  %v3514_v10 = vunpack.c.h.bf16 %v3527_v61 }
0x16b3   :  { %v3083_v26 = vmax.f32 %v3076_v21, 0.0 }
0x16b5   :  { %v3086_v59 = vpack.c.bf16 %v3083_v26, %v3082_v33 }
0x16b7   :  { %3490 = vmatmul.msk.bf16.gmra.mxu1 %vm2018_vm5, %v3086_v59 }
0x1714   :  { %v3112_v24 = vpop.f32.mrf.mxu1 }
0x1715   :  { %v3113_v37 = vadd.f32 %v3703_v1, %v3112_v24 }
0x1717   :  { %v3127_v40 = vpack.c.bf16 %v3113_v37, %v3113_v37 }
0x171c   :  { %v3114_v3 = vpop.f32.mrf.mxu1 }
0x171d   :  { %v3115_v28 = vadd.f32 %v3703_v1, %v3114_v3 }
0x171f   :  { %v3128_v38 = vpack.c.bf16 %v3115_v28, %v3115_v28 }
0x1724   :  { %v3117_v25 = vpop.f32.mrf.mxu1 }
0x1725   :  { %v3118_v27 = vadd.f32 %v3703_v1, %v3117_v25 }
0x1727   :  { %v3129_v58 = vpack.c.bf16 %v3118_v27, %v3118_v27 }
0x1729   :  { %3153 = vperm.xlu0 %3675, %v3129_v58  }
0x172c   :  { %v3119_v29 = vpop.f32.mrf.mxu1 }
0x172d   :  { %v3120_v34 = vadd.f32 %v3703_v1, %v3119_v29 }
0x172f   :  { %v3130_v47 = vpack.c.bf16 %v3120_v34, %v3120_v34 }
0x1731   :  { %3144 = vperm.xlu0 %3675, %v3128_v38  }
0x1734   :  { %v3122_v39 = vpop.f32.mrf.mxu1 }
0x1735   :  { %v3123_v31 = vadd.f32 %v3703_v1, %v3122_v39 }
0x1737   :  { %v3131_v32 = vpack.c.bf16 %v3123_v31, %v3123_v31 }
0x1739   :  { %3171 = vperm.xlu1 %3672, %v3131_v32  }
0x173c   :  { %v3124_v35 = vpop.f32.mrf.mxu1 }
0x173d   :  { %v3125_v36 = vadd.f32 %v3703_v1, %v3124_v35 }
0x173f   :  { %v3132_v8 = vpack.c.bf16 %v3125_v36, %v3125_v36 }
0x1741   :  { %3180 = vperm.xlu2 %3674, %v3132_v8   ;;  %3162 = vperm.xlu1 %3672, %v3130_v47  }
0x1749   :  { %3135 = vperm.xlu2 %3674, %v3127_v40  }
0x179b   :  { %v3181_v41 = vpop.permute.xlu2 %3180  ;;  %v3154_v42 = vpop.permute.xlu0 %3153 }
0x179c   :  { %v3186_v43 = vperm.slane %v3181_v41, %v5859_v22  ;;  %v3159_v57 = vperm.slane %v3154_v42, %v5859_v22 }
0x179e   :  { %v3192_v49 = vunpack.c.l.bf16 %v3186_v43  ;;  %v3189_v7 = vunpack.c.l.bf16 %v3159_v57 }
0x17a0   :  { %v3204_v56 = vmul.f32 %v3518_v48, %v3192_v49  ;;  %v3201_v15 = vmul.f32 %v3513_v5, %v3189_v7 }
0x17a3   :  { %v3145_v54 = vpop.permute.xlu0 %3144  ;;  %v3136_v55 = vpop.permute.xlu2 %3135 }
0x17a4   :  { %v3150_v63 = vperm.slane %v3145_v54, %v5859_v22  ;;  %v3141_v0 = vperm.slane %v3136_v55, %v5859_v22 }
0x17a6   :  { %v3188_v11 = vunpack.c.l.bf16 %v3150_v63  ;;  %v3187_v13 = vunpack.c.l.bf16 %v3141_v0 }
0x17a8   :  { %v3200_v17 = vmul.f32 %v3510_v6, %v3188_v11  ;;  %v3199_v18 = vmul.f32 %v3509_v12, %v3187_v13 }
0x17aa   :  { %v3205_v19 = vpack.c.bf16 %v3200_v17, %v3199_v18 }
0x17ab   :  { %v3172_v46 = vpop.permute.xlu1 %3171 }
0x17ac   :  { %v3177_v51 = vperm.slane %v3172_v46, %v5859_v22 }
0x17ae   :  { %v3191_v52 = vunpack.c.l.bf16 %v3177_v51 }
0x17b0   :  { %v3203_v60 = vmul.f32 %v3517_v50, %v3191_v52 }
0x17b2   :  { %v3207_v2 = vpack.c.bf16 %v3204_v56, %v3203_v60 }
0x17b3   :  { %v3163_v4 = vpop.permute.xlu1 %3162 }
0x17b4   :  { %v3168_v45 = vperm.slane %v3163_v4, %v5859_v22  ;;  %3221 = vmatpush.bf16.msrb.mxu3 %v3207_v2 }
0x17b6   :  { %v3190_v14 = vunpack.c.l.bf16 %v3168_v45 }
0x17b8   :  { %v3202_v16 = vmul.f32 %v3514_v10, %v3190_v14 }
0x17ba   :  { %v3206_v23 = vpack.c.bf16 %v3202_v16, %v3201_v15 }
0x17bc   :  { %3222 = vmatpush.bf16.msrb.mxu3 %v3206_v23 }
0x17c0   :  { %3223 = vmatpush.bf16.msrb.mxu3 %v3205_v19 }
0x17c3   :  { %3495 = vmatmul.msk.bf16.vlgmr.msrb.gmra.mxu3 %vm1835_vm2, %v3502_v9 }
0x17c4   :  { %4865 = shalt.err (!%p4862_p1)
}
0x17c5   :  { %3256 = dma.vmem_to_hbm [thread:$0]  %s3252_s23, 128, %s3254_s26, [#allocation80]  }
0x17c6   :  { %s5078_s1 = smov [#allocation78]   ;;  %s3239_s30 = sshll.u32 %s5460_s25, 4  ;;  %s3240_s30 = int_to_ptr.hbm [resolvable:$true] %s3239_s30 }
0x17c7   :  { %s3237_s9 = sshll.u32 %s5078_s1, 4  ;;  %s4878_s2 = sshra.s32 %s3240_s30, 4  ;;  %s3238_s9 = int_to_ptr.vmem [resolvable:$true] %s3237_s9  ;;  %s4879_s2 = int_to_ptr.hbm [resolvable:$true] %s4878_s2 }
0x17c8   :  { %s4880_s28 = scalar_lea.hbm %s4879_s2, 16  ;;  %s4882_s7 = scalar_lea.hbm %s5460_s25, 16 }
0x17c9   :  { %p4881_p2 = scmp.ne.s32.totalorder %s4879_s2, %s4880_s28  ;;  %p4883_p3 = scmp.lt.s32.totalorder %s4879_s2, %s5460_s25 }
0x17ca   :  { %p4884_p4 = scmp.lt.s32.totalorder %s4882_s7, %s4880_s28 }
0x17cc   :  { %p4885_p5 = por %p4884_p4, %p4883_p3 }
0x17ce   :  { %p4886_p6 = pnand %p4885_p5, %p4881_p2 }
0x1846   :  { %v3225_v22 = vpop.f32.mrf.mxu3 }
0x1847   :  { %3230 = vst [vmem:[#allocation78] sm:$0xff] %v3225_v22 }
0x184e   :  { %v3227_v30 = vpop.f32.mrf.mxu3 }
0x184f   :  { %3231 = vst [vmem:[#allocation78 + $0x8] sm:$0xff] %v3227_v30 }
0x1850   :  { %4889 = shalt.err (!%p4886_p6)
}
0x1851   :  { %3245 = dma.vmem_to_hbm [thread:$0]  %s3238_s9, 256, %s3240_s30, [#allocation8], %s5029_s10, %s5029_s10, %s5030_s16  }
0x1852   :  { %4938 = dma.done.wait [#allocation8], 256  }
0x1853   :  { %4939 = vsyncadd [#allocation8], 4294967040 }
0x1854   :  { %4940 = dma.done.wait [#allocation80], 128  }
0x1855   :  { %4941 = vsyncadd [#allocation80], 4294967168 }
0x1856   :  { %3265 = vsyncpa [#allocation7], 1 }
0x1857   :  { %3266 = vsyncpa [#allocation10], 1 }
0x1858   :  { %3267 = vsyncpa [#allocation13], 1 }
0x1859   :  { %3268 = vsyncpa [#allocation16], 1 }
0x185a   :  { %3269 = vsyncpa [#allocation19], 1 }
0x185b   :  { %3270 = vsyncpa [#allocation22], 1 }
0x185c   :  { %3271 = vsyncpa [#allocation25], 1 }
0x185d   :  { %3272 = vsyncpa [#allocation28], 1 }
0x185e   :  { %3273 = vsyncpa [#allocation31], 1 }
0x185f   :  { %3274 = vsyncpa [#allocation34], 1 }
0x1860   :  { %3275 = vsyncpa [#allocation37], 1 }
0x1861   :  { %3276 = vsyncpa [#allocation40], 1 }
0x1862   :  { %3277 = vsyncpa [#allocation43], 1 }
0x1863   :  { %3278 = vsyncpa [#allocation46], 1 }
0x1864   :  { %3279 = vsyncpa [#allocation49], 1 }
0x1865   :  { %3280 = vsyncpa [#allocation52], 1 }
0x1866   :  { %3281 = vsyncpa [#allocation55], 1 }
0x1867   :  { %3282 = vsyncpa [#allocation58], 1 }
0x1868   :  { %3283 = vsyncpa [#allocation61], 1 }
0x1869   :  { %3284 = vsyncpa [#allocation64], 1 }
0x186a   :  { %3285 = vsyncpa [#allocation67], 1 }
0x186b   :  { %3286 = vsyncpa [#allocation70], 1 }
0x186c   :  { %3287 = vsyncpa [#allocation73], 1 }
0x186d   :  { %3288 = vsyncpa [#allocation76], 1 }
0x186e   :  { %3289 = vsyncpa [#allocation8], 1 }
0x186f   :  { %3290 = vsyncpa [#allocation80], 1 }

</bundles_post_ra>
